<compile_context>
chip_gen: v6e
topology: v6e:2x2x1
jax: 0.10.0
libtpu: 0.0.40
codegen_flags: <defaults>
</compile_context>

<pallas_src>
import functools

import numpy as np
import jax
import jax.numpy as jnp
from jax.experimental import pallas as pl
from jax.experimental.pallas import tpu as pltpu


# ---------------------------------------------------------------------------
# Static network geometry (28x28 input, conv k=5 pad=1, 2x2 stride-2 pools)
# ---------------------------------------------------------------------------
K = 5              # conv kernel size
C1P = 8            # conv1 out-channels padded 6 -> 8 (lane packing unit)
C2 = 16            # conv2 out-channels
W1 = 30            # padded input width (28 + 2)
HEO = 15           # rows per parity block of the padded input (30 / 2)
HP1 = 13           # pool1 output height/width (conv1 out 26 -> 13)
H2 = 15            # conv2 input height (13 + 2 zero border)
HO2 = 11           # conv2 output height/width
HP2 = 5            # pool2 output height/width
FCP = 128          # lane padding for conv outputs / fc features


# ---------------------------------------------------------------------------
# The fused Pallas kernel
# ---------------------------------------------------------------------------
def _lenet_kernel(x_ref,                      # (N*30, 30) f32: per sample [even rows(15); odd rows(15)]
                  b1_ref, bias1_ref,          # (5, 30, 256) bf16, (1, 128) f32
                  b2_ref, bias2_ref,          # (5, 128, 256) bf16, (1, 128) f32
                  fc1w_ref, fc1b_ref,         # (5, 128, 128) bf16, (1, 128) f32
                  fc2w_ref, fc2b_ref,         # (128, 128) bf16, (1, 128) f32
                  fc3w_ref, fc3b_ref,         # (128, 128) bf16, (1, 128) f32
                  out_ref,                    # (N, 128) f32
                  p1_ref,                     # scratch (N*15, 128) f32
                  h_ref,                      # scratch (N, 128) f32
                  *, n_batch):
    f32 = jnp.float32
    bf16 = jnp.bfloat16
    zrow = jnp.zeros((1, FCP), f32)

    # NOTE: for batch > ~4 this python loop should become a grid axis with
    # dimension_semantics=("parallel",); at N=2 a single grid-less invocation
    # keeps all weights VMEM-resident and is optimal.
    for n in range(n_batch):
        # ---------------- conv1 + full 2x2 pool1 ---------------------------
        eb = n * (2 * HEO)                 # even-row block of this sample
        ob = eb + HEO                      # odd-row block
        xe = [x_ref[eb + k: eb + k + HP1, :].astype(bf16) for k in range(3)]
        xo = [x_ref[ob + k: ob + k + HP1, :].astype(bf16) for k in range(3)]
        # Row r of taps0[di] is padded-input row (2r+di); of taps1[di] it is
        # row (2r+1+di): the pool's row direction lives in the two
        # accumulators, its column direction in the two 128-lane RHS halves.
        taps0 = (xe[0], xo[0], xe[1], xo[1], xe[2])
        taps1 = (xo[0], xe[1], xo[1], xe[2], xo[2])
        acc0 = jnp.zeros((HP1, 2 * FCP), f32)
        acc1 = jnp.zeros((HP1, 2 * FCP), f32)
        for di in range(K):
            w = b1_ref[di]
            acc0 = acc0 + jnp.dot(taps0[di], w, preferred_element_type=f32)
            acc1 = acc1 + jnp.dot(taps1[di], w, preferred_element_type=f32)
        m = jnp.maximum(acc0, acc1)                                  # pool rows
        s1 = jnp.maximum(jnp.maximum(m[:, :FCP], m[:, FCP:])        # pool cols
                         + bias1_ref[...], 0.0)                      # (13, 128)

        # conv2 input block: rows 0 / 14 are the zero border; rows 1..13 get
        # the pooled conv1 output in ONE dense 128-lane store (its lane
        # padding already carries conv2's zero left/right border).
        p1_ref[n * H2: n * H2 + 1, :] = zrow
        p1_ref[n * H2 + 1: n * H2 + 1 + HP1, :] = s1
        p1_ref[n * H2 + H2 - 1: n * H2 + H2, :] = zrow

        # ---------------- conv2 + pool2 column direction -------------------
        acc2 = jnp.zeros((HO2, 2 * FCP), f32)
        for di in range(K):
            lhs = p1_ref[n * H2 + di: n * H2 + di + HO2, :].astype(bf16)
            acc2 = acc2 + jnp.dot(lhs, b2_ref[di], preferred_element_type=f32)
        s2 = jnp.maximum(jnp.maximum(acc2[:, :FCP], acc2[:, FCP:])
                         + bias2_ref[...], 0.0)                      # (11, 128)

        # -------- pool2 row direction folded into the fc1 contraction ------
        h = jnp.zeros((1, FCP), f32)
        for io2 in range(HP2):
            pr = jnp.maximum(s2[2 * io2: 2 * io2 + 1, :],
                             s2[2 * io2 + 1: 2 * io2 + 2, :])        # (1, 128)
            h = h + jnp.dot(pr.astype(bf16), fc1w_ref[io2],
                            preferred_element_type=f32)
        h_ref[n: n + 1, :] = h

    # -------- batched fc chain: one lane-dense (N,128) output store --------
    h1 = jnp.maximum(h_ref[...] + fc1b_ref[...], 0.0)
    h2 = jnp.maximum(jnp.dot(h1.astype(bf16), fc2w_ref[...],
                             preferred_element_type=f32) + fc2b_ref[...], 0.0)
    out_ref[...] = jnp.dot(h2.astype(bf16), fc3w_ref[...],
                           preferred_element_type=f32) + fc3b_ref[...]


# ---------------------------------------------------------------------------
# One-time parameter packing (Toeplitz conv weights, fc transposes, bf16)
# ---------------------------------------------------------------------------
def pack_params(params):
    w1 = np.asarray(params["conv1_w"], np.float32)   # (6,1,5,5)  OIHW
    c1b = np.asarray(params["conv1_b"], np.float32)
    w2 = np.asarray(params["conv2_w"], np.float32)   # (16,6,5,5)
    c2b = np.asarray(params["conv2_b"], np.float32)
    fc1w = np.asarray(params["fc1_w"], np.float32)   # (120,400) (out,in)
    fc1b = np.asarray(params["fc1_b"], np.float32)
    fc2w = np.asarray(params["fc2_w"], np.float32)   # (84,120)
    fc2b = np.asarray(params["fc2_b"], np.float32)
    fc3w = np.asarray(params["fc3_w"], np.float32)   # (10,84)
    fc3b = np.asarray(params["fc3_b"], np.float32)

    # conv1: Toeplitz over width; even/odd output columns in the two 128-lane
    # halves; pooled column jo lands at lane offset (jo+1)*8 so the pooled row
    # directly carries conv2's zero left/right border columns.
    b1p = np.zeros((K, W1, 2 * FCP), np.float32)
    bias1 = np.zeros((1, FCP), np.float32)
    for jo in range(HP1):
        lane = (jo + 1) * C1P
        bias1[0, lane: lane + 6] = c1b
        for par in range(2):
            j = 2 * jo + par
            for di in range(K):
                for dj in range(K):
                    b1p[di, j + dj,
                        par * FCP + lane: par * FCP + lane + 6] = w1[:, 0, di, dj]

    # conv2: same trick on the (15 cols x 8 ch = 120 -> 128)-lane p1 layout.
    b2p = np.zeros((K, FCP, 2 * FCP), np.float32)
    bias2 = np.zeros((1, FCP), np.float32)
    for jo2 in range(HP2):
        lane = jo2 * C2
        bias2[0, lane: lane + C2] = c2b
        for par in range(2):
            j2 = 2 * jo2 + par
            for di in range(K):
                for dj in range(K):
                    jj = j2 + dj
                    for ci in range(6):
                        b2p[di, jj * C1P + ci,
                            par * FCP + lane: par * FCP + lane + C2] = w2[:, ci, di, dj]

    # fc1: fold PyTorch's NCHW flatten order (co*25 + io*5 + jo); pad 120->128.
    fc1wp = np.zeros((HP2, FCP, FCP), np.float32)
    for io2 in range(HP2):
        for jo2 in range(HP2):
            for co in range(C2):
                fc1wp[io2, jo2 * C2 + co, :120] = fc1w[:, co * 25 + io2 * 5 + jo2]
    fc1bp = np.zeros((1, FCP), np.float32); fc1bp[0, :120] = fc1b
    fc2wp = np.zeros((FCP, FCP), np.float32); fc2wp[:120, :84] = fc2w.T
    fc2bp = np.zeros((1, FCP), np.float32); fc2bp[0, :84] = fc2b
    fc3wp = np.zeros((FCP, FCP), np.float32); fc3wp[:84, :10] = fc3w.T
    fc3bp = np.zeros((1, FCP), np.float32); fc3bp[0, :10] = fc3b

    bf16 = jnp.bfloat16
    return dict(
        b1=jnp.asarray(b1p, bf16), bias1=jnp.asarray(bias1),
        b2=jnp.asarray(b2p, bf16), bias2=jnp.asarray(bias2),
        fc1w=jnp.asarray(fc1wp, bf16), fc1b=jnp.asarray(fc1bp),
        fc2w=jnp.asarray(fc2wp, bf16), fc2b=jnp.asarray(fc2bp),
        fc3w=jnp.asarray(fc3wp, bf16), fc3b=jnp.asarray(fc3bp),
    )


# ---------------------------------------------------------------------------
# Forward wrapper
# ---------------------------------------------------------------------------
@functools.partial(jax.jit, static_argnames=("n_batch",))
def _lenet_pallas(packed, x_l, *, n_batch):
    flops = 2 * n_batch * (
        2 * K * HP1 * W1 * (2 * FCP)       # conv1 (+pool) matmuls
        + K * HO2 * FCP * (2 * FCP)        # conv2 (+pool-j) matmuls
        + HP2 * FCP * FCP                  # fc1
        + 2 * FCP * FCP)                   # fc2 + fc3
    bytes_accessed = int(
        x_l.size * x_l.dtype.itemsize
        + sum(int(v.size) * v.dtype.itemsize for v in packed.values())
        + n_batch * FCP * 4)
    vmem = pl.BlockSpec(memory_space=pltpu.MemorySpace.VMEM)
    return pl.pallas_call(
        functools.partial(_lenet_kernel, n_batch=n_batch),
        out_shape=jax.ShapeDtypeStruct((n_batch, FCP), jnp.float32),
        in_specs=[vmem] * 11,
        out_specs=vmem,
        scratch_shapes=[pltpu.VMEM((n_batch * H2, FCP), jnp.float32),
                        pltpu.VMEM((n_batch, FCP), jnp.float32)],
        cost_estimate=pl.CostEstimate(flops=flops, transcendentals=0,
                                      bytes_accessed=bytes_accessed),
    )(x_l,
      packed["b1"], packed["bias1"],
      packed["b2"], packed["bias2"],
      packed["fc1w"], packed["fc1b"],
      packed["fc2w"], packed["fc2b"],
      packed["fc3w"], packed["fc3b"])


def lenet_forward(packed, x_nchw):
    n = x_nchw.shape[0]
    xp = jnp.pad(x_nchw[:, 0, :, :].astype(jnp.float32),
                 ((0, 0), (1, 1), (1, 1)))                      # (N, 30, 30)
    # Per-sample row-parity split: [even rows (15); odd rows (15)] so every
    # conv1 tap's LHS inside the kernel is a contiguous 13-row slice and the
    # pool's row direction needs no strided access (layout plumbing only).
    x_eo = jnp.stack([xp[:, 0::2, :], xp[:, 1::2, :]], axis=1)  # (N,2,15,30)
    x_l = x_eo.reshape(n * 2 * HEO, W1)
    out = _lenet_pallas(packed, x_l, n_batch=n)
    return out[:, :10]


# ---------------------------------------------------------------------------
# Deterministic synthetic parameters (PyTorch layout)
# ---------------------------------------------------------------------------
def init_params(key):
    ks = jax.random.split(key, 10)
    s = 0.1
    return {
        "conv1_w": jax.random.normal(ks[0], (6, 1, 5, 5), jnp.float32) * s,
        "conv1_b": jax.random.normal(ks[1], (6,), jnp.float32) * s,
        "conv2_w": jax.random.normal(ks[2], (16, 6, 5, 5), jnp.float32) * s,
        "conv2_b": jax.random.normal(ks[3], (16,), jnp.float32) * s,
        "fc1_w": jax.random.normal(ks[4], (120, 400), jnp.float32) * s,  # (out,in)
        "fc1_b": jax.random.normal(ks[5], (120,), jnp.float32) * s,
        "fc2_w": jax.random.normal(ks[6], (84, 120), jnp.float32) * s,
        "fc2_b": jax.random.normal(ks[7], (84,), jnp.float32) * s,
        "fc3_w": jax.random.normal(ks[8], (10, 84), jnp.float32) * s,
        "fc3_b": jax.random.normal(ks[9], (10,), jnp.float32) * s,
    }


# ---------------------------------------------------------------------------
# Pure-JAX reference (correctness check only)
# ---------------------------------------------------------------------------
def lenet_reference(params, x_nchw):
    def conv(x, w, b, pad):
        y = jax.lax.conv_general_dilated(
            x, w, window_strides=(1, 1), padding=[(pad, pad), (pad, pad)],
            dimension_numbers=("NCHW", "OIHW", "NCHW"))
        return jax.nn.relu(y + b[None, :, None, None])

    def pool(x):
        return jax.lax.reduce_window(
            x, -jnp.inf, jax.lax.max,
            window_dimensions=(1, 1, 2, 2), window_strides=(1, 1, 2, 2),
            padding="VALID")

    x = pool(conv(x_nchw, params["conv1_w"], params["conv1_b"], 1))
    x = pool(conv(x, params["conv2_w"], params["conv2_b"], 1))
    x = x.reshape(-1, 16 * 5 * 5)
    x = jax.nn.relu(x @ params["fc1_w"].T + params["fc1_b"])
    x = jax.nn.relu(x @ params["fc2_w"].T + params["fc2_b"])
    return x @ params["fc3_w"].T + params["fc3_b"]


if __name__ == "__main__":
    key = jax.random.PRNGKey(0)
    pkey, xkey = jax.random.split(key)
    params = init_params(pkey)
    packed = pack_params(params)

    # batch=2, 1 channel, 28x28 (spatial size implied by the 16*5*5 flatten).
    x = jax.random.normal(xkey, (2, 1, 28, 28), jnp.float32)

    out = jax.block_until_ready(lenet_forward(packed, x))
    ref = jax.block_until_ready(lenet_reference(params, x))

    assert out.shape == (2, 10), out.shape
    err = float(jnp.max(jnp.abs(out - ref)))
    # bf16 weights/activations: tolerance loosened vs the f32 version.
    assert jnp.allclose(out, ref, rtol=3e-2, atol=3e-2), err
    print("KERNEL_OK")
</pallas_src>

<mosaic_0001>
module attributes {stable_mosaic.version = 11 : i64} {
  func.func @_lenet_kernel(%arg0: memref<60x30xf32, #tpu.memory_space<vmem>>, %arg1: memref<5x30x256xbf16, #tpu.memory_space<vmem>>, %arg2: memref<1x128xf32, #tpu.memory_space<vmem>>, %arg3: memref<5x128x256xbf16, #tpu.memory_space<vmem>>, %arg4: memref<1x128xf32, #tpu.memory_space<vmem>>, %arg5: memref<5x128x128xbf16, #tpu.memory_space<vmem>>, %arg6: memref<1x128xf32, #tpu.memory_space<vmem>>, %arg7: memref<128x128xbf16, #tpu.memory_space<vmem>>, %arg8: memref<1x128xf32, #tpu.memory_space<vmem>>, %arg9: memref<128x128xbf16, #tpu.memory_space<vmem>>, %arg10: memref<1x128xf32, #tpu.memory_space<vmem>>, %arg11: memref<2x128xf32, #tpu.memory_space<vmem>>, %arg12: memref<30x128xf32, #tpu.memory_space<vmem>>, %arg13: memref<2x128xf32, #tpu.memory_space<vmem>>) attributes {dimension_semantics = [], scalar_prefetch = 0 : i64, scratch_operands = 2 : i64, tpu.core_type = #tpu.core_type<tc>} {
    %cst = arith.constant 0.000000e+00 : f32
    %0 = vector.broadcast %cst : f32 to vector<1x128xf32>
    %c0 = arith.constant 0 : index
    %c0_0 = arith.constant 0 : index
    %1 = vector.load %arg0[%c0, %c0_0] : memref<60x30xf32, #tpu.memory_space<vmem>>, vector<13x30xf32>
    %2 = arith.truncf %1 : vector<13x30xf32> to vector<13x30xbf16>
    %c1 = arith.constant 1 : index
    %c0_1 = arith.constant 0 : index
    %3 = vector.load %arg0[%c1, %c0_1] : memref<60x30xf32, #tpu.memory_space<vmem>>, vector<13x30xf32>
    %4 = arith.truncf %3 : vector<13x30xf32> to vector<13x30xbf16>
    %c2 = arith.constant 2 : index
    %c0_2 = arith.constant 0 : index
    %5 = vector.load %arg0[%c2, %c0_2] : memref<60x30xf32, #tpu.memory_space<vmem>>, vector<13x30xf32>
    %6 = arith.truncf %5 : vector<13x30xf32> to vector<13x30xbf16>
    %c15 = arith.constant 15 : index
    %c0_3 = arith.constant 0 : index
    %7 = vector.load %arg0[%c15, %c0_3] : memref<60x30xf32, #tpu.memory_space<vmem>>, vector<13x30xf32>
    %8 = arith.truncf %7 : vector<13x30xf32> to vector<13x30xbf16>
    %c16 = arith.constant 16 : index
    %c0_4 = arith.constant 0 : index
    %9 = vector.load %arg0[%c16, %c0_4] : memref<60x30xf32, #tpu.memory_space<vmem>>, vector<13x30xf32>
    %10 = arith.truncf %9 : vector<13x30xf32> to vector<13x30xbf16>
    %c17 = arith.constant 17 : index
    %c0_5 = arith.constant 0 : index
    %11 = vector.load %arg0[%c17, %c0_5] : memref<60x30xf32, #tpu.memory_space<vmem>>, vector<13x30xf32>
    %12 = arith.truncf %11 : vector<13x30xf32> to vector<13x30xbf16>
    %cst_6 = arith.constant 0.000000e+00 : f32
    %13 = vector.broadcast %cst_6 : f32 to vector<13x256xf32>
    %cst_7 = arith.constant 0.000000e+00 : f32
    %14 = vector.broadcast %cst_7 : f32 to vector<13x256xf32>
    %c0_8 = arith.constant 0 : index
    %c0_9 = arith.constant 0 : index
    %c0_10 = arith.constant 0 : index
    %15 = vector.load %arg1[%c0_8, %c0_9, %c0_10] : memref<5x30x256xbf16, #tpu.memory_space<vmem>>, vector<1x30x256xbf16>
    %16 = vector.shape_cast %15 : vector<1x30x256xbf16> to vector<30x256xbf16>
    %cst_11 = arith.constant dense<0.000000e+00> : vector<13x256xf32>
    %17 = tpu.matmul %2, %16, %cst_11 {dimension_numbers = #tpu.dot_dimension_numbers<[1], [0], [0], [1], [0, 0, 1, 1], [], []>} : vector<13x30xbf16>, vector<30x256xbf16>, vector<13x256xf32> -> vector<13x256xf32>
    %18 = arith.addf %13, %17 : vector<13x256xf32>
    %cst_12 = arith.constant dense<0.000000e+00> : vector<13x256xf32>
    %19 = tpu.matmul %8, %16, %cst_12 {dimension_numbers = #tpu.dot_dimension_numbers<[1], [0], [0], [1], [0, 0, 1, 1], [], []>} : vector<13x30xbf16>, vector<30x256xbf16>, vector<13x256xf32> -> vector<13x256xf32>
    %20 = arith.addf %14, %19 : vector<13x256xf32>
    %c1_13 = arith.constant 1 : index
    %c0_14 = arith.constant 0 : index
    %c0_15 = arith.constant 0 : index
    %21 = vector.load %arg1[%c1_13, %c0_14, %c0_15] : memref<5x30x256xbf16, #tpu.memory_space<vmem>>, vector<1x30x256xbf16>
    %22 = vector.shape_cast %21 : vector<1x30x256xbf16> to vector<30x256xbf16>
    %cst_16 = arith.constant dense<0.000000e+00> : vector<13x256xf32>
    %23 = tpu.matmul %8, %22, %cst_16 {dimension_numbers = #tpu.dot_dimension_numbers<[1], [0], [0], [1], [0, 0, 1, 1], [], []>} : vector<13x30xbf16>, vector<30x256xbf16>, vector<13x256xf32> -> vector<13x256xf32>
    %24 = arith.addf %18, %23 : vector<13x256xf32>
    %cst_17 = arith.constant dense<0.000000e+00> : vector<13x256xf32>
    %25 = tpu.matmul %4, %22, %cst_17 {dimension_numbers = #tpu.dot_dimension_numbers<[1], [0], [0], [1], [0, 0, 1, 1], [], []>} : vector<13x30xbf16>, vector<30x256xbf16>, vector<13x256xf32> -> vector<13x256xf32>
    %26 = arith.addf %20, %25 : vector<13x256xf32>
    %c2_18 = arith.constant 2 : index
    %c0_19 = arith.constant 0 : index
    %c0_20 = arith.constant 0 : index
    %27 = vector.load %arg1[%c2_18, %c0_19, %c0_20] : memref<5x30x256xbf16, #tpu.memory_space<vmem>>, vector<1x30x256xbf16>
    %28 = vector.shape_cast %27 : vector<1x30x256xbf16> to vector<30x256xbf16>
    %cst_21 = arith.constant dense<0.000000e+00> : vector<13x256xf32>
    %29 = tpu.matmul %4, %28, %cst_21 {dimension_numbers = #tpu.dot_dimension_numbers<[1], [0], [0], [1], [0, 0, 1, 1], [], []>} : vector<13x30xbf16>, vector<30x256xbf16>, vector<13x256xf32> -> vector<13x256xf32>
    %30 = arith.addf %24, %29 : vector<13x256xf32>
    %cst_22 = arith.constant dense<0.000000e+00> : vector<13x256xf32>
    %31 = tpu.matmul %10, %28, %cst_22 {dimension_numbers = #tpu.dot_dimension_numbers<[1], [0], [0], [1], [0, 0, 1, 1], [], []>} : vector<13x30xbf16>, vector<30x256xbf16>, vector<13x256xf32> -> vector<13x256xf32>
    %32 = arith.addf %26, %31 : vector<13x256xf32>
    %c3 = arith.constant 3 : index
    %c0_23 = arith.constant 0 : index
    %c0_24 = arith.constant 0 : index
    %33 = vector.load %arg1[%c3, %c0_23, %c0_24] : memref<5x30x256xbf16, #tpu.memory_space<vmem>>, vector<1x30x256xbf16>
    %34 = vector.shape_cast %33 : vector<1x30x256xbf16> to vector<30x256xbf16>
    %cst_25 = arith.constant dense<0.000000e+00> : vector<13x256xf32>
    %35 = tpu.matmul %10, %34, %cst_25 {dimension_numbers = #tpu.dot_dimension_numbers<[1], [0], [0], [1], [0, 0, 1, 1], [], []>} : vector<13x30xbf16>, vector<30x256xbf16>, vector<13x256xf32> -> vector<13x256xf32>
    %36 = arith.addf %30, %35 : vector<13x256xf32>
    %cst_26 = arith.constant dense<0.000000e+00> : vector<13x256xf32>
    %37 = tpu.matmul %6, %34, %cst_26 {dimension_numbers = #tpu.dot_dimension_numbers<[1], [0], [0], [1], [0, 0, 1, 1], [], []>} : vector<13x30xbf16>, vector<30x256xbf16>, vector<13x256xf32> -> vector<13x256xf32>
    %38 = arith.addf %32, %37 : vector<13x256xf32>
    %c4 = arith.constant 4 : index
    %c0_27 = arith.constant 0 : index
    %c0_28 = arith.constant 0 : index
    %39 = vector.load %arg1[%c4, %c0_27, %c0_28] : memref<5x30x256xbf16, #tpu.memory_space<vmem>>, vector<1x30x256xbf16>
    %40 = vector.shape_cast %39 : vector<1x30x256xbf16> to vector<30x256xbf16>
    %cst_29 = arith.constant dense<0.000000e+00> : vector<13x256xf32>
    %41 = tpu.matmul %6, %40, %cst_29 {dimension_numbers = #tpu.dot_dimension_numbers<[1], [0], [0], [1], [0, 0, 1, 1], [], []>} : vector<13x30xbf16>, vector<30x256xbf16>, vector<13x256xf32> -> vector<13x256xf32>
    %42 = arith.addf %36, %41 : vector<13x256xf32>
    %cst_30 = arith.constant dense<0.000000e+00> : vector<13x256xf32>
    %43 = tpu.matmul %12, %40, %cst_30 {dimension_numbers = #tpu.dot_dimension_numbers<[1], [0], [0], [1], [0, 0, 1, 1], [], []>} : vector<13x30xbf16>, vector<30x256xbf16>, vector<13x256xf32> -> vector<13x256xf32>
    %44 = arith.addf %38, %43 : vector<13x256xf32>
    %45 = arith.maximumf %42, %44 : vector<13x256xf32>
    %46 = vector.extract_strided_slice %45 {offsets = [0, 0], sizes = [13, 128], strides = [1, 1]} : vector<13x256xf32> to vector<13x128xf32>
    %47 = vector.extract_strided_slice %45 {offsets = [0, 128], sizes = [13, 128], strides = [1, 1]} : vector<13x256xf32> to vector<13x128xf32>
    %48 = arith.maximumf %46, %47 : vector<13x128xf32>
    %c0_31 = arith.constant 0 : index
    %c0_32 = arith.constant 0 : index
    %49 = vector.load %arg2[%c0_31, %c0_32] : memref<1x128xf32, #tpu.memory_space<vmem>>, vector<1x128xf32>
    %50 = vector.broadcast %49 : vector<1x128xf32> to vector<13x128xf32>
    %51 = arith.addf %48, %50 : vector<13x128xf32>
    %cst_33 = arith.constant 0.000000e+00 : f32
    %52 = vector.broadcast %cst_33 : f32 to vector<13x128xf32>
    %53 = arith.maximumf %51, %52 : vector<13x128xf32>
    %c0_34 = arith.constant 0 : index
    %c0_35 = arith.constant 0 : index
    %54 = vector.load %arg12[%c0_34, %c0_35] : memref<30x128xf32, #tpu.memory_space<vmem>>, vector<1x128xf32>
    tpu.vector_store %arg12[%c0_34, %c0_35], %0 {strides = array<i32>} : memref<30x128xf32, #tpu.memory_space<vmem>>, vector<1x128xf32>,
    %c1_36 = arith.constant 1 : index
    %c0_37 = arith.constant 0 : index
    %55 = vector.load %arg12[%c1_36, %c0_37] : memref<30x128xf32, #tpu.memory_space<vmem>>, vector<13x128xf32>
    tpu.vector_store %arg12[%c1_36, %c0_37], %53 {strides = array<i32>} : memref<30x128xf32, #tpu.memory_space<vmem>>, vector<13x128xf32>,
    %c14 = arith.constant 14 : index
    %c0_38 = arith.constant 0 : index
    %56 = vector.load %arg12[%c14, %c0_38] : memref<30x128xf32, #tpu.memory_space<vmem>>, vector<1x128xf32>
    tpu.vector_store %arg12[%c14, %c0_38], %0 {strides = array<i32>} : memref<30x128xf32, #tpu.memory_space<vmem>>, vector<1x128xf32>,
    %cst_39 = arith.constant 0.000000e+00 : f32
    %57 = vector.broadcast %cst_39 : f32 to vector<11x256xf32>
    %c0_40 = arith.constant 0 : index
    %c0_41 = arith.constant 0 : index
    %58 = vector.load %arg12[%c0_40, %c0_41] : memref<30x128xf32, #tpu.memory_space<vmem>>, vector<11x128xf32>
    %59 = arith.truncf %58 : vector<11x128xf32> to vector<11x128xbf16>
    %c0_42 = arith.constant 0 : index
    %c0_43 = arith.constant 0 : index
    %c0_44 = arith.constant 0 : index
    %60 = vector.load %arg3[%c0_42, %c0_43, %c0_44] : memref<5x128x256xbf16, #tpu.memory_space<vmem>>, vector<1x128x256xbf16>
    %61 = vector.shape_cast %60 : vector<1x128x256xbf16> to vector<128x256xbf16>
    %cst_45 = arith.constant dense<0.000000e+00> : vector<11x256xf32>
    %62 = tpu.matmul %59, %61, %cst_45 {dimension_numbers = #tpu.dot_dimension_numbers<[1], [0], [0], [1], [0, 0, 1, 1], [], []>} : vector<11x128xbf16>, vector<128x256xbf16>, vector<11x256xf32> -> vector<11x256xf32>
    %63 = arith.addf %57, %62 : vector<11x256xf32>
    %c1_46 = arith.constant 1 : index
    %c0_47 = arith.constant 0 : index
    %64 = vector.load %arg12[%c1_46, %c0_47] : memref<30x128xf32, #tpu.memory_space<vmem>>, vector<11x128xf32>
    %65 = arith.truncf %64 : vector<11x128xf32> to vector<11x128xbf16>
    %c1_48 = arith.constant 1 : index
    %c0_49 = arith.constant 0 : index
    %c0_50 = arith.constant 0 : index
    %66 = vector.load %arg3[%c1_48, %c0_49, %c0_50] : memref<5x128x256xbf16, #tpu.memory_space<vmem>>, vector<1x128x256xbf16>
    %67 = vector.shape_cast %66 : vector<1x128x256xbf16> to vector<128x256xbf16>
    %cst_51 = arith.constant dense<0.000000e+00> : vector<11x256xf32>
    %68 = tpu.matmul %65, %67, %cst_51 {dimension_numbers = #tpu.dot_dimension_numbers<[1], [0], [0], [1], [0, 0, 1, 1], [], []>} : vector<11x128xbf16>, vector<128x256xbf16>, vector<11x256xf32> -> vector<11x256xf32>
    %69 = arith.addf %63, %68 : vector<11x256xf32>
    %c2_52 = arith.constant 2 : index
    %c0_53 = arith.constant 0 : index
    %70 = vector.load %arg12[%c2_52, %c0_53] : memref<30x128xf32, #tpu.memory_space<vmem>>, vector<11x128xf32>
    %71 = arith.truncf %70 : vector<11x128xf32> to vector<11x128xbf16>
    %c2_54 = arith.constant 2 : index
    %c0_55 = arith.constant 0 : index
    %c0_56 = arith.constant 0 : index
    %72 = vector.load %arg3[%c2_54, %c0_55, %c0_56] : memref<5x128x256xbf16, #tpu.memory_space<vmem>>, vector<1x128x256xbf16>
    %73 = vector.shape_cast %72 : vector<1x128x256xbf16> to vector<128x256xbf16>
    %cst_57 = arith.constant dense<0.000000e+00> : vector<11x256xf32>
    %74 = tpu.matmul %71, %73, %cst_57 {dimension_numbers = #tpu.dot_dimension_numbers<[1], [0], [0], [1], [0, 0, 1, 1], [], []>} : vector<11x128xbf16>, vector<128x256xbf16>, vector<11x256xf32> -> vector<11x256xf32>
    %75 = arith.addf %69, %74 : vector<11x256xf32>
    %c3_58 = arith.constant 3 : index
    %c0_59 = arith.constant 0 : index
    %76 = vector.load %arg12[%c3_58, %c0_59] : memref<30x128xf32, #tpu.memory_space<vmem>>, vector<11x128xf32>
    %77 = arith.truncf %76 : vector<11x128xf32> to vector<11x128xbf16>
    %c3_60 = arith.constant 3 : index
    %c0_61 = arith.constant 0 : index
    %c0_62 = arith.constant 0 : index
    %78 = vector.load %arg3[%c3_60, %c0_61, %c0_62] : memref<5x128x256xbf16, #tpu.memory_space<vmem>>, vector<1x128x256xbf16>
    %79 = vector.shape_cast %78 : vector<1x128x256xbf16> to vector<128x256xbf16>
    %cst_63 = arith.constant dense<0.000000e+00> : vector<11x256xf32>
    %80 = tpu.matmul %77, %79, %cst_63 {dimension_numbers = #tpu.dot_dimension_numbers<[1], [0], [0], [1], [0, 0, 1, 1], [], []>} : vector<11x128xbf16>, vector<128x256xbf16>, vector<11x256xf32> -> vector<11x256xf32>
    %81 = arith.addf %75, %80 : vector<11x256xf32>
    %c4_64 = arith.constant 4 : index
    %c0_65 = arith.constant 0 : index
    %82 = vector.load %arg12[%c4_64, %c0_65] : memref<30x128xf32, #tpu.memory_space<vmem>>, vector<11x128xf32>
    %83 = arith.truncf %82 : vector<11x128xf32> to vector<11x128xbf16>
    %c4_66 = arith.constant 4 : index
    %c0_67 = arith.constant 0 : index
    %c0_68 = arith.constant 0 : index
    %84 = vector.load %arg3[%c4_66, %c0_67, %c0_68] : memref<5x128x256xbf16, #tpu.memory_space<vmem>>, vector<1x128x256xbf16>
    %85 = vector.shape_cast %84 : vector<1x128x256xbf16> to vector<128x256xbf16>
    %cst_69 = arith.constant dense<0.000000e+00> : vector<11x256xf32>
    %86 = tpu.matmul %83, %85, %cst_69 {dimension_numbers = #tpu.dot_dimension_numbers<[1], [0], [0], [1], [0, 0, 1, 1], [], []>} : vector<11x128xbf16>, vector<128x256xbf16>, vector<11x256xf32> -> vector<11x256xf32>
    %87 = arith.addf %81, %86 : vector<11x256xf32>
    %88 = vector.extract_strided_slice %87 {offsets = [0, 0], sizes = [11, 128], strides = [1, 1]} : vector<11x256xf32> to vector<11x128xf32>
    %89 = vector.extract_strided_slice %87 {offsets = [0, 128], sizes = [11, 128], strides = [1, 1]} : vector<11x256xf32> to vector<11x128xf32>
    %90 = arith.maximumf %88, %89 : vector<11x128xf32>
    %c0_70 = arith.constant 0 : index
    %c0_71 = arith.constant 0 : index
    %91 = vector.load %arg4[%c0_70, %c0_71] : memref<1x128xf32, #tpu.memory_space<vmem>>, vector<1x128xf32>
    %92 = vector.broadcast %91 : vector<1x128xf32> to vector<11x128xf32>
    %93 = arith.addf %90, %92 : vector<11x128xf32>
    %cst_72 = arith.constant 0.000000e+00 : f32
    %94 = vector.broadcast %cst_72 : f32 to vector<11x128xf32>
    %95 = arith.maximumf %93, %94 : vector<11x128xf32>
    %cst_73 = arith.constant 0.000000e+00 : f32
    %96 = vector.broadcast %cst_73 : f32 to vector<1x128xf32>
    %97 = vector.extract_strided_slice %95 {offsets = [0, 0], sizes = [1, 128], strides = [1, 1]} : vector<11x128xf32> to vector<1x128xf32>
    %98 = vector.extract_strided_slice %95 {offsets = [1, 0], sizes = [1, 128], strides = [1, 1]} : vector<11x128xf32> to vector<1x128xf32>
    %99 = arith.maximumf %97, %98 : vector<1x128xf32>
    %100 = arith.truncf %99 : vector<1x128xf32> to vector<1x128xbf16>
    %c0_74 = arith.constant 0 : index
    %c0_75 = arith.constant 0 : index
    %c0_76 = arith.constant 0 : index
    %101 = vector.load %arg5[%c0_74, %c0_75, %c0_76] : memref<5x128x128xbf16, #tpu.memory_space<vmem>>, vector<1x128x128xbf16>
    %102 = vector.shape_cast %101 : vector<1x128x128xbf16> to vector<128x128xbf16>
    %cst_77 = arith.constant dense<0.000000e+00> : vector<1x128xf32>
    %103 = tpu.matmul %100, %102, %cst_77 {dimension_numbers = #tpu.dot_dimension_numbers<[1], [0], [0], [1], [0, 0, 1, 1], [], []>} : vector<1x128xbf16>, vector<128x128xbf16>, vector<1x128xf32> -> vector<1x128xf32>
    %104 = arith.addf %96, %103 : vector<1x128xf32>
    %105 = vector.extract_strided_slice %95 {offsets = [2, 0], sizes = [1, 128], strides = [1, 1]} : vector<11x128xf32> to vector<1x128xf32>
    %106 = vector.extract_strided_slice %95 {offsets = [3, 0], sizes = [1, 128], strides = [1, 1]} : vector<11x128xf32> to vector<1x128xf32>
    %107 = arith.maximumf %105, %106 : vector<1x128xf32>
    %108 = arith.truncf %107 : vector<1x128xf32> to vector<1x128xbf16>
    %c1_78 = arith.constant 1 : index
    %c0_79 = arith.constant 0 : index
    %c0_80 = arith.constant 0 : index
    %109 = vector.load %arg5[%c1_78, %c0_79, %c0_80] : memref<5x128x128xbf16, #tpu.memory_space<vmem>>, vector<1x128x128xbf16>
    %110 = vector.shape_cast %109 : vector<1x128x128xbf16> to vector<128x128xbf16>
    %cst_81 = arith.constant dense<0.000000e+00> : vector<1x128xf32>
    %111 = tpu.matmul %108, %110, %cst_81 {dimension_numbers = #tpu.dot_dimension_numbers<[1], [0], [0], [1], [0, 0, 1, 1], [], []>} : vector<1x128xbf16>, vector<128x128xbf16>, vector<1x128xf32> -> vector<1x128xf32>
    %112 = arith.addf %104, %111 : vector<1x128xf32>
    %113 = vector.extract_strided_slice %95 {offsets = [4, 0], sizes = [1, 128], strides = [1, 1]} : vector<11x128xf32> to vector<1x128xf32>
    %114 = vector.extract_strided_slice %95 {offsets = [5, 0], sizes = [1, 128], strides = [1, 1]} : vector<11x128xf32> to vector<1x128xf32>
    %115 = arith.maximumf %113, %114 : vector<1x128xf32>
    %116 = arith.truncf %115 : vector<1x128xf32> to vector<1x128xbf16>
    %c2_82 = arith.constant 2 : index
    %c0_83 = arith.constant 0 : index
    %c0_84 = arith.constant 0 : index
    %117 = vector.load %arg5[%c2_82, %c0_83, %c0_84] : memref<5x128x128xbf16, #tpu.memory_space<vmem>>, vector<1x128x128xbf16>
    %118 = vector.shape_cast %117 : vector<1x128x128xbf16> to vector<128x128xbf16>
    %cst_85 = arith.constant dense<0.000000e+00> : vector<1x128xf32>
    %119 = tpu.matmul %116, %118, %cst_85 {dimension_numbers = #tpu.dot_dimension_numbers<[1], [0], [0], [1], [0, 0, 1, 1], [], []>} : vector<1x128xbf16>, vector<128x128xbf16>, vector<1x128xf32> -> vector<1x128xf32>
    %120 = arith.addf %112, %119 : vector<1x128xf32>
    %121 = vector.extract_strided_slice %95 {offsets = [6, 0], sizes = [1, 128], strides = [1, 1]} : vector<11x128xf32> to vector<1x128xf32>
    %122 = vector.extract_strided_slice %95 {offsets = [7, 0], sizes = [1, 128], strides = [1, 1]} : vector<11x128xf32> to vector<1x128xf32>
    %123 = arith.maximumf %121, %122 : vector<1x128xf32>
    %124 = arith.truncf %123 : vector<1x128xf32> to vector<1x128xbf16>
    %c3_86 = arith.constant 3 : index
    %c0_87 = arith.constant 0 : index
    %c0_88 = arith.constant 0 : index
    %125 = vector.load %arg5[%c3_86, %c0_87, %c0_88] : memref<5x128x128xbf16, #tpu.memory_space<vmem>>, vector<1x128x128xbf16>
    %126 = vector.shape_cast %125 : vector<1x128x128xbf16> to vector<128x128xbf16>
    %cst_89 = arith.constant dense<0.000000e+00> : vector<1x128xf32>
    %127 = tpu.matmul %124, %126, %cst_89 {dimension_numbers = #tpu.dot_dimension_numbers<[1], [0], [0], [1], [0, 0, 1, 1], [], []>} : vector<1x128xbf16>, vector<128x128xbf16>, vector<1x128xf32> -> vector<1x128xf32>
    %128 = arith.addf %120, %127 : vector<1x128xf32>
    %129 = vector.extract_strided_slice %95 {offsets = [8, 0], sizes = [1, 128], strides = [1, 1]} : vector<11x128xf32> to vector<1x128xf32>
    %130 = vector.extract_strided_slice %95 {offsets = [9, 0], sizes = [1, 128], strides = [1, 1]} : vector<11x128xf32> to vector<1x128xf32>
    %131 = arith.maximumf %129, %130 : vector<1x128xf32>
    %132 = arith.truncf %131 : vector<1x128xf32> to vector<1x128xbf16>
    %c4_90 = arith.constant 4 : index
    %c0_91 = arith.constant 0 : index
    %c0_92 = arith.constant 0 : index
    %133 = vector.load %arg5[%c4_90, %c0_91, %c0_92] : memref<5x128x128xbf16, #tpu.memory_space<vmem>>, vector<1x128x128xbf16>
    %134 = vector.shape_cast %133 : vector<1x128x128xbf16> to vector<128x128xbf16>
    %cst_93 = arith.constant dense<0.000000e+00> : vector<1x128xf32>
    %135 = tpu.matmul %132, %134, %cst_93 {dimension_numbers = #tpu.dot_dimension_numbers<[1], [0], [0], [1], [0, 0, 1, 1], [], []>} : vector<1x128xbf16>, vector<128x128xbf16>, vector<1x128xf32> -> vector<1x128xf32>
    %136 = arith.addf %128, %135 : vector<1x128xf32>
    %c0_94 = arith.constant 0 : index
    %c0_95 = arith.constant 0 : index
    %137 = vector.load %arg13[%c0_94, %c0_95] : memref<2x128xf32, #tpu.memory_space<vmem>>, vector<1x128xf32>
    tpu.vector_store %arg13[%c0_94, %c0_95], %136 {strides = array<i32>} : memref<2x128xf32, #tpu.memory_space<vmem>>, vector<1x128xf32>,
    %c30 = arith.constant 30 : index
    %c0_96 = arith.constant 0 : index
    %138 = vector.load %arg0[%c30, %c0_96] : memref<60x30xf32, #tpu.memory_space<vmem>>, vector<13x30xf32>
    %139 = arith.truncf %138 : vector<13x30xf32> to vector<13x30xbf16>
    %c31 = arith.constant 31 : index
    %c0_97 = arith.constant 0 : index
    %140 = vector.load %arg0[%c31, %c0_97] : memref<60x30xf32, #tpu.memory_space<vmem>>, vector<13x30xf32>
    %141 = arith.truncf %140 : vector<13x30xf32> to vector<13x30xbf16>
    %c32 = arith.constant 32 : index
    %c0_98 = arith.constant 0 : index
    %142 = vector.load %arg0[%c32, %c0_98] : memref<60x30xf32, #tpu.memory_space<vmem>>, vector<13x30xf32>
    %143 = arith.truncf %142 : vector<13x30xf32> to vector<13x30xbf16>
    %c45 = arith.constant 45 : index
    %c0_99 = arith.constant 0 : index
    %144 = vector.load %arg0[%c45, %c0_99] : memref<60x30xf32, #tpu.memory_space<vmem>>, vector<13x30xf32>
    %145 = arith.truncf %144 : vector<13x30xf32> to vector<13x30xbf16>
    %c46 = arith.constant 46 : index
    %c0_100 = arith.constant 0 : index
    %146 = vector.load %arg0[%c46, %c0_100] : memref<60x30xf32, #tpu.memory_space<vmem>>, vector<13x30xf32>
    %147 = arith.truncf %146 : vector<13x30xf32> to vector<13x30xbf16>
    %c47 = arith.constant 47 : index
    %c0_101 = arith.constant 0 : index
    %148 = vector.load %arg0[%c47, %c0_101] : memref<60x30xf32, #tpu.memory_space<vmem>>, vector<13x30xf32>
    %149 = arith.truncf %148 : vector<13x30xf32> to vector<13x30xbf16>
    %cst_102 = arith.constant 0.000000e+00 : f32
    %150 = vector.broadcast %cst_102 : f32 to vector<13x256xf32>
    %cst_103 = arith.constant 0.000000e+00 : f32
    %151 = vector.broadcast %cst_103 : f32 to vector<13x256xf32>
    %c0_104 = arith.constant 0 : index
    %c0_105 = arith.constant 0 : index
    %c0_106 = arith.constant 0 : index
    %152 = vector.load %arg1[%c0_104, %c0_105, %c0_106] : memref<5x30x256xbf16, #tpu.memory_space<vmem>>, vector<1x30x256xbf16>
    %153 = vector.shape_cast %152 : vector<1x30x256xbf16> to vector<30x256xbf16>
    %cst_107 = arith.constant dense<0.000000e+00> : vector<13x256xf32>
    %154 = tpu.matmul %139, %153, %cst_107 {dimension_numbers = #tpu.dot_dimension_numbers<[1], [0], [0], [1], [0, 0, 1, 1], [], []>} : vector<13x30xbf16>, vector<30x256xbf16>, vector<13x256xf32> -> vector<13x256xf32>
    %155 = arith.addf %150, %154 : vector<13x256xf32>
    %cst_108 = arith.constant dense<0.000000e+00> : vector<13x256xf32>
    %156 = tpu.matmul %145, %153, %cst_108 {dimension_numbers = #tpu.dot_dimension_numbers<[1], [0], [0], [1], [0, 0, 1, 1], [], []>} : vector<13x30xbf16>, vector<30x256xbf16>, vector<13x256xf32> -> vector<13x256xf32>
    %157 = arith.addf %151, %156 : vector<13x256xf32>
    %c1_109 = arith.constant 1 : index
    %c0_110 = arith.constant 0 : index
    %c0_111 = arith.constant 0 : index
    %158 = vector.load %arg1[%c1_109, %c0_110, %c0_111] : memref<5x30x256xbf16, #tpu.memory_space<vmem>>, vector<1x30x256xbf16>
    %159 = vector.shape_cast %158 : vector<1x30x256xbf16> to vector<30x256xbf16>
    %cst_112 = arith.constant dense<0.000000e+00> : vector<13x256xf32>
    %160 = tpu.matmul %145, %159, %cst_112 {dimension_numbers = #tpu.dot_dimension_numbers<[1], [0], [0], [1], [0, 0, 1, 1], [], []>} : vector<13x30xbf16>, vector<30x256xbf16>, vector<13x256xf32> -> vector<13x256xf32>
    %161 = arith.addf %155, %160 : vector<13x256xf32>
    %cst_113 = arith.constant dense<0.000000e+00> : vector<13x256xf32>
    %162 = tpu.matmul %141, %159, %cst_113 {dimension_numbers = #tpu.dot_dimension_numbers<[1], [0], [0], [1], [0, 0, 1, 1], [], []>} : vector<13x30xbf16>, vector<30x256xbf16>, vector<13x256xf32> -> vector<13x256xf32>
    %163 = arith.addf %157, %162 : vector<13x256xf32>
    %c2_114 = arith.constant 2 : index
    %c0_115 = arith.constant 0 : index
    %c0_116 = arith.constant 0 : index
    %164 = vector.load %arg1[%c2_114, %c0_115, %c0_116] : memref<5x30x256xbf16, #tpu.memory_space<vmem>>, vector<1x30x256xbf16>
    %165 = vector.shape_cast %164 : vector<1x30x256xbf16> to vector<30x256xbf16>
    %cst_117 = arith.constant dense<0.000000e+00> : vector<13x256xf32>
    %166 = tpu.matmul %141, %165, %cst_117 {dimension_numbers = #tpu.dot_dimension_numbers<[1], [0], [0], [1], [0, 0, 1, 1], [], []>} : vector<13x30xbf16>, vector<30x256xbf16>, vector<13x256xf32> -> vector<13x256xf32>
    %167 = arith.addf %161, %166 : vector<13x256xf32>
    %cst_118 = arith.constant dense<0.000000e+00> : vector<13x256xf32>
    %168 = tpu.matmul %147, %165, %cst_118 {dimension_numbers = #tpu.dot_dimension_numbers<[1], [0], [0], [1], [0, 0, 1, 1], [], []>} : vector<13x30xbf16>, vector<30x256xbf16>, vector<13x256xf32> -> vector<13x256xf32>
    %169 = arith.addf %163, %168 : vector<13x256xf32>
    %c3_119 = arith.constant 3 : index
    %c0_120 = arith.constant 0 : index
    %c0_121 = arith.constant 0 : index
    %170 = vector.load %arg1[%c3_119, %c0_120, %c0_121] : memref<5x30x256xbf16, #tpu.memory_space<vmem>>, vector<1x30x256xbf16>
    %171 = vector.shape_cast %170 : vector<1x30x256xbf16> to vector<30x256xbf16>
    %cst_122 = arith.constant dense<0.000000e+00> : vector<13x256xf32>
    %172 = tpu.matmul %147, %171, %cst_122 {dimension_numbers = #tpu.dot_dimension_numbers<[1], [0], [0], [1], [0, 0, 1, 1], [], []>} : vector<13x30xbf16>, vector<30x256xbf16>, vector<13x256xf32> -> vector<13x256xf32>
    %173 = arith.addf %167, %172 : vector<13x256xf32>
    %cst_123 = arith.constant dense<0.000000e+00> : vector<13x256xf32>
    %174 = tpu.matmul %143, %171, %cst_123 {dimension_numbers = #tpu.dot_dimension_numbers<[1], [0], [0], [1], [0, 0, 1, 1], [], []>} : vector<13x30xbf16>, vector<30x256xbf16>, vector<13x256xf32> -> vector<13x256xf32>
    %175 = arith.addf %169, %174 : vector<13x256xf32>
    %c4_124 = arith.constant 4 : index
    %c0_125 = arith.constant 0 : index
    %c0_126 = arith.constant 0 : index
    %176 = vector.load %arg1[%c4_124, %c0_125, %c0_126] : memref<5x30x256xbf16, #tpu.memory_space<vmem>>, vector<1x30x256xbf16>
    %177 = vector.shape_cast %176 : vector<1x30x256xbf16> to vector<30x256xbf16>
    %cst_127 = arith.constant dense<0.000000e+00> : vector<13x256xf32>
    %178 = tpu.matmul %143, %177, %cst_127 {dimension_numbers = #tpu.dot_dimension_numbers<[1], [0], [0], [1], [0, 0, 1, 1], [], []>} : vector<13x30xbf16>, vector<30x256xbf16>, vector<13x256xf32> -> vector<13x256xf32>
    %179 = arith.addf %173, %178 : vector<13x256xf32>
    %cst_128 = arith.constant dense<0.000000e+00> : vector<13x256xf32>
    %180 = tpu.matmul %149, %177, %cst_128 {dimension_numbers = #tpu.dot_dimension_numbers<[1], [0], [0], [1], [0, 0, 1, 1], [], []>} : vector<13x30xbf16>, vector<30x256xbf16>, vector<13x256xf32> -> vector<13x256xf32>
    %181 = arith.addf %175, %180 : vector<13x256xf32>
    %182 = arith.maximumf %179, %181 : vector<13x256xf32>
    %183 = vector.extract_strided_slice %182 {offsets = [0, 0], sizes = [13, 128], strides = [1, 1]} : vector<13x256xf32> to vector<13x128xf32>
    %184 = vector.extract_strided_slice %182 {offsets = [0, 128], sizes = [13, 128], strides = [1, 1]} : vector<13x256xf32> to vector<13x128xf32>
    %185 = arith.maximumf %183, %184 : vector<13x128xf32>
    %c0_129 = arith.constant 0 : index
    %c0_130 = arith.constant 0 : index
    %186 = vector.load %arg2[%c0_129, %c0_130] : memref<1x128xf32, #tpu.memory_space<vmem>>, vector<1x128xf32>
    %187 = vector.broadcast %186 : vector<1x128xf32> to vector<13x128xf32>
    %188 = arith.addf %185, %187 : vector<13x128xf32>
    %cst_131 = arith.constant 0.000000e+00 : f32
    %189 = vector.broadcast %cst_131 : f32 to vector<13x128xf32>
    %190 = arith.maximumf %188, %189 : vector<13x128xf32>
    %c15_132 = arith.constant 15 : index
    %c0_133 = arith.constant 0 : index
    %191 = vector.load %arg12[%c15_132, %c0_133] : memref<30x128xf32, #tpu.memory_space<vmem>>, vector<1x128xf32>
    tpu.vector_store %arg12[%c15_132, %c0_133], %0 {strides = array<i32>} : memref<30x128xf32, #tpu.memory_space<vmem>>, vector<1x128xf32>,
    %c16_134 = arith.constant 16 : index
    %c0_135 = arith.constant 0 : index
    %192 = vector.load %arg12[%c16_134, %c0_135] : memref<30x128xf32, #tpu.memory_space<vmem>>, vector<13x128xf32>
    tpu.vector_store %arg12[%c16_134, %c0_135], %190 {strides = array<i32>} : memref<30x128xf32, #tpu.memory_space<vmem>>, vector<13x128xf32>,
    %c29 = arith.constant 29 : index
    %c0_136 = arith.constant 0 : index
    %193 = vector.load %arg12[%c29, %c0_136] : memref<30x128xf32, #tpu.memory_space<vmem>>, vector<1x128xf32>
    tpu.vector_store %arg12[%c29, %c0_136], %0 {strides = array<i32>} : memref<30x128xf32, #tpu.memory_space<vmem>>, vector<1x128xf32>,
    %cst_137 = arith.constant 0.000000e+00 : f32
    %194 = vector.broadcast %cst_137 : f32 to vector<11x256xf32>
    %c15_138 = arith.constant 15 : index
    %c0_139 = arith.constant 0 : index
    %195 = vector.load %arg12[%c15_138, %c0_139] : memref<30x128xf32, #tpu.memory_space<vmem>>, vector<11x128xf32>
    %196 = arith.truncf %195 : vector<11x128xf32> to vector<11x128xbf16>
    %c0_140 = arith.constant 0 : index
    %c0_141 = arith.constant 0 : index
    %c0_142 = arith.constant 0 : index
    %197 = vector.load %arg3[%c0_140, %c0_141, %c0_142] : memref<5x128x256xbf16, #tpu.memory_space<vmem>>, vector<1x128x256xbf16>
    %198 = vector.shape_cast %197 : vector<1x128x256xbf16> to vector<128x256xbf16>
    %cst_143 = arith.constant dense<0.000000e+00> : vector<11x256xf32>
    %199 = tpu.matmul %196, %198, %cst_143 {dimension_numbers = #tpu.dot_dimension_numbers<[1], [0], [0], [1], [0, 0, 1, 1], [], []>} : vector<11x128xbf16>, vector<128x256xbf16>, vector<11x256xf32> -> vector<11x256xf32>
    %200 = arith.addf %194, %199 : vector<11x256xf32>
    %c16_144 = arith.constant 16 : index
    %c0_145 = arith.constant 0 : index
    %201 = vector.load %arg12[%c16_144, %c0_145] : memref<30x128xf32, #tpu.memory_space<vmem>>, vector<11x128xf32>
    %202 = arith.truncf %201 : vector<11x128xf32> to vector<11x128xbf16>
    %c1_146 = arith.constant 1 : index
    %c0_147 = arith.constant 0 : index
    %c0_148 = arith.constant 0 : index
    %203 = vector.load %arg3[%c1_146, %c0_147, %c0_148] : memref<5x128x256xbf16, #tpu.memory_space<vmem>>, vector<1x128x256xbf16>
    %204 = vector.shape_cast %203 : vector<1x128x256xbf16> to vector<128x256xbf16>
    %cst_149 = arith.constant dense<0.000000e+00> : vector<11x256xf32>
    %205 = tpu.matmul %202, %204, %cst_149 {dimension_numbers = #tpu.dot_dimension_numbers<[1], [0], [0], [1], [0, 0, 1, 1], [], []>} : vector<11x128xbf16>, vector<128x256xbf16>, vector<11x256xf32> -> vector<11x256xf32>
    %206 = arith.addf %200, %205 : vector<11x256xf32>
    %c17_150 = arith.constant 17 : index
    %c0_151 = arith.constant 0 : index
    %207 = vector.load %arg12[%c17_150, %c0_151] : memref<30x128xf32, #tpu.memory_space<vmem>>, vector<11x128xf32>
    %208 = arith.truncf %207 : vector<11x128xf32> to vector<11x128xbf16>
    %c2_152 = arith.constant 2 : index
    %c0_153 = arith.constant 0 : index
    %c0_154 = arith.constant 0 : index
    %209 = vector.load %arg3[%c2_152, %c0_153, %c0_154] : memref<5x128x256xbf16, #tpu.memory_space<vmem>>, vector<1x128x256xbf16>
    %210 = vector.shape_cast %209 : vector<1x128x256xbf16> to vector<128x256xbf16>
    %cst_155 = arith.constant dense<0.000000e+00> : vector<11x256xf32>
    %211 = tpu.matmul %208, %210, %cst_155 {dimension_numbers = #tpu.dot_dimension_numbers<[1], [0], [0], [1], [0, 0, 1, 1], [], []>} : vector<11x128xbf16>, vector<128x256xbf16>, vector<11x256xf32> -> vector<11x256xf32>
    %212 = arith.addf %206, %211 : vector<11x256xf32>
    %c18 = arith.constant 18 : index
    %c0_156 = arith.constant 0 : index
    %213 = vector.load %arg12[%c18, %c0_156] : memref<30x128xf32, #tpu.memory_space<vmem>>, vector<11x128xf32>
    %214 = arith.truncf %213 : vector<11x128xf32> to vector<11x128xbf16>
    %c3_157 = arith.constant 3 : index
    %c0_158 = arith.constant 0 : index
    %c0_159 = arith.constant 0 : index
    %215 = vector.load %arg3[%c3_157, %c0_158, %c0_159] : memref<5x128x256xbf16, #tpu.memory_space<vmem>>, vector<1x128x256xbf16>
    %216 = vector.shape_cast %215 : vector<1x128x256xbf16> to vector<128x256xbf16>
    %cst_160 = arith.constant dense<0.000000e+00> : vector<11x256xf32>
    %217 = tpu.matmul %214, %216, %cst_160 {dimension_numbers = #tpu.dot_dimension_numbers<[1], [0], [0], [1], [0, 0, 1, 1], [], []>} : vector<11x128xbf16>, vector<128x256xbf16>, vector<11x256xf32> -> vector<11x256xf32>
    %218 = arith.addf %212, %217 : vector<11x256xf32>
    %c19 = arith.constant 19 : index
    %c0_161 = arith.constant 0 : index
    %219 = vector.load %arg12[%c19, %c0_161] : memref<30x128xf32, #tpu.memory_space<vmem>>, vector<11x128xf32>
    %220 = arith.truncf %219 : vector<11x128xf32> to vector<11x128xbf16>
    %c4_162 = arith.constant 4 : index
    %c0_163 = arith.constant 0 : index
    %c0_164 = arith.constant 0 : index
    %221 = vector.load %arg3[%c4_162, %c0_163, %c0_164] : memref<5x128x256xbf16, #tpu.memory_space<vmem>>, vector<1x128x256xbf16>
    %222 = vector.shape_cast %221 : vector<1x128x256xbf16> to vector<128x256xbf16>
    %cst_165 = arith.constant dense<0.000000e+00> : vector<11x256xf32>
    %223 = tpu.matmul %220, %222, %cst_165 {dimension_numbers = #tpu.dot_dimension_numbers<[1], [0], [0], [1], [0, 0, 1, 1], [], []>} : vector<11x128xbf16>, vector<128x256xbf16>, vector<11x256xf32> -> vector<11x256xf32>
    %224 = arith.addf %218, %223 : vector<11x256xf32>
    %225 = vector.extract_strided_slice %224 {offsets = [0, 0], sizes = [11, 128], strides = [1, 1]} : vector<11x256xf32> to vector<11x128xf32>
    %226 = vector.extract_strided_slice %224 {offsets = [0, 128], sizes = [11, 128], strides = [1, 1]} : vector<11x256xf32> to vector<11x128xf32>
    %227 = arith.maximumf %225, %226 : vector<11x128xf32>
    %c0_166 = arith.constant 0 : index
    %c0_167 = arith.constant 0 : index
    %228 = vector.load %arg4[%c0_166, %c0_167] : memref<1x128xf32, #tpu.memory_space<vmem>>, vector<1x128xf32>
    %229 = vector.broadcast %228 : vector<1x128xf32> to vector<11x128xf32>
    %230 = arith.addf %227, %229 : vector<11x128xf32>
    %cst_168 = arith.constant 0.000000e+00 : f32
    %231 = vector.broadcast %cst_168 : f32 to vector<11x128xf32>
    %232 = arith.maximumf %230, %231 : vector<11x128xf32>
    %cst_169 = arith.constant 0.000000e+00 : f32
    %233 = vector.broadcast %cst_169 : f32 to vector<1x128xf32>
    %234 = vector.extract_strided_slice %232 {offsets = [0, 0], sizes = [1, 128], strides = [1, 1]} : vector<11x128xf32> to vector<1x128xf32>
    %235 = vector.extract_strided_slice %232 {offsets = [1, 0], sizes = [1, 128], strides = [1, 1]} : vector<11x128xf32> to vector<1x128xf32>
    %236 = arith.maximumf %234, %235 : vector<1x128xf32>
    %237 = arith.truncf %236 : vector<1x128xf32> to vector<1x128xbf16>
    %c0_170 = arith.constant 0 : index
    %c0_171 = arith.constant 0 : index
    %c0_172 = arith.constant 0 : index
    %238 = vector.load %arg5[%c0_170, %c0_171, %c0_172] : memref<5x128x128xbf16, #tpu.memory_space<vmem>>, vector<1x128x128xbf16>
    %239 = vector.shape_cast %238 : vector<1x128x128xbf16> to vector<128x128xbf16>
    %cst_173 = arith.constant dense<0.000000e+00> : vector<1x128xf32>
    %240 = tpu.matmul %237, %239, %cst_173 {dimension_numbers = #tpu.dot_dimension_numbers<[1], [0], [0], [1], [0, 0, 1, 1], [], []>} : vector<1x128xbf16>, vector<128x128xbf16>, vector<1x128xf32> -> vector<1x128xf32>
    %241 = arith.addf %233, %240 : vector<1x128xf32>
    %242 = vector.extract_strided_slice %232 {offsets = [2, 0], sizes = [1, 128], strides = [1, 1]} : vector<11x128xf32> to vector<1x128xf32>
    %243 = vector.extract_strided_slice %232 {offsets = [3, 0], sizes = [1, 128], strides = [1, 1]} : vector<11x128xf32> to vector<1x128xf32>
    %244 = arith.maximumf %242, %243 : vector<1x128xf32>
    %245 = arith.truncf %244 : vector<1x128xf32> to vector<1x128xbf16>
    %c1_174 = arith.constant 1 : index
    %c0_175 = arith.constant 0 : index
    %c0_176 = arith.constant 0 : index
    %246 = vector.load %arg5[%c1_174, %c0_175, %c0_176] : memref<5x128x128xbf16, #tpu.memory_space<vmem>>, vector<1x128x128xbf16>
    %247 = vector.shape_cast %246 : vector<1x128x128xbf16> to vector<128x128xbf16>
    %cst_177 = arith.constant dense<0.000000e+00> : vector<1x128xf32>
    %248 = tpu.matmul %245, %247, %cst_177 {dimension_numbers = #tpu.dot_dimension_numbers<[1], [0], [0], [1], [0, 0, 1, 1], [], []>} : vector<1x128xbf16>, vector<128x128xbf16>, vector<1x128xf32> -> vector<1x128xf32>
    %249 = arith.addf %241, %248 : vector<1x128xf32>
    %250 = vector.extract_strided_slice %232 {offsets = [4, 0], sizes = [1, 128], strides = [1, 1]} : vector<11x128xf32> to vector<1x128xf32>
    %251 = vector.extract_strided_slice %232 {offsets = [5, 0], sizes = [1, 128], strides = [1, 1]} : vector<11x128xf32> to vector<1x128xf32>
    %252 = arith.maximumf %250, %251 : vector<1x128xf32>
    %253 = arith.truncf %252 : vector<1x128xf32> to vector<1x128xbf16>
    %c2_178 = arith.constant 2 : index
    %c0_179 = arith.constant 0 : index
    %c0_180 = arith.constant 0 : index
    %254 = vector.load %arg5[%c2_178, %c0_179, %c0_180] : memref<5x128x128xbf16, #tpu.memory_space<vmem>>, vector<1x128x128xbf16>
    %255 = vector.shape_cast %254 : vector<1x128x128xbf16> to vector<128x128xbf16>
    %cst_181 = arith.constant dense<0.000000e+00> : vector<1x128xf32>
    %256 = tpu.matmul %253, %255, %cst_181 {dimension_numbers = #tpu.dot_dimension_numbers<[1], [0], [0], [1], [0, 0, 1, 1], [], []>} : vector<1x128xbf16>, vector<128x128xbf16>, vector<1x128xf32> -> vector<1x128xf32>
    %257 = arith.addf %249, %256 : vector<1x128xf32>
    %258 = vector.extract_strided_slice %232 {offsets = [6, 0], sizes = [1, 128], strides = [1, 1]} : vector<11x128xf32> to vector<1x128xf32>
    %259 = vector.extract_strided_slice %232 {offsets = [7, 0], sizes = [1, 128], strides = [1, 1]} : vector<11x128xf32> to vector<1x128xf32>
    %260 = arith.maximumf %258, %259 : vector<1x128xf32>
    %261 = arith.truncf %260 : vector<1x128xf32> to vector<1x128xbf16>
    %c3_182 = arith.constant 3 : index
    %c0_183 = arith.constant 0 : index
    %c0_184 = arith.constant 0 : index
    %262 = vector.load %arg5[%c3_182, %c0_183, %c0_184] : memref<5x128x128xbf16, #tpu.memory_space<vmem>>, vector<1x128x128xbf16>
    %263 = vector.shape_cast %262 : vector<1x128x128xbf16> to vector<128x128xbf16>
    %cst_185 = arith.constant dense<0.000000e+00> : vector<1x128xf32>
    %264 = tpu.matmul %261, %263, %cst_185 {dimension_numbers = #tpu.dot_dimension_numbers<[1], [0], [0], [1], [0, 0, 1, 1], [], []>} : vector<1x128xbf16>, vector<128x128xbf16>, vector<1x128xf32> -> vector<1x128xf32>
    %265 = arith.addf %257, %264 : vector<1x128xf32>
    %266 = vector.extract_strided_slice %232 {offsets = [8, 0], sizes = [1, 128], strides = [1, 1]} : vector<11x128xf32> to vector<1x128xf32>
    %267 = vector.extract_strided_slice %232 {offsets = [9, 0], sizes = [1, 128], strides = [1, 1]} : vector<11x128xf32> to vector<1x128xf32>
    %268 = arith.maximumf %266, %267 : vector<1x128xf32>
    %269 = arith.truncf %268 : vector<1x128xf32> to vector<1x128xbf16>
    %c4_186 = arith.constant 4 : index
    %c0_187 = arith.constant 0 : index
    %c0_188 = arith.constant 0 : index
    %270 = vector.load %arg5[%c4_186, %c0_187, %c0_188] : memref<5x128x128xbf16, #tpu.memory_space<vmem>>, vector<1x128x128xbf16>
    %271 = vector.shape_cast %270 : vector<1x128x128xbf16> to vector<128x128xbf16>
    %cst_189 = arith.constant dense<0.000000e+00> : vector<1x128xf32>
    %272 = tpu.matmul %269, %271, %cst_189 {dimension_numbers = #tpu.dot_dimension_numbers<[1], [0], [0], [1], [0, 0, 1, 1], [], []>} : vector<1x128xbf16>, vector<128x128xbf16>, vector<1x128xf32> -> vector<1x128xf32>
    %273 = arith.addf %265, %272 : vector<1x128xf32>
    %c1_190 = arith.constant 1 : index
    %c0_191 = arith.constant 0 : index
    %274 = vector.load %arg13[%c1_190, %c0_191] : memref<2x128xf32, #tpu.memory_space<vmem>>, vector<1x128xf32>
    tpu.vector_store %arg13[%c1_190, %c0_191], %273 {strides = array<i32>} : memref<2x128xf32, #tpu.memory_space<vmem>>, vector<1x128xf32>,
    %c0_192 = arith.constant 0 : index
    %c0_193 = arith.constant 0 : index
    %275 = vector.load %arg13[%c0_192, %c0_193] : memref<2x128xf32, #tpu.memory_space<vmem>>, vector<2x128xf32>
    %c0_194 = arith.constant 0 : index
    %c0_195 = arith.constant 0 : index
    %276 = vector.load %arg6[%c0_194, %c0_195] : memref<1x128xf32, #tpu.memory_space<vmem>>, vector<1x128xf32>
    %277 = vector.broadcast %276 : vector<1x128xf32> to vector<2x128xf32>
    %278 = arith.addf %275, %277 : vector<2x128xf32>
    %cst_196 = arith.constant 0.000000e+00 : f32
    %279 = vector.broadcast %cst_196 : f32 to vector<2x128xf32>
    %280 = arith.maximumf %278, %279 : vector<2x128xf32>
    %281 = arith.truncf %280 : vector<2x128xf32> to vector<2x128xbf16>
    %c0_197 = arith.constant 0 : index
    %c0_198 = arith.constant 0 : index
    %282 = vector.load %arg7[%c0_197, %c0_198] : memref<128x128xbf16, #tpu.memory_space<vmem>>, vector<128x128xbf16>
    %cst_199 = arith.constant dense<0.000000e+00> : vector<2x128xf32>
    %283 = tpu.matmul %281, %282, %cst_199 {dimension_numbers = #tpu.dot_dimension_numbers<[1], [0], [0], [1], [0, 0, 1, 1], [], []>} : vector<2x128xbf16>, vector<128x128xbf16>, vector<2x128xf32> -> vector<2x128xf32>
    %c0_200 = arith.constant 0 : index
    %c0_201 = arith.constant 0 : index
    %284 = vector.load %arg8[%c0_200, %c0_201] : memref<1x128xf32, #tpu.memory_space<vmem>>, vector<1x128xf32>
    %285 = vector.broadcast %284 : vector<1x128xf32> to vector<2x128xf32>
    %286 = arith.addf %283, %285 : vector<2x128xf32>
    %cst_202 = arith.constant 0.000000e+00 : f32
    %287 = vector.broadcast %cst_202 : f32 to vector<2x128xf32>
    %288 = arith.maximumf %286, %287 : vector<2x128xf32>
    %289 = arith.truncf %288 : vector<2x128xf32> to vector<2x128xbf16>
    %c0_203 = arith.constant 0 : index
    %c0_204 = arith.constant 0 : index
    %290 = vector.load %arg9[%c0_203, %c0_204] : memref<128x128xbf16, #tpu.memory_space<vmem>>, vector<128x128xbf16>
    %cst_205 = arith.constant dense<0.000000e+00> : vector<2x128xf32>
    %291 = tpu.matmul %289, %290, %cst_205 {dimension_numbers = #tpu.dot_dimension_numbers<[1], [0], [0], [1], [0, 0, 1, 1], [], []>} : vector<2x128xbf16>, vector<128x128xbf16>, vector<2x128xf32> -> vector<2x128xf32>
    %c0_206 = arith.constant 0 : index
    %c0_207 = arith.constant 0 : index
    %292 = vector.load %arg10[%c0_206, %c0_207] : memref<1x128xf32, #tpu.memory_space<vmem>>, vector<1x128xf32>
    %293 = vector.broadcast %292 : vector<1x128xf32> to vector<2x128xf32>
    %294 = arith.addf %291, %293 : vector<2x128xf32>
    %c0_208 = arith.constant 0 : index
    %c0_209 = arith.constant 0 : index
    %295 = vector.load %arg11[%c0_208, %c0_209] : memref<2x128xf32, #tpu.memory_space<vmem>>, vector<2x128xf32>
    tpu.vector_store %arg11[%c0_208, %c0_209], %294 {strides = array<i32>} : memref<2x128xf32, #tpu.memory_space<vmem>>, vector<2x128xf32>,
    return
  }
}

</mosaic_0001>

<bundles_post_ra>
// kernel: _lenet_pallas.1
= control target key start
LH: loop header
LB: loop body
LE: loop exit
PB: predicated region body
PF: predicated region fallthrough
CT: control target
= control target key end

     0   :  { %16 = vsyncpa [#allocation5], 0  ;;  %s5875_s0 = inlined_call_operand.vmem [shape: f32[60,30], index: 0, kind: input, shape index: {}]   ;;  %s5876_s1 = inlined_call_operand.hbm [shape: bf16[5,30,256], index: 1, kind: input, shape index: {}]   ;;  %s5877_s2 = inlined_call_operand.vmem [shape: f32[1,128], index: 2, kind: input, shape index: {}]   ;;  %s5878_s3 = inlined_call_operand.hbm [shape: bf16[5,128,256], index: 3, kind: input, shape index: {}]   ;;  %s5879_s4 = inlined_call_operand.vmem [shape: f32[1,128], index: 4, kind: input, shape index: {}]   ;;  %s5880_s5 = inlined_call_operand.hbm [shape: bf16[5,128,128], index: 5, kind: input, shape index: {}]   ;;  %s5881_s6 = inlined_call_operand.vmem [shape: f32[1,128], index: 6, kind: input, shape index: {}]   ;;  %s5882_s7 = inlined_call_operand.vmem [shape: bf16[128,128], index: 7, kind: input, shape index: {}]   ;;  %s5883_s8 = inlined_call_operand.vmem [shape: f32[1,128], index: 8, kind: input, shape index: {}]   ;;  %s5884_s9 = inlined_call_operand.hbm [shape: bf16[128,128], index: 9, kind: input, shape index: {}]   ;;  %s5885_s10 = inlined_call_operand.vmem [shape: f32[1,128], index: 10, kind: input, shape index: {}]   ;;  %s5886_s11 = inlined_call_operand.hbm [shape: f32[2,128], index: 11, kind: output, shape index: {}]  }
   0x1   :  { %17 = vsyncpa [#allocation8], 0 }
   0x2   :  { %18 = vsyncpa [#allocation11], 0 }
   0x3   :  { %19 = vsyncpa [#allocation6], 0  ;;  %s5423_s17 = smov [#allocation7]   ;;  %s5424_s19 = smov [#allocation4]  }
   0x4   :  { %s41_s18 = sshll.u32 %s5423_s17, 4  ;;  %s27_s20 = sshll.u32 %s5424_s19, 4  ;;  %s42_s18 = int_to_ptr.vmem [resolvable:$true] %s41_s18  ;;  %s28_s20 = int_to_ptr.vmem [resolvable:$true] %s27_s20 }
   0x5   :  { %s5323_s21 = scalar_lea.vmem %s42_s18, 10240  ;;  %p5328_p1 = scmp.lt.s32.totalorder %s42_s18, %s42_s18 }
   0x6   :  { %p5324_p0 = scmp.ne.s32.totalorder %s42_s18, %s5323_s21  ;;  %p5329_p2 = scmp.lt.s32.totalorder %s5323_s21, %s5323_s21 }
   0x8   :  { %p5330_p3 = por %p5329_p2, %p5328_p1 }
   0xa   :  { %p5331_p4 = pnand %p5330_p3, %p5324_p0 }
   0xc   :  { %5334 = shalt.err (!%p5331_p4)
}
   0xd   :  { %s5425_s22 = smov 128   ;;  %s5426_s23 = smov 8  }
   0xe   :  { %47 = dma.hbm_to_vmem [thread:$0]  %s5878_s3, 10240, %s42_s18, [#allocation8], %s5425_s22, %s5425_s22, %s5426_s23  }
   0xf   :  { %s5343_s26 = scalar_lea.vmem %s28_s20, 2560  ;;  %p5348_p6 = scmp.lt.s32.totalorder %s28_s20, %s28_s20 }
  0x10   :  { %p5344_p5 = scmp.ne.s32.totalorder %s28_s20, %s5343_s26  ;;  %p5349_p7 = scmp.lt.s32.totalorder %s5343_s26, %s5343_s26 }
  0x12   :  { %p5350_p8 = por %p5349_p7, %p5348_p6 }
  0x14   :  { %p5351_p9 = pnand %p5350_p8, %p5344_p5 }
  0x16   :  { %5354 = shalt.err (!%p5351_p9)
}
  0x17   :  { %33 = dma.hbm_to_vmem [thread:$0]  %s5876_s1, 2560, %s28_s20, [#allocation5], %s5425_s22, %s5425_s22, %s5426_s23  }
  0x18   :  { %s5427_s29 = smov [#allocation9]  }
  0x19   :  { %s55_s30 = sshll.u32 %s5427_s29, 4  ;;  %s56_s30 = int_to_ptr.vmem [resolvable:$true] %s55_s30 }
  0x1a   :  { %s5363_s12 = scalar_lea.vmem %s56_s30, 5120  ;;  %p5368_p11 = scmp.lt.s32.totalorder %s56_s30, %s56_s30 }
  0x1b   :  { %p5364_p10 = scmp.ne.s32.totalorder %s56_s30, %s5363_s12  ;;  %p5369_p12 = scmp.lt.s32.totalorder %s5363_s12, %s5363_s12 }
  0x1d   :  { %p5370_p13 = por %p5369_p12, %p5368_p11 }
  0x1f   :  { %p5371_p0 = pnand %p5370_p13, %p5364_p10 }
  0x21   :  { %5374 = shalt.err (!%p5371_p0)
}
  0x22   :  { %s5428_s3 = smov 64   ;;  %s5429_s13 = smov 4  }
  0x23   :  { %61 = dma.hbm_to_vmem [thread:$0]  %s5880_s5, 5120, %s56_s30, [#allocation8], %s5428_s3, %s5428_s3, %s5429_s13  }
  0x24   :  { %s5430_s16 = smov [#allocation10]  }
  0x25   :  { %s73_s17 = sshll.u32 %s5430_s16, 4  ;;  %s74_s17 = int_to_ptr.vmem [resolvable:$true] %s73_s17 }
  0x26   :  { %s5383_s1 = scalar_lea.vmem %s74_s17, 1024  ;;  %p5388_p2 = scmp.lt.s32.totalorder %s74_s17, %s74_s17 }
  0x27   :  { %p5384_p1 = scmp.ne.s32.totalorder %s74_s17, %s5383_s1  ;;  %p5389_p3 = scmp.lt.s32.totalorder %s5383_s1, %s5383_s1 }
  0x29   :  { %p5390_p4 = por %p5389_p3, %p5388_p2 }
  0x2b   :  { %p5391_p5 = pnand %p5390_p4, %p5384_p1 }
  0x2d   :  { %5394 = shalt.err (!%p5391_p5)
}
  0x2e   :  { %79 = dma.hbm_to_vmem [thread:$0]  %s5884_s9, 1024, %s74_s17, [#allocation11], %s5428_s3, %s5428_s3, %s5429_s13  }
  0x2f   :  { %5415 = dma.done.wait [#allocation5], 2560  }
  0x30   :  { %5416 = vsyncadd [#allocation5], 4294964736 }
  0x31   :  { %5417 = dma.done.wait [#allocation8], 15360  }
  0x32   :  { %5418 = vsyncadd [#allocation8], 4294951936 }
  0x33   :  { %5419 = dma.done.wait [#allocation11], 1024  }
  0x34   :  { %5420 = vsyncadd [#allocation11], 4294966272  ;;  %v5431_v0 = vmov 0   ;;  %vm144_vm0 = vcmask 1046528   ;;  %v4925_v5 = vld [vmem:[#allocation4 + $0x24] ss:$8 sps:$4 sm:$0xff]  }
  0x35   :  { %183 = vmatprep.mubr.bf16.mxu0 %v5431_v0  ;;  %253 = vmatprep.mubr.bf16.mxu1 %v5431_v0  ;;  %v4919_v1 = vld [vmem:[#allocation4 + $0x34] ss:$8 sps:$4 sm:$0x7f]   ;;  %v4923_v3 = vld [vmem:[#allocation4 + $0x30] ss:$8 sps:$4 sm:$0x7f]  }
  0x36   :  { %v4921_v2 = vld [vmem:[#allocation4 + $0x14] ss:$8 sps:$4 sm:$0x7f]   ;;  %4220 = vmatprep.subr.msk.bf16.mxu0 %vm144_vm0, %v4919_v1  ;;  %v4924_v4 = vld [vmem:[#allocation4 + $0x10] ss:$8 sps:$4 sm:$0x7f]  }
  0x37   :  { %4226 = vmatprep.subr.msk.bf16.mxu1 %vm144_vm0, %v4921_v2  ;;  %v146_v6 = vsel %vm144_vm0, %v4923_v3, 0  ;;  %v216_v7 = vsel %vm144_vm0, %v4924_v4, 0  ;;  %v4927_v8 = vld [vmem:[#allocation4 + $0x4] ss:$8 sps:$4 sm:$0xff]   ;;  %v4929_v9 = vld [vmem:[#allocation4 + $0x20] ss:$8 sps:$4 sm:$0xff]  }
  0x38   :  { %164 = vmatpush1.bf16.msra.mxu0 %v146_v6  ;;  %234 = vmatpush1.bf16.msra.mxu1 %v216_v7  ;;  %v4930_v10 = vld [vmem:[#allocation4] ss:$8 sps:$4 sm:$0xff]   ;;  %v104_v11 = vld [vmem:[%s5875_s0 + $0xf] sm:$0xff]  ;;  %v105_v12 = vld [vmem:[%s5875_s0 + $0x17] sm:$0x1f]  ;;  %vm140_vm1 = vcmask 244736  }
  0x39   :  { %165 = vmatprep.subr.bf16.mxu0 %v4925_v5  ;;  %235 = vmatprep.subr.bf16.mxu1 %v4927_v8  ;;  %v95_v13 = vld [vmem:[%s5875_s0] sm:$0xff]  ;;  %v96_v14 = vld [vmem:[%s5875_s0 + $0x8] sm:$0x1f]  ;;  %v106_v15 = vpack.c.bf16 %v105_v12, %v104_v11  ;;  %v4933_v20 = vld [vmem:[#allocation4 + $0x50] ss:$8 sps:$4 sm:$0x7f]  }
  0x3a   :  { %v97_v16 = vpack.c.bf16 %v96_v14, %v95_v13  ;;  %v98_v17 = vld [vmem:[%s5875_s0 + $0x1] sm:$0xff]  ;;  %v99_v18 = vld [vmem:[%s5875_s0 + $0x9] sm:$0x1f]  ;;  %v4931_v19 = vld [vmem:[#allocation4 + $0x54] ss:$8 sps:$4 sm:$0x7f]  }
  0x3b   :  { %v100_v21 = vpack.c.bf16 %v99_v18, %v98_v17  ;;  %v4936_v22 = vld [vmem:[#allocation4 + $0x44] ss:$8 sps:$4 sm:$0xff]   ;;  %v377_v23 = vsel %vm144_vm0, %v4933_v20, 0  ;;  %v4934_v24 = vld [vmem:[#allocation4 + $0x40] ss:$8 sps:$4 sm:$0xff]   ;;  %vm5433_vm2 = vmmov 0  }
  0x3c   :  { %166 = vmatpush1.bf16.msra.mxu0 %v4929_v9  ;;  %236 = vmatpush1.bf16.msra.mxu1 %v4930_v10  ;;  %v107_v25 = vld [vmem:[%s5875_s0 + $0x10] sm:$0xff]  ;;  %v108_v26 = vld [vmem:[%s5875_s0 + $0x18] sm:$0x1f]  ;;  %v4940_v32 = vld [vmem:[#allocation4 + $0x60] ss:$8 sps:$4 sm:$0xff]   ;;  %s5434_s22 = smov [#allocation12]  }
  0x3d   :  { %4228 = vmatprep.subr.msk.bf16.mxu0 %vm144_vm0, %v4919_v1  ;;  %4230 = vmatprep.subr.msk.bf16.mxu1 %vm144_vm0, %v4921_v2  ;;  %v4937_v27 = vld [vmem:[#allocation4 + $0x74] ss:$8 sps:$4 sm:$0x7f]   ;;  %v4939_v28 = vld [vmem:[#allocation4 + $0x70] ss:$8 sps:$4 sm:$0x7f]   ;;  %v109_v29 = vpack.c.bf16 %v108_v26, %v107_v25 }
  0x3e   :  { %v4942_v30 = vld [vmem:[#allocation4 + $0x64] ss:$8 sps:$4 sm:$0xff]   ;;  %v503_v31 = vsel %vm144_vm0, %v4939_v28, 0  ;;  %v4943_v35 = vld [vmem:[#allocation4 + $0x94] ss:$8 sps:$4 sm:$0x7f]  }
  0x3f   :  { %4221 = vmatmul.mubr.msk.bf16.vlgmr.msra.gmra.mxu0 %vm140_vm1, %v106_v15  ;;  %4227 = vmatmul.mubr.msk.bf16.vlgmr.msra.gmra.mxu1 %vm140_vm1, %v97_v16  ;;  %v101_v33 = vld [vmem:[%s5875_s0 + $0x2] sm:$0xff]  ;;  %v102_v34 = vld [vmem:[%s5875_s0 + $0xa] sm:$0x1f]  ;;  %v4945_v36 = vld [vmem:[#allocation4 + $0x90] ss:$8 sps:$4 sm:$0x7f]  }
  0x40   :  { %280 = vmatpush1.bf16.msra.mxu0 %v146_v6  ;;  %323 = vmatpush1.bf16.msra.mxu1 %v216_v7  ;;  %v103_v37 = vpack.c.bf16 %v102_v34, %v101_v33  ;;  %v4948_v38 = vld [vmem:[#allocation4 + $0x84] ss:$8 sps:$4 sm:$0xff]   ;;  %v629_v39 = vsel %vm144_vm0, %v4945_v36, 0  ;;  %v4946_v40 = vld [vmem:[#allocation4 + $0x80] ss:$8 sps:$4 sm:$0xff]   ;;  %s4205_s23 = sshll.u32 %s5434_s22, 4  ;;  %s4206_s23 = int_to_ptr.vmem [resolvable:$true] %s4205_s23 }
  0x41   :  { %281 = vmatprep.subr.bf16.mxu0 %v4925_v5  ;;  %324 = vmatprep.subr.bf16.mxu1 %v4927_v8  ;;  %v110_v41 = vld [vmem:[%s5875_s0 + $0x11] sm:$0xff]  ;;  %v111_v42 = vld [vmem:[%s5875_s0 + $0x19] sm:$0x1f]  ;;  %v4955_v50 = vld [vmem:[#allocation7 + $0xe0] ss:$8 sps:$4 sm:$0xff]   ;;  %v5432_v5 = vmov 0.0   ;;  %p5400_p7 = scmp.lt.s32.totalorder %s4206_s23, %s4206_s23 }
  0x42   :  { %299 = vmatprep.mubr.bf16.mxu0 %v5431_v0  ;;  %342 = vmatprep.mubr.bf16.mxu1 %v5431_v0  ;;  %v112_v43 = vpack.c.bf16 %v111_v42, %v110_v41  ;;  %v4951_v44 = vld [vmem:[#allocation7 + $0xf4] ss:$8 sps:$4 sm:$0xff]   ;;  %v4949_v46 = vld [vmem:[#allocation7 + $0xf0] ss:$8 sps:$4 sm:$0xff]   ;;  %v4957_v48 = vld [vmem:[#allocation7 + $0xe4] ss:$8 sps:$4 sm:$0xff]  }
  0x43   :  { %v4954_v45 = vld [vmem:[#allocation7 + $0x74] ss:$8 sps:$4 sm:$0xff]   ;;  %v4952_v47 = vld [vmem:[#allocation7 + $0x70] ss:$8 sps:$4 sm:$0xff]   ;;  %v4960_v49 = vld [vmem:[#allocation7 + $0x64] ss:$8 sps:$4 sm:$0xff]  }
  0x44   :  { %282 = vmatpush1.bf16.msra.mxu0 %v4929_v9  ;;  %325 = vmatpush1.bf16.msra.mxu1 %v4930_v10  ;;  %v4958_v51 = vld [vmem:[#allocation7 + $0x60] ss:$8 sps:$4 sm:$0xff]   ;;  %v4963_v52 = vld [vmem:[#allocation7 + $0xd4] ss:$8 sps:$4 sm:$0xff]   ;;  %v4961_v54 = vld [vmem:[#allocation7 + $0xd0] ss:$8 sps:$4 sm:$0xff]  }
  0x45   :  { %4236 = vmatprep.subr.msk.bf16.mxu0 %vm144_vm0, %v4931_v19  ;;  %4238 = vmatprep.subr.msk.bf16.mxu1 %vm144_vm0, %v4931_v19  ;;  %v4966_v53 = vld [vmem:[#allocation7 + $0x54] ss:$8 sps:$4 sm:$0xff]   ;;  %v4964_v55 = vld [vmem:[#allocation7 + $0x50] ss:$8 sps:$4 sm:$0xff]   ;;  %v4969_v56 = vld [vmem:[#allocation7 + $0xc4] ss:$8 sps:$4 sm:$0xff]  }
  0x46   :  { %v4972_v57 = vld [vmem:[#allocation7 + $0x44] ss:$8 sps:$4 sm:$0xff]   ;;  %v4967_v58 = vld [vmem:[#allocation7 + $0xc0] ss:$8 sps:$4 sm:$0xff]   ;;  %v4975_v60 = vld [vmem:[#allocation7 + $0xb4] ss:$8 sps:$4 sm:$0xff]  }
  0x47   :  { %4229 = vmatmul.mubr.msk.bf16.vlgmr.msra.gmra.mxu0 %vm140_vm1, %v100_v21  ;;  %4231 = vmatmul.mubr.msk.bf16.vlgmr.msra.gmra.mxu1 %vm140_vm1, %v106_v15  ;;  %v4970_v59 = vld [vmem:[#allocation7 + $0x40] ss:$8 sps:$4 sm:$0xff]   ;;  %v4978_v61 = vld [vmem:[#allocation7 + $0x34] ss:$8 sps:$4 sm:$0xff]   ;;  %v4973_v62 = vld [vmem:[#allocation7 + $0xb0] ss:$8 sps:$4 sm:$0xff]  }
  0x48   :  { %395 = vmatpush1.bf16.msra.mxu0 %v377_v23  ;;  %445 = vmatpush1.bf16.msra.mxu1 %v377_v23  ;;  %v4976_v63 = vld [vmem:[#allocation7 + $0x30] ss:$8 sps:$4 sm:$0xff]   ;;  %v4981_v1 = vld [vmem:[#allocation7 + $0xa4] ss:$8 sps:$4 sm:$0xff]   ;;  %v4979_v3 = vld [vmem:[#allocation7 + $0xa0] ss:$8 sps:$4 sm:$0xff]  }
  0x49   :  { %396 = vmatprep.subr.bf16.mxu0 %v4936_v22  ;;  %446 = vmatprep.subr.bf16.mxu1 %v4936_v22  ;;  %v4984_v2 = vld [vmem:[#allocation7 + $0x24] ss:$8 sps:$4 sm:$0xff]   ;;  %v4982_v4 = vld [vmem:[#allocation7 + $0x20] ss:$8 sps:$4 sm:$0xff]   ;;  %748 = vst [vmem:[#allocation2] sm:$0x1] %v5432_v5 }
  0x4a   :  { %414 = vmatprep.mubr.bf16.mxu0 %v5431_v0  ;;  %464 = vmatprep.mubr.bf16.mxu1 %v5431_v0  ;;  %751 = vst [vmem:[#allocation2 + $0xe] sm:$0x1] %v5432_v5  ;;  %2683 = vst [vmem:[#allocation2 + $0xf] sm:$0x1] %v5432_v5  ;;  %v4987_v6 = vld [vmem:[#allocation7 + $0x94] ss:$8 sps:$4 sm:$0xff]  }
  0x4b   :  { %2686 = vst [vmem:[#allocation2 + $0x1d] sm:$0x1] %v5432_v5  ;;  %v4990_v7 = vld [vmem:[#allocation7 + $0x14] ss:$8 sps:$4 sm:$0xff]   ;;  %v4985_v8 = vld [vmem:[#allocation7 + $0x90] ss:$8 sps:$4 sm:$0xff]  }
  0x4c   :  { %397 = vmatpush1.bf16.msra.mxu0 %v4934_v24  ;;  %447 = vmatpush1.bf16.msra.mxu1 %v4934_v24  ;;  %v4988_v9 = vld [vmem:[#allocation7 + $0x10] ss:$8 sps:$4 sm:$0xff]   ;;  %v4993_v10 = vld [vmem:[#allocation7 + $0x84] ss:$8 sps:$4 sm:$0xff]   ;;  %v4991_v12 = vld [vmem:[#allocation7 + $0x80] ss:$8 sps:$4 sm:$0xff]  }
  0x4d   :  { %4244 = vmatprep.subr.msk.bf16.mxu0 %vm144_vm0, %v4937_v27  ;;  %4246 = vmatprep.subr.msk.bf16.mxu1 %vm144_vm0, %v4937_v27  ;;  %v4996_v11 = vld [vmem:[#allocation7 + $0x4] ss:$8 sps:$4 sm:$0xff]   ;;  %v4994_v13 = vld [vmem:[#allocation7] ss:$8 sps:$4 sm:$0xff]   ;;  %v4999_v14 = vld [vmem:[#allocation7 + $0x174] ss:$8 sps:$4 sm:$0xff]  }
  0x4e   :  { %v5002_v15 = vld [vmem:[#allocation7 + $0x1f4] ss:$8 sps:$4 sm:$0xff]  }
  0x4f   :  { %4237 = vmatmul.mubr.msk.bf16.vlgmr.msra.gmra.mxu0 %vm140_vm1, %v100_v21  ;;  %4239 = vmatmul.mubr.msk.bf16.vlgmr.msra.gmra.mxu1 %vm140_vm1, %v109_v29 }
  0x50   :  { %521 = vmatpush1.bf16.msra.mxu0 %v503_v31  ;;  %571 = vmatpush1.bf16.msra.mxu1 %v503_v31 }
  0x51   :  { %522 = vmatprep.subr.bf16.mxu0 %v4942_v30  ;;  %572 = vmatprep.subr.bf16.mxu1 %v4942_v30 }
  0x52   :  { %540 = vmatprep.mubr.bf16.mxu0 %v5431_v0  ;;  %590 = vmatprep.mubr.bf16.mxu1 %v5431_v0 }
  0x54   :  { %523 = vmatpush1.bf16.msra.mxu0 %v4940_v32  ;;  %573 = vmatpush1.bf16.msra.mxu1 %v4940_v32 }
  0x55   :  { %4252 = vmatprep.subr.msk.bf16.mxu0 %vm144_vm0, %v4943_v35  ;;  %4254 = vmatprep.subr.msk.bf16.mxu1 %vm144_vm0, %v4943_v35 }
  0x57   :  { %4245 = vmatmul.mubr.msk.bf16.vlgmr.msra.gmra.mxu0 %vm140_vm1, %v109_v29  ;;  %4247 = vmatmul.mubr.msk.bf16.vlgmr.msra.gmra.mxu1 %vm140_vm1, %v103_v37 }
  0x58   :  { %647 = vmatpush1.bf16.msra.mxu0 %v629_v39  ;;  %697 = vmatpush1.bf16.msra.mxu1 %v629_v39 }
  0x59   :  { %648 = vmatprep.subr.bf16.mxu0 %v4948_v38  ;;  %698 = vmatprep.subr.bf16.mxu1 %v4948_v38 }
  0x5a   :  { %666 = vmatprep.mubr.bf16.mxu0 %v5431_v0  ;;  %716 = vmatprep.mubr.bf16.mxu1 %v5431_v0 }
  0x5c   :  { %649 = vmatpush1.bf16.msra.mxu0 %v4946_v40  ;;  %699 = vmatpush1.bf16.msra.mxu1 %v4946_v40 }
  0x5d   :  { %871 = vmatprep.subr.bf16.mxu0 %v4951_v44  ;;  %994 = vmatprep.subr.bf16.mxu1 %v4954_v45 }
  0x5f   :  { %4253 = vmatmul.mubr.msk.bf16.vlgmr.msra.gmra.mxu0 %vm140_vm1, %v103_v37  ;;  %4255 = vmatmul.mubr.msk.bf16.vlgmr.msra.gmra.mxu1 %vm140_vm1, %v112_v43 }
  0x60   :  { %903 = vmatprep.mubr.bf16.mxu0 %v5431_v0  ;;  %1026 = vmatprep.mubr.bf16.mxu1 %v5431_v0 }
  0x61   :  { %872 = vmatpush1.bf16.msra.mxu0 %v4949_v46  ;;  %995 = vmatpush1.bf16.msra.mxu1 %v4952_v47 }
  0x62   :  { %873 = vmatprep.subr.bf16.mxu0 %v4957_v48  ;;  %996 = vmatprep.subr.bf16.mxu1 %v4960_v49 }
  0x65   :  { %874 = vmatpush1.bf16.msra.mxu0 %v4955_v50  ;;  %997 = vmatpush1.bf16.msra.mxu1 %v4958_v51 }
  0x66   :  { %875 = vmatprep.subr.bf16.mxu0 %v4963_v52  ;;  %998 = vmatprep.subr.bf16.mxu1 %v4966_v53 }
  0x69   :  { %876 = vmatpush1.bf16.msra.mxu0 %v4961_v54  ;;  %999 = vmatpush1.bf16.msra.mxu1 %v4964_v55 }
  0x6a   :  { %877 = vmatprep.subr.bf16.mxu0 %v4969_v56  ;;  %1000 = vmatprep.subr.bf16.mxu1 %v4972_v57 }
  0x6d   :  { %878 = vmatpush1.bf16.msra.mxu0 %v4967_v58  ;;  %1001 = vmatpush1.bf16.msra.mxu1 %v4970_v59 }
  0x6e   :  { %879 = vmatprep.subr.bf16.mxu0 %v4975_v60  ;;  %1002 = vmatprep.subr.bf16.mxu1 %v4978_v61 }
  0x71   :  { %880 = vmatpush1.bf16.msra.mxu0 %v4973_v62  ;;  %1003 = vmatpush1.bf16.msra.mxu1 %v4976_v63 }
  0x72   :  { %881 = vmatprep.subr.bf16.mxu0 %v4981_v1  ;;  %1004 = vmatprep.subr.bf16.mxu1 %v4984_v2 }
  0x75   :  { %882 = vmatpush1.bf16.msra.mxu0 %v4979_v3  ;;  %1005 = vmatpush1.bf16.msra.mxu1 %v4982_v4 }
  0x76   :  { %883 = vmatprep.subr.bf16.mxu0 %v4987_v6  ;;  %1006 = vmatprep.subr.bf16.mxu1 %v4990_v7 }
  0x79   :  { %884 = vmatpush1.bf16.msra.mxu0 %v4985_v8  ;;  %1007 = vmatpush1.bf16.msra.mxu1 %v4988_v9 }
  0x7a   :  { %885 = vmatprep.subr.bf16.mxu0 %v4993_v10  ;;  %1008 = vmatprep.subr.bf16.mxu1 %v4996_v11 }
  0x7d   :  { %886 = vmatpush1.bf16.msra.mxu0 %v4991_v12  ;;  %1009 = vmatpush1.bf16.msra.mxu1 %v4994_v13 }
  0x7e   :  { %1137 = vmatprep.subr.bf16.mxu0 %v4999_v14  ;;  %1284 = vmatprep.subr.bf16.mxu1 %v5002_v15 }
  0xff   :  { %v185_v16 = vpop.f32.mrf.mxu0  ;;  %v255_v17 = vpop.f32.mrf.mxu1 }
 0x100   :  { %v256_v44 = vadd.f32 %v255_v17, %v185_v16 }
 0x101   :  { %v187_v18 = vpop.f32.mrf.mxu0  ;;  %v257_v19 = vpop.f32.mrf.mxu1 }
 0x102   :  { %v258_v48 = vadd.f32 %v257_v19, %v187_v18 }
 0x103   :  { %v189_v20 = vpop.f32.mrf.mxu0  ;;  %v259_v21 = vpop.f32.mrf.mxu1 }
 0x104   :  { %v260_v52 = vadd.f32 %v259_v21, %v189_v20 }
 0x105   :  { %v191_v22 = vpop.f32.mrf.mxu0  ;;  %v261_v23 = vpop.f32.mrf.mxu1 }
 0x106   :  { %v262_v60 = vadd.f32 %v261_v23, %v191_v22 }
 0x107   :  { %v301_v24 = vpop.f32.mrf.mxu0  ;;  %v344_v25 = vpop.f32.mrf.mxu1 }
 0x108   :  { %v345_v45 = vadd.f32 %v344_v25, %v301_v24  ;;  %v4256_v24 = vld [vmem:[%s5877_s2] ss:$0 sm:$0xff] }
 0x109   :  { %v303_v26 = vpop.f32.mrf.mxu0  ;;  %v346_v27 = vpop.f32.mrf.mxu1 }
 0x10a   :  { %v347_v49 = vadd.f32 %v346_v27, %v303_v26 }
 0x10b   :  { %v305_v28 = vpop.f32.mrf.mxu0  ;;  %v348_v29 = vpop.f32.mrf.mxu1 }
 0x10c   :  { %v349_v53 = vadd.f32 %v348_v29, %v305_v28 }
 0x10d   :  { %v307_v30 = vpop.f32.mrf.mxu0  ;;  %v350_v31 = vpop.f32.mrf.mxu1 }
 0x10e   :  { %v351_v61 = vadd.f32 %v350_v31, %v307_v30 }
 0x10f   :  { %v416_v32 = vpop.f32.mrf.mxu0  ;;  %v466_v33 = vpop.f32.mrf.mxu1 }
 0x110   :  { %v425_v50 = vadd.f32 %v416_v32, %v256_v44  ;;  %v475_v51 = vadd.f32 %v466_v33, %v345_v45  ;;  %v5005_v44 = vld [vmem:[#allocation7 + $0x164] ss:$8 sps:$4 sm:$0xff]  }
 0x111   :  { %v418_v34 = vpop.f32.mrf.mxu0  ;;  %v468_v35 = vpop.f32.mrf.mxu1  ;;  %v5008_v45 = vld [vmem:[#allocation7 + $0x1e4] ss:$8 sps:$4 sm:$0xff]  }
 0x112   :  { %v426_v56 = vadd.f32 %v418_v34, %v258_v48  ;;  %v476_v57 = vadd.f32 %v468_v35, %v347_v49  ;;  %v5011_v48 = vld [vmem:[#allocation7 + $0x154] ss:$8 sps:$4 sm:$0xff]  }
 0x113   :  { %v420_v36 = vpop.f32.mrf.mxu0  ;;  %v470_v37 = vpop.f32.mrf.mxu1  ;;  %v5014_v49 = vld [vmem:[#allocation7 + $0x1d4] ss:$8 sps:$4 sm:$0xff]  }
 0x114   :  { %v427_v62 = vadd.f32 %v420_v36, %v260_v52  ;;  %v477_v63 = vadd.f32 %v470_v37, %v349_v53  ;;  %v4997_v37 = vld [vmem:[#allocation7 + $0x170] ss:$8 sps:$4 sm:$0xff]   ;;  %v5017_v52 = vld [vmem:[#allocation7 + $0x144] ss:$8 sps:$4 sm:$0xff]  }
 0x115   :  { %v422_v38 = vpop.f32.mrf.mxu0  ;;  %v472_v39 = vpop.f32.mrf.mxu1  ;;  %v5020_v53 = vld [vmem:[#allocation7 + $0x1c4] ss:$8 sps:$4 sm:$0xff]  }
 0x116   :  { %v428_v8 = vadd.f32 %v422_v38, %v262_v60  ;;  %v478_v9 = vadd.f32 %v472_v39, %v351_v61  ;;  %v5000_v38 = vld [vmem:[#allocation7 + $0x1f0] ss:$8 sps:$4 sm:$0xff]   ;;  %v5029_v60 = vld [vmem:[#allocation7 + $0x124] ss:$8 sps:$4 sm:$0xff]  }
 0x117   :  { %v542_v40 = vpop.f32.mrf.mxu0  ;;  %v592_v41 = vpop.f32.mrf.mxu1  ;;  %v5032_v61 = vld [vmem:[#allocation7 + $0x1a4] ss:$8 sps:$4 sm:$0xff]  }
 0x118   :  { %v551_v58 = vadd.f32 %v542_v40, %v425_v50  ;;  %v601_v59 = vadd.f32 %v592_v41, %v475_v51  ;;  %v5009_v50 = vld [vmem:[#allocation7 + $0x150] ss:$8 sps:$4 sm:$0xff]  }
 0x119   :  { %v544_v42 = vpop.f32.mrf.mxu0  ;;  %v594_v43 = vpop.f32.mrf.mxu1  ;;  %v5012_v51 = vld [vmem:[#allocation7 + $0x1d0] ss:$8 sps:$4 sm:$0xff]  }
 0x11a   :  { %v552_v3 = vadd.f32 %v544_v42, %v426_v56  ;;  %v602_v4 = vadd.f32 %v594_v43, %v476_v57  ;;  %v5023_v56 = vld [vmem:[#allocation7 + $0x134] ss:$8 sps:$4 sm:$0xff]  }
 0x11b   :  { %v546_v46 = vpop.f32.mrf.mxu0  ;;  %v596_v47 = vpop.f32.mrf.mxu1  ;;  %v5026_v57 = vld [vmem:[#allocation7 + $0x1b4] ss:$8 sps:$4 sm:$0xff]  }
 0x11c   :  { %v553_v12 = vadd.f32 %v546_v46, %v427_v62  ;;  %v603_v13 = vadd.f32 %v596_v47, %v477_v63  ;;  %v5003_v46 = vld [vmem:[#allocation7 + $0x160] ss:$8 sps:$4 sm:$0xff]  }
 0x11d   :  { %v548_v54 = vpop.f32.mrf.mxu0  ;;  %v598_v55 = vpop.f32.mrf.mxu1  ;;  %v5006_v47 = vld [vmem:[#allocation7 + $0x1e0] ss:$8 sps:$4 sm:$0xff]  }
 0x11e   :  { %v554_v16 = vadd.f32 %v548_v54, %v428_v8  ;;  %v604_v17 = vadd.f32 %v598_v55, %v478_v9  ;;  %v5015_v54 = vld [vmem:[#allocation7 + $0x140] ss:$8 sps:$4 sm:$0xff]  }
 0x11f   :  { %v668_v1 = vpop.f32.mrf.mxu0  ;;  %v718_v2 = vpop.f32.mrf.mxu1  ;;  %v5018_v55 = vld [vmem:[#allocation7 + $0x1c0] ss:$8 sps:$4 sm:$0xff]  }
 0x120   :  { %v677_v6 = vadd.f32 %v668_v1, %v551_v58  ;;  %v727_v7 = vadd.f32 %v718_v2, %v601_v59  ;;  %v5021_v58 = vld [vmem:[#allocation7 + $0x130] ss:$8 sps:$4 sm:$0xff]   ;;  %v5027_v62 = vld [vmem:[#allocation7 + $0x120] ss:$8 sps:$4 sm:$0xff]   ;;  %v5035_v1 = vld [vmem:[#allocation7 + $0x114] ss:$8 sps:$4 sm:$0xff]  }
 0x121   :  { %v670_v10 = vpop.f32.mrf.mxu0  ;;  %v720_v11 = vpop.f32.mrf.mxu1  ;;  %v5024_v59 = vld [vmem:[#allocation7 + $0x1b0] ss:$8 sps:$4 sm:$0xff]   ;;  %v5030_v63 = vld [vmem:[#allocation7 + $0x1a0] ss:$8 sps:$4 sm:$0xff]   ;;  %v5038_v2 = vld [vmem:[#allocation7 + $0x194] ss:$8 sps:$4 sm:$0xff]  }
 0x122   :  { %v678_v14 = vadd.f32 %v670_v10, %v552_v3  ;;  %v728_v15 = vadd.f32 %v720_v11, %v602_v4  ;;  %v731_v20 = vmax.f32 %v677_v6, %v727_v7  ;;  %v5033_v3 = vld [vmem:[#allocation7 + $0x110] ss:$8 sps:$4 sm:$0xff]   ;;  %v5041_v6 = vld [vmem:[#allocation7 + $0x104] ss:$8 sps:$4 sm:$0xff]   ;;  %v5039_v8 = vld [vmem:[#allocation7 + $0x100] ss:$8 sps:$4 sm:$0xff]  }
 0x123   :  { %v672_v18 = vpop.f32.mrf.mxu0  ;;  %v722_v19 = vpop.f32.mrf.mxu1  ;;  %v5036_v4 = vld [vmem:[#allocation7 + $0x190] ss:$8 sps:$4 sm:$0xff]   ;;  %v5044_v7 = vld [vmem:[#allocation7 + $0x184] ss:$8 sps:$4 sm:$0xff]   ;;  %v5042_v9 = vld [vmem:[#allocation7 + $0x180] ss:$8 sps:$4 sm:$0xff]  }
 0x124   :  { %v732_v21 = vmax.f32 %v678_v14, %v728_v15  ;;  %v679_v22 = vadd.f32 %v672_v18, %v553_v12  ;;  %v729_v23 = vadd.f32 %v722_v19, %v603_v13  ;;  %v5047_v11 = vld [vmem:[#allocation7 + $0x274] ss:$8 sps:$4 sm:$0xff]   ;;  %v5045_v15 = vld [vmem:[#allocation7 + $0x270] ss:$8 sps:$4 sm:$0xff]   ;;  %v5050_v18 = vld [vmem:[#allocation7 + $0x264] ss:$8 sps:$4 sm:$0xff]  }
 0x125   :  { %v674_v25 = vpop.f32.mrf.mxu0  ;;  %v724_v26 = vpop.f32.mrf.mxu1  ;;  %v5048_v19 = vld [vmem:[#allocation7 + $0x260] ss:$8 sps:$4 sm:$0xff]  }
 0x126   :  { %v735_v27 = vmax.f32 %v731_v20, %v732_v21  ;;  %v680_v28 = vadd.f32 %v674_v25, %v554_v16  ;;  %v730_v29 = vadd.f32 %v724_v26, %v604_v17  ;;  %v733_v31 = vmax.f32 %v679_v22, %v729_v23  ;;  %v5053_v20 = vld [vmem:[#allocation7 + $0x254] ss:$8 sps:$4 sm:$0xff]   ;;  %v5051_v21 = vld [vmem:[#allocation7 + $0x250] ss:$8 sps:$4 sm:$0xff]   ;;  %v5056_v22 = vld [vmem:[#allocation7 + $0x244] ss:$8 sps:$4 sm:$0xff]  }
 0x127   :  { %v5054_v23 = vld [vmem:[#allocation7 + $0x240] ss:$8 sps:$4 sm:$0xff]   ;;  %v5057_v25 = vld [vmem:[#allocation7 + $0x230] ss:$8 sps:$4 sm:$0xff]   ;;  %v5062_v26 = vld [vmem:[#allocation7 + $0x224] ss:$8 sps:$4 sm:$0xff]  }
 0x128   :  { %v744_v30 = vadd.f32 %v4256_v24, %v735_v27  ;;  %v734_v32 = vmax.f32 %v680_v28, %v730_v29  ;;  %v5060_v27 = vld [vmem:[#allocation7 + $0x220] ss:$8 sps:$4 sm:$0xff]   ;;  %v5065_v28 = vld [vmem:[#allocation7 + $0x214] ss:$8 sps:$4 sm:$0xff]   ;;  %v5063_v29 = vld [vmem:[#allocation7 + $0x210] ss:$8 sps:$4 sm:$0xff]  }
 0x12a   :  { %v746_v33 = vmax.f32 %v744_v30, 0.0  ;;  %v736_v34 = vmax.f32 %v733_v31, %v734_v32  ;;  %v5068_v30 = vld [vmem:[#allocation7 + $0x204] ss:$8 sps:$4 sm:$0xff]   ;;  %v5066_v31 = vld [vmem:[#allocation7 + $0x200] ss:$8 sps:$4 sm:$0xff]  }
 0x12c   :  { %749 = vst [vmem:[#allocation2 + $0x1] sm:$0xff] %v746_v33  ;;  %v745_v35 = vadd.f32 %v4256_v24, %v736_v34  ;;  %v5059_v24 = vld [vmem:[#allocation7 + $0x234] ss:$8 sps:$4 sm:$0xff]  }
 0x12e   :  { %v747_v36 = vmax.f32 %v745_v35, 0.0  ;;  %v5069_v35 = vld [vmem:[#allocation9 + $0x38] sm:$0xff]  }
 0x130   :  { %750 = vst [vmem:[#allocation2 + $0x9] sm:$0x1f] %v747_v36  ;;  %v5070_v36 = vld [vmem:[#allocation9 + $0x78] sm:$0xff]  }
 0x133   :  { %v752_v40 = vld [vmem:[#allocation2] sm:$0xff] }
 0x137   :  { %v772_v39 = vld [vmem:[#allocation2 + $0x9] sm:$0x7] }
 0x138   :  { %v753_v41 = vld [vmem:[#allocation2 + $0x8] sm:$0x7]  ;;  %v773_v42 = vpack.c.bf16 %v772_v39, %v746_v33  ;;  %v1185_v14 = vld [vmem:[#allocation2 + $0xb] sm:$0x7] }
 0x139   :  { %v754_v43 = vpack.c.bf16 %v753_v41, %v752_v40  ;;  %v1037_v10 = vld [vmem:[#allocation2 + $0x2] sm:$0xff]  ;;  %v1038_v12 = vld [vmem:[#allocation2 + $0xa] sm:$0x7] }
 0x13a   :  { %904 = vmatmul.mubr.bf16.vlgmr.msra.gmra.mxu0 %v773_v42  ;;  %v1184_v13 = vld [vmem:[#allocation2 + $0x3] sm:$0xff]  ;;  %v1039_v16 = vpack.c.bf16 %v1038_v12, %v1037_v10  ;;  %v1332_v33 = vld [vmem:[#allocation2 + $0xc] sm:$0x7] }
 0x13b   :  { %1027 = vmatmul.mubr.bf16.vlgmr.msra.gmra.mxu1 %v754_v43  ;;  %1138 = vmatpush1.bf16.msra.mxu0 %v4997_v37  ;;  %v1186_v17 = vpack.c.bf16 %v1185_v14, %v1184_v13  ;;  %v1331_v32 = vld [vmem:[#allocation2 + $0x4] sm:$0xff]  ;;  %v5071_v37 = vld [vmem:[#allocation9 + $0x30] sm:$0xff]   ;;  %v5077_v43 = vld [vmem:[#allocation9 + $0x18] sm:$0xff]  }
 0x13c   :  { %1285 = vmatpush1.bf16.msra.mxu1 %v5000_v38  ;;  %1139 = vmatprep.subr.bf16.mxu0 %v5005_v44  ;;  %v1333_v34 = vpack.c.bf16 %v1332_v33, %v1331_v32  ;;  %v5072_v38 = vld [vmem:[#allocation9 + $0x70] sm:$0xff]   ;;  %v5073_v39 = vld [vmem:[#allocation9 + $0x28] sm:$0xff]   ;;  %v5075_v41 = vld [vmem:[#allocation9 + $0x20] sm:$0xff]  }
 0x13d   :  { %1286 = vmatprep.subr.bf16.mxu1 %v5008_v45  ;;  %1169 = vmatprep.mubr.bf16.mxu0 %v5431_v0  ;;  %v5074_v40 = vld [vmem:[#allocation9 + $0x68] sm:$0xff]   ;;  %v5076_v42 = vld [vmem:[#allocation9 + $0x60] sm:$0xff]   ;;  %v5078_v44 = vld [vmem:[#allocation9 + $0x58] sm:$0xff]  }
 0x13e   :  { %1316 = vmatprep.mubr.bf16.mxu1 %v5431_v0  ;;  %v5079_v45 = vld [vmem:[#allocation9 + $0x10] sm:$0xff]   ;;  %v5085_v33 = vld [vmem:[#allocation9 + $0xf8] sm:$0xff]  }
 0x13f   :  { %1140 = vmatpush1.bf16.msra.mxu0 %v5003_v46  ;;  %v5080_v46 = vld [vmem:[#allocation9 + $0x50] sm:$0xff]  }
 0x140   :  { %1287 = vmatpush1.bf16.msra.mxu1 %v5006_v47  ;;  %1141 = vmatprep.subr.bf16.mxu0 %v5011_v48  ;;  %v5081_v47 = vld [vmem:[#allocation9 + $0x8] sm:$0xff]  }
 0x141   :  { %1288 = vmatprep.subr.bf16.mxu1 %v5014_v49  ;;  %v5082_v48 = vld [vmem:[#allocation9 + $0x48] sm:$0xff]   ;;  %v5083_v49 = vld [vmem:[#allocation9] sm:$0xff]  }
 0x143   :  { %1142 = vmatpush1.bf16.msra.mxu0 %v5009_v50  ;;  %v5084_v50 = vld [vmem:[#allocation9 + $0x40] sm:$0xff]  }
 0x144   :  { %1289 = vmatpush1.bf16.msra.mxu1 %v5012_v51  ;;  %1143 = vmatprep.subr.bf16.mxu0 %v5017_v52 }
 0x145   :  { %1290 = vmatprep.subr.bf16.mxu1 %v5020_v53 }
 0x147   :  { %1144 = vmatpush1.bf16.msra.mxu0 %v5015_v54 }
 0x148   :  { %1291 = vmatpush1.bf16.msra.mxu1 %v5018_v55  ;;  %1145 = vmatprep.subr.bf16.mxu0 %v5023_v56 }
 0x149   :  { %1292 = vmatprep.subr.bf16.mxu1 %v5026_v57 }
 0x14b   :  { %1146 = vmatpush1.bf16.msra.mxu0 %v5021_v58 }
 0x14c   :  { %1293 = vmatpush1.bf16.msra.mxu1 %v5024_v59  ;;  %1147 = vmatprep.subr.bf16.mxu0 %v5029_v60 }
 0x14d   :  { %1294 = vmatprep.subr.bf16.mxu1 %v5032_v61 }
 0x14f   :  { %1148 = vmatpush1.bf16.msra.mxu0 %v5027_v62 }
 0x150   :  { %1295 = vmatpush1.bf16.msra.mxu1 %v5030_v63  ;;  %1149 = vmatprep.subr.bf16.mxu0 %v5035_v1 }
 0x151   :  { %1296 = vmatprep.subr.bf16.mxu1 %v5038_v2 }
 0x153   :  { %1150 = vmatpush1.bf16.msra.mxu0 %v5033_v3 }
 0x154   :  { %1297 = vmatpush1.bf16.msra.mxu1 %v5036_v4  ;;  %1151 = vmatprep.subr.bf16.mxu0 %v5041_v6 }
 0x155   :  { %1298 = vmatprep.subr.bf16.mxu1 %v5044_v7 }
 0x157   :  { %1152 = vmatpush1.bf16.msra.mxu0 %v5039_v8 }
 0x158   :  { %1299 = vmatpush1.bf16.msra.mxu1 %v5042_v9  ;;  %1431 = vmatprep.subr.bf16.mxu0 %v5047_v11 }
 0x159   :  { %4667 = vmatprep.subr.bf16.mxu1 %v5432_v5 }
 0x15a   :  { %1170 = vmatmul.mubr.bf16.vlgmr.msra.gmra.mxu0 %v1039_v16 }
 0x15b   :  { %1317 = vmatmul.mubr.bf16.vlgmr.msra.gmra.mxu1 %v1186_v17  ;;  %1432 = vmatpush1.bf16.msra.mxu0 %v5045_v15 }
 0x15c   :  { %1463 = vmatprep.mubr.bf16.mxu0 %v5431_v0  ;;  %1433 = vmatprep.subr.bf16.mxu0 %v5050_v18 }
 0x15d   :  { %4668 = vmatpush3.bf16.msra.mxu1 %v5070_v36  ;;  %4683 = vmatprep.mubr.msk.bf16.mxu1 %vm5433_vm2, %v5432_v5 }
 0x15e   :  { %4669 = vmatprep.subr.bf16.mxu1 %v5432_v5 }
 0x15f   :  { %1434 = vmatpush1.bf16.msra.mxu0 %v5048_v19  ;;  %v4337_v19 = vld [vmem:[%s5879_s4] ss:$0 sm:$0xff] }
 0x160   :  { %1435 = vmatprep.subr.bf16.mxu0 %v5053_v20 }
 0x161   :  { %4670 = vmatpush3.bf16.msra.mxu1 %v5072_v38  ;;  %v5088_v38 = vld [vmem:[#allocation9 + $0xb0] sm:$0xff]  }
 0x162   :  { %4671 = vmatprep.subr.bf16.mxu1 %v5432_v5 }
 0x163   :  { %1436 = vmatpush1.bf16.msra.mxu0 %v5051_v21 }
 0x164   :  { %1437 = vmatprep.subr.bf16.mxu0 %v5056_v22 }
 0x165   :  { %4672 = vmatpush3.bf16.msra.mxu1 %v5074_v40  ;;  %v5090_v40 = vld [vmem:[#allocation9 + $0xa8] sm:$0xff]  }
 0x166   :  { %4673 = vmatprep.subr.bf16.mxu1 %v5432_v5 }
 0x167   :  { %1438 = vmatpush1.bf16.msra.mxu0 %v5054_v23 }
 0x168   :  { %1439 = vmatprep.subr.bf16.mxu0 %v5059_v24 }
 0x169   :  { %4674 = vmatpush3.bf16.msra.mxu1 %v5076_v42  ;;  %v5092_v42 = vld [vmem:[#allocation9 + $0xa0] sm:$0xff]  }
 0x16a   :  { %4675 = vmatprep.subr.bf16.mxu1 %v5432_v5 }
 0x16b   :  { %1440 = vmatpush1.bf16.msra.mxu0 %v5057_v25 }
 0x16c   :  { %1441 = vmatprep.subr.bf16.mxu0 %v5062_v26 }
 0x16d   :  { %4676 = vmatpush3.bf16.msra.mxu1 %v5078_v44  ;;  %v5094_v44 = vld [vmem:[#allocation9 + $0x98] sm:$0xff]  }
 0x16e   :  { %4677 = vmatprep.subr.bf16.mxu1 %v5432_v5 }
 0x16f   :  { %1442 = vmatpush1.bf16.msra.mxu0 %v5060_v27 }
 0x170   :  { %1443 = vmatprep.subr.bf16.mxu0 %v5065_v28 }
 0x171   :  { %4678 = vmatpush3.bf16.msra.mxu1 %v5080_v46  ;;  %v5096_v46 = vld [vmem:[#allocation9 + $0x90] sm:$0xff]  }
 0x172   :  { %4679 = vmatprep.subr.bf16.mxu1 %v5432_v5 }
 0x173   :  { %1444 = vmatpush1.bf16.msra.mxu0 %v5063_v29 }
 0x174   :  { %1445 = vmatprep.subr.bf16.mxu0 %v5068_v30 }
 0x175   :  { %4680 = vmatpush3.bf16.msra.mxu1 %v5082_v48  ;;  %v5098_v48 = vld [vmem:[#allocation9 + $0x88] sm:$0xff]  }
 0x176   :  { %4681 = vmatprep.subr.bf16.mxu1 %v5432_v5 }
 0x177   :  { %1446 = vmatpush1.bf16.msra.mxu0 %v5066_v31 }
 0x178   :  { %4687 = vmatprep.subr.bf16.mxu0 %v5432_v5 }
 0x179   :  { %4682 = vmatpush3.bf16.msra.mxu1 %v5084_v50  ;;  %v5103_v50 = vld [vmem:[#allocation4 + $0x34] ss:$8 sps:$4 sm:$0x7f]  }
 0x17a   :  { %1464 = vmatmul.mubr.bf16.vlgmr.msra.gmra.mxu0 %v1333_v34  ;;  %4707 = vmatprep.subr.bf16.mxu1 %v5432_v5 }
 0x17b   :  { %4688 = vmatpush3.bf16.msra.mxu0 %v5069_v35  ;;  %4703 = vmatprep.mubr.msk.bf16.mxu0 %vm5433_vm2, %v5432_v5  ;;  %v5086_v35 = vld [vmem:[#allocation9 + $0xb8] sm:$0xff]  }
 0x17c   :  { %4689 = vmatprep.subr.bf16.mxu0 %v5432_v5 }
 0x17f   :  { %4690 = vmatpush3.bf16.msra.mxu0 %v5071_v37  ;;  %v5087_v37 = vld [vmem:[#allocation9 + $0xf0] sm:$0xff]  }
 0x180   :  { %4691 = vmatprep.subr.bf16.mxu0 %v5432_v5 }
 0x183   :  { %4692 = vmatpush3.bf16.msra.mxu0 %v5073_v39  ;;  %v5089_v39 = vld [vmem:[#allocation9 + $0xe8] sm:$0xff]  }
 0x184   :  { %4693 = vmatprep.subr.bf16.mxu0 %v5432_v5 }
 0x187   :  { %4694 = vmatpush3.bf16.msra.mxu0 %v5075_v41  ;;  %v5091_v41 = vld [vmem:[#allocation9 + $0xe0] sm:$0xff]  }
 0x188   :  { %4695 = vmatprep.subr.bf16.mxu0 %v5432_v5 }
 0x18b   :  { %4696 = vmatpush3.bf16.msra.mxu0 %v5077_v43  ;;  %v5093_v43 = vld [vmem:[#allocation9 + $0xd8] sm:$0xff]  }
 0x18c   :  { %4697 = vmatprep.subr.bf16.mxu0 %v5432_v5 }
 0x18f   :  { %4698 = vmatpush3.bf16.msra.mxu0 %v5079_v45  ;;  %v5095_v45 = vld [vmem:[#allocation9 + $0xd0] sm:$0xff]  }
 0x190   :  { %4699 = vmatprep.subr.bf16.mxu0 %v5432_v5 }
 0x193   :  { %4700 = vmatpush3.bf16.msra.mxu0 %v5081_v47  ;;  %v5097_v47 = vld [vmem:[#allocation9 + $0xc8] sm:$0xff]  }
 0x194   :  { %4701 = vmatprep.subr.bf16.mxu0 %v5432_v5 }
 0x197   :  { %4702 = vmatpush3.bf16.msra.mxu0 %v5083_v49  ;;  %v5099_v49 = vld [vmem:[#allocation9 + $0xc0] sm:$0xff]  }
 0x198   :  { %4727 = vmatprep.subr.bf16.mxu0 %v5432_v5 }
 0x1fa   :  { %v905_v51 = vpop.f32.mrf.mxu0 }
 0x1fb   :  { %v1028_v52 = vpop.f32.mrf.mxu1 }
 0x1fc   :  { %v907_v53 = vpop.f32.mrf.mxu0  ;;  %v1029_v6 = vadd.f32 %v1028_v52, %v905_v51  ;;  %v5105_v51 = vld [vmem:[#allocation4 + $0x30] ss:$8 sps:$4 sm:$0x7f]   ;;  %v5100_v52 = vld [vmem:[#allocation9 + $0x80] sm:$0xff]  }
 0x1fd   :  { %v1030_v54 = vpop.f32.mrf.mxu1 }
 0x1fe   :  { %v909_v55 = vpop.f32.mrf.mxu0  ;;  %v1031_v7 = vadd.f32 %v1030_v54, %v907_v53  ;;  %v2084_v54 = vsel %vm144_vm0, %v5105_v51, 0  ;;  %v5150_v51 = vld [vmem:[#allocation7 + $0x64] ss:$8 sps:$4 sm:$0xff]  }
 0x1ff   :  { %v1032_v56 = vpop.f32.mrf.mxu1 }
 0x200   :  { %v1033_v57 = vadd.f32 %v1032_v56, %v909_v55  ;;  %v911_v58 = vpop.f32.mrf.mxu0  ;;  %v5109_v55 = vld [vmem:[#allocation4 + $0x24] ss:$8 sps:$4 sm:$0xff]   ;;  %v5101_v56 = vld [vmem:[#allocation9 + $0x138] sm:$0xff]  }
 0x201   :  { %v1034_v59 = vpop.f32.mrf.mxu1 }
 0x202   :  { %v1035_v60 = vadd.f32 %v1034_v59, %v911_v58  ;;  %v5107_v58 = vld [vmem:[#allocation4 + $0x20] ss:$8 sps:$4 sm:$0xff]  }
 0x203   :  { %v2045_v59 = vld [vmem:[%s5875_s0 + $0x2d] sm:$0xff] }
 0x21a   :  { %v1171_v61 = vpop.f32.mrf.mxu0 }
 0x21b   :  { %v1318_v4 = vpop.f32.mrf.mxu1  ;;  %v1180_v9 = vadd.f32 %v1171_v61, %v1029_v6  ;;  %v5102_v61 = vld [vmem:[#allocation9 + $0x130] sm:$0xff]   ;;  %v5110_v6 = vld [vmem:[#allocation9 + $0x120] sm:$0xff]  }
 0x21c   :  { %v1173_v62 = vpop.f32.mrf.mxu0 }
 0x21d   :  { %v1320_v8 = vpop.f32.mrf.mxu1  ;;  %v1181_v10 = vadd.f32 %v1173_v62, %v1031_v7  ;;  %v1327_v13 = vadd.f32 %v1318_v4, %v1180_v9  ;;  %v5115_v4 = vld [vmem:[#allocation4 + $0x50] ss:$8 sps:$4 sm:$0x7f]   ;;  %v5675_v9 = vld [vmem:[#allocation4 + $0x44] ss:$8 sps:$4 sm:$0xff]  }
 0x21e   :  { %v1175_v63 = vpop.f32.mrf.mxu0 }
 0x21f   :  { %v1182_v1 = vadd.f32 %v1175_v63, %v1033_v57  ;;  %v1322_v11 = vpop.f32.mrf.mxu1  ;;  %v1328_v14 = vadd.f32 %v1320_v8, %v1181_v10  ;;  %v5106_v63 = vld [vmem:[#allocation9 + $0x128] sm:$0xff]   ;;  %v5673_v8 = vsel %vm144_vm0, %v5115_v4, 0  ;;  %v5111_v10 = vld [vmem:[#allocation9 + $0x118] sm:$0xff]  }
 0x220   :  { %v1177_v2 = vpop.f32.mrf.mxu0  ;;  %v5174_v4 = vld [vmem:[#allocation7 + $0x24] ss:$8 sps:$4 sm:$0xff]  }
 0x221   :  { %v1183_v3 = vadd.f32 %v1177_v2, %v1035_v60  ;;  %v1324_v18 = vpop.f32.mrf.mxu1  ;;  %v1329_v21 = vadd.f32 %v1322_v11, %v1182_v1  ;;  %v2046_v60 = vld [vmem:[%s5875_s0 + $0x35] sm:$0x1f]  ;;  %v2039_v1 = vld [vmem:[%s5875_s0 + $0x1f] sm:$0xff]  ;;  %v2040_v2 = vld [vmem:[%s5875_s0 + $0x27] sm:$0x1f] }
 0x222   :  { %v5654_v62 = vpack.c.bf16 %v2046_v60, %v2045_v59  ;;  %v2041_v7 = vpack.c.bf16 %v2040_v2, %v2039_v1  ;;  %v5680_v11 = vld [vmem:[#allocation4 + $0x40] ss:$8 sps:$4 sm:$0xff]   ;;  %v5162_v59 = vld [vmem:[#allocation7 + $0x44] ss:$8 sps:$4 sm:$0xff]   ;;  %v5163_v1 = vld [vmem:[#allocation7 + $0xb0] ss:$8 sps:$4 sm:$0xff]  }
 0x223   :  { %v1330_v22 = vadd.f32 %v1324_v18, %v1183_v3  ;;  %v5667_v3 = vld [vmem:[#allocation4 + $0x54] ss:$8 sps:$4 sm:$0x7f]   ;;  %v5116_v18 = vld [vmem:[#allocation9 + $0x108] sm:$0xff]   ;;  %v5166_v2 = vld [vmem:[#allocation7 + $0x30] ss:$8 sps:$4 sm:$0xff]  }
 0x224   :  { %v5157_v60 = vld [vmem:[#allocation7 + $0xc0] ss:$8 sps:$4 sm:$0xff]  }
 0x23a   :  { %v1465_v12 = vpop.f32.mrf.mxu0 }
 0x23b   :  { %v1474_v16 = vadd.f32 %v1465_v12, %v1327_v13  ;;  %v5684_v12 = vld [vmem:[#allocation4 + $0x74] ss:$8 sps:$4 sm:$0x7f]   ;;  %v5123_v13 = vld [vmem:[#allocation4 + $0x70] ss:$8 sps:$4 sm:$0x7f]  }
 0x23c   :  { %v1467_v15 = vpop.f32.mrf.mxu0 }
 0x23d   :  { %v1475_v17 = vadd.f32 %v1467_v15, %v1328_v14  ;;  %v5112_v14 = vld [vmem:[#allocation9 + $0x110] sm:$0xff]  }
 0x23e   :  { %v1469_v20 = vpop.f32.mrf.mxu0 }
 0x23f   :  { %v1478_v23 = vmax.f32 %v1474_v16, %v1475_v17  ;;  %v1476_v26 = vadd.f32 %v1469_v20, %v1329_v21  ;;  %v5692_v16 = vsel %vm144_vm0, %v5123_v13, 0  ;;  %v5694_v17 = vld [vmem:[#allocation4 + $0x64] ss:$8 sps:$4 sm:$0xff]   ;;  %v5127_v20 = vld [vmem:[#allocation4 + $0x60] ss:$8 sps:$4 sm:$0xff]  }
 0x240   :  { %v1471_v24 = vpop.f32.mrf.mxu0  ;;  %v2048_v21 = vld [vmem:[%s5875_s0 + $0x2e] sm:$0xff] }
 0x241   :  { %v1487_v25 = vadd.f32 %v4337_v19, %v1478_v23  ;;  %v1477_v27 = vadd.f32 %v1471_v24, %v1330_v22  ;;  %v2049_v22 = vld [vmem:[%s5875_s0 + $0x36] sm:$0x1f]  ;;  %v5186_v13 = vld [vmem:[#allocation7 + $0x4] ss:$8 sps:$4 sm:$0xff]  }
 0x242   :  { %v5133_v23 = vld [vmem:[#allocation4 + $0x94] ss:$8 sps:$4 sm:$0x7f]   ;;  %v5135_v24 = vld [vmem:[#allocation4 + $0x90] ss:$8 sps:$4 sm:$0x7f]  }
 0x243   :  { %v1489_v28 = vmax.f32 %v1487_v25, 0.0  ;;  %v1479_v29 = vmax.f32 %v1476_v26, %v1477_v27  ;;  %v5120_v25 = vld [vmem:[#allocation9 + $0x100] sm:$0xff]   ;;  %v5124_v27 = vld [vmem:[#allocation4 + $0x14] ss:$8 sps:$4 sm:$0x7f]  }
 0x245   :  { %v1492_v30 = vrot.slane %v1489_v28, 1  ;;  %v5615_v31 = vadd.f32 %v4337_v19, %v1479_v29  ;;  %v2050_v29 = vpack.c.bf16 %v2049_v22, %v2048_v21 }
 0x247   :  { %v1494_v32 = vmax.f32 %v1489_v28, %v1492_v30  ;;  %v1490_v15 = vmax.f32 %v5615_v31, 0.0  ;;  %v5126_v28 = vld [vmem:[#allocation4 + $0x10] ss:$8 sps:$4 sm:$0x7f]   ;;  %v2564_v30 = vsel %vm144_vm0, %v5135_v24, 0 }
 0x248   :  { %v5138_v31 = vld [vmem:[#allocation4 + $0x84] ss:$8 sps:$4 sm:$0xff]  }
 0x249   :  { %v5617_v34 = vpack.c.bf16 %v1494_v32, %v1494_v32  ;;  %v1925_v19 = vrot.slane %v1490_v15, 1 }
 0x24b   :  { %4704 = vmatmul.mubr.bf16.vlgmr.msra.gmra.mxu0 %v5617_v34  ;;  %v1530_v36 = vrot.slane %v5617_v34, 1  ;;  %v1833_v53 = vrot.slane %v5617_v34, 3  ;;  %v1725_v57 = vrot.slane %v5617_v34, 2  ;;  %v1927_v26 = vmax.f32 %v1490_v15, %v1925_v19  ;;  %v5132_v34 = vld [vmem:[#allocation4 + $0x4] ss:$8 sps:$4 sm:$0xff]  }
 0x24c   :  { %4728 = vmatpush3.bf16.msra.mxu0 %v5085_v33  ;;  %4743 = vmatprep.mubr.msk.bf16.mxu0 %vm5433_vm2, %v5432_v5  ;;  %v2154_v33 = vsel %vm144_vm0, %v5126_v28, 0  ;;  %v5184_v15 = vld [vmem:[#allocation7] ss:$8 sps:$4 sm:$0xff]  }
 0x24d   :  { %4684 = vmatmul.mubr.bf16.vlgmr.msra.gmra.mxu1 %v1530_v36  ;;  %4729 = vmatprep.subr.bf16.mxu0 %v5432_v5  ;;  %v1928_v32 = vpack.c.bf16 %v1927_v26, %v1927_v26  ;;  %v2042_v36 = vld [vmem:[%s5875_s0 + $0x20] sm:$0xff] }
 0x24e   :  { %4708 = vmatpush3.bf16.msra.mxu1 %v5086_v35  ;;  %4723 = vmatprep.mubr.msk.bf16.mxu1 %vm5433_vm2, %v5432_v5  ;;  %v5136_v35 = vld [vmem:[#allocation4 + $0x80] ss:$8 sps:$4 sm:$0xff]  }
 0x24f   :  { %4709 = vmatprep.subr.bf16.mxu1 %v5432_v5 }
 0x250   :  { %4730 = vmatpush3.bf16.msra.mxu0 %v5087_v37  ;;  %v2043_v37 = vld [vmem:[%s5875_s0 + $0x28] sm:$0x1f] }
 0x251   :  { %4731 = vmatprep.subr.bf16.mxu0 %v5432_v5 }
 0x252   :  { %4710 = vmatpush3.bf16.msra.mxu1 %v5088_v38  ;;  %v5130_v38 = vld [vmem:[#allocation4] ss:$8 sps:$4 sm:$0xff]  }
 0x253   :  { %4711 = vmatprep.subr.bf16.mxu1 %v5432_v5 }
 0x254   :  { %4732 = vmatpush3.bf16.msra.mxu0 %v5089_v39  ;;  %v2036_v39 = vld [vmem:[%s5875_s0 + $0x1e] sm:$0xff] }
 0x255   :  { %4733 = vmatprep.subr.bf16.mxu0 %v5432_v5 }
 0x256   :  { %4712 = vmatpush3.bf16.msra.mxu1 %v5090_v40  ;;  %v2037_v40 = vld [vmem:[%s5875_s0 + $0x26] sm:$0x1f] }
 0x257   :  { %4713 = vmatprep.subr.bf16.mxu1 %v5432_v5 }
 0x258   :  { %4734 = vmatpush3.bf16.msra.mxu0 %v5091_v41  ;;  %v2044_v41 = vpack.c.bf16 %v2043_v37, %v2042_v36 }
 0x259   :  { %4735 = vmatprep.subr.bf16.mxu0 %v5432_v5 }
 0x25a   :  { %4714 = vmatpush3.bf16.msra.mxu1 %v5092_v42  ;;  %v2038_v42 = vpack.c.bf16 %v2037_v40, %v2036_v39 }
 0x25b   :  { %4715 = vmatprep.subr.bf16.mxu1 %v5432_v5 }
 0x25c   :  { %4736 = vmatpush3.bf16.msra.mxu0 %v5093_v43  ;;  %v2051_v43 = vld [vmem:[%s5875_s0 + $0x2f] sm:$0xff] }
 0x25d   :  { %4737 = vmatprep.subr.bf16.mxu0 %v5432_v5 }
 0x25e   :  { %4716 = vmatpush3.bf16.msra.mxu1 %v5094_v44  ;;  %v2052_v44 = vld [vmem:[%s5875_s0 + $0x37] sm:$0x1f] }
 0x25f   :  { %4717 = vmatprep.subr.bf16.mxu1 %v5432_v5 }
 0x260   :  { %4738 = vmatpush3.bf16.msra.mxu0 %v5095_v45  ;;  %v2053_v45 = vpack.c.bf16 %v2052_v44, %v2051_v43 }
 0x261   :  { %4739 = vmatprep.subr.bf16.mxu0 %v5432_v5 }
 0x262   :  { %4718 = vmatpush3.bf16.msra.mxu1 %v5096_v46  ;;  %v5141_v46 = vld [vmem:[#allocation7 + $0xf4] ss:$8 sps:$4 sm:$0xff]  }
 0x263   :  { %4719 = vmatprep.subr.bf16.mxu1 %v5432_v5 }
 0x264   :  { %4740 = vmatpush3.bf16.msra.mxu0 %v5097_v47  ;;  %v5144_v47 = vld [vmem:[#allocation7 + $0x74] ss:$8 sps:$4 sm:$0xff]  }
 0x265   :  { %4741 = vmatprep.subr.bf16.mxu0 %v5432_v5 }
 0x266   :  { %4720 = vmatpush3.bf16.msra.mxu1 %v5098_v48  ;;  %v5139_v48 = vld [vmem:[#allocation7 + $0xf0] ss:$8 sps:$4 sm:$0xff]  }
 0x267   :  { %4721 = vmatprep.subr.bf16.mxu1 %v5432_v5 }
 0x268   :  { %4742 = vmatpush3.bf16.msra.mxu0 %v5099_v49  ;;  %v5142_v49 = vld [vmem:[#allocation7 + $0x70] ss:$8 sps:$4 sm:$0xff]  }
 0x269   :  { %4382 = vmatprep.subr.msk.bf16.mxu0 %vm144_vm0, %v5103_v50 }
 0x26a   :  { %4722 = vmatpush3.bf16.msra.mxu1 %v5100_v52  ;;  %v5145_v52 = vld [vmem:[#allocation7 + $0xe0] ss:$8 sps:$4 sm:$0xff]  }
 0x26b   :  { %4744 = vmatmul.mubr.bf16.vlgmr.msra.gmra.mxu0 %v1833_v53  ;;  %4747 = vmatprep.subr.bf16.mxu1 %v5432_v5  ;;  %v5148_v53 = vld [vmem:[#allocation7 + $0x60] ss:$8 sps:$4 sm:$0xff]  }
 0x26c   :  { %2102 = vmatpush1.bf16.msra.mxu0 %v2084_v54  ;;  %2121 = vmatprep.mubr.bf16.mxu0 %v5431_v0 }
 0x26d   :  { %4724 = vmatmul.mubr.bf16.vlgmr.msra.gmra.mxu1 %v1725_v57  ;;  %2103 = vmatprep.subr.bf16.mxu0 %v5109_v55  ;;  %v5154_v57 = vld [vmem:[#allocation7 + $0x50] ss:$8 sps:$4 sm:$0xff]  }
 0x26e   :  { %4748 = vmatpush3.bf16.msra.mxu1 %v5101_v56  ;;  %4763 = vmatprep.mubr.msk.bf16.mxu1 %vm5433_vm2, %v5432_v5  ;;  %v5151_v56 = vld [vmem:[#allocation7 + $0xd0] ss:$8 sps:$4 sm:$0xff]  }
 0x26f   :  { %4749 = vmatprep.subr.bf16.mxu1 %v5432_v5 }
 0x270   :  { %2104 = vmatpush1.bf16.msra.mxu0 %v5107_v58 }
 0x271   :  { %4390 = vmatprep.subr.msk.bf16.mxu0 %vm144_vm0, %v5103_v50  ;;  %v5147_v50 = vld [vmem:[#allocation7 + $0xe4] ss:$8 sps:$4 sm:$0xff]  }
 0x272   :  { %4750 = vmatpush3.bf16.msra.mxu1 %v5102_v61  ;;  %v5160_v61 = vld [vmem:[#allocation7 + $0x40] ss:$8 sps:$4 sm:$0xff]  }
 0x273   :  { %4751 = vmatprep.subr.bf16.mxu1 %v5432_v5  ;;  %4383 = vmatmul.mubr.msk.bf16.vlgmr.msra.gmra.mxu0 %vm140_vm1, %v5654_v62 }
 0x274   :  { %2218 = vmatpush1.bf16.msra.mxu0 %v2084_v54  ;;  %2237 = vmatprep.mubr.bf16.mxu0 %v5431_v0  ;;  %v5153_v54 = vld [vmem:[#allocation7 + $0xd4] ss:$8 sps:$4 sm:$0xff]  }
 0x275   :  { %2219 = vmatprep.subr.bf16.mxu0 %v5109_v55  ;;  %v5156_v55 = vld [vmem:[#allocation7 + $0x54] ss:$8 sps:$4 sm:$0xff]  }
 0x276   :  { %4752 = vmatpush3.bf16.msra.mxu1 %v5106_v63  ;;  %v5168_v63 = vld [vmem:[#allocation7 + $0x34] ss:$8 sps:$4 sm:$0xff]  }
 0x277   :  { %4753 = vmatprep.subr.bf16.mxu1 %v5432_v5 }
 0x278   :  { %2220 = vmatpush1.bf16.msra.mxu0 %v5107_v58  ;;  %v5159_v58 = vld [vmem:[#allocation7 + $0xc4] ss:$8 sps:$4 sm:$0xff]  }
 0x279   :  { %4398 = vmatprep.subr.msk.bf16.mxu0 %vm144_vm0, %v5667_v3 }
 0x27a   :  { %4754 = vmatpush3.bf16.msra.mxu1 %v5110_v6  ;;  %v5169_v6 = vld [vmem:[#allocation7 + $0xa0] ss:$8 sps:$4 sm:$0xff]  }
 0x27b   :  { %4755 = vmatprep.subr.bf16.mxu1 %v5432_v5  ;;  %4391 = vmatmul.mubr.msk.bf16.vlgmr.msra.gmra.mxu0 %vm140_vm1, %v2041_v7 }
 0x27c   :  { %2332 = vmatpush1.bf16.msra.mxu0 %v5673_v8  ;;  %2351 = vmatprep.mubr.bf16.mxu0 %v5431_v0 }
 0x27d   :  { %2333 = vmatprep.subr.bf16.mxu0 %v5675_v9 }
 0x27e   :  { %4756 = vmatpush3.bf16.msra.mxu1 %v5111_v10  ;;  %v5175_v10 = vld [vmem:[#allocation7 + $0x90] ss:$8 sps:$4 sm:$0xff]  }
 0x27f   :  { %4757 = vmatprep.subr.bf16.mxu1 %v5432_v5 }
 0x280   :  { %2334 = vmatpush1.bf16.msra.mxu0 %v5680_v11 }
 0x281   :  { %4406 = vmatprep.subr.msk.bf16.mxu0 %vm144_vm0, %v5684_v12 }
 0x282   :  { %4758 = vmatpush3.bf16.msra.mxu1 %v5112_v14  ;;  %v5181_v14 = vld [vmem:[#allocation7 + $0x80] ss:$8 sps:$4 sm:$0xff]  }
 0x283   :  { %4759 = vmatprep.subr.bf16.mxu1 %v5432_v5  ;;  %4399 = vmatmul.mubr.msk.bf16.vlgmr.msra.gmra.mxu0 %vm140_vm1, %v2041_v7  ;;  %v5172_v7 = vld [vmem:[#allocation7 + $0x20] ss:$8 sps:$4 sm:$0xff]  }
 0x284   :  { %2457 = vmatpush1.bf16.msra.mxu0 %v5692_v16  ;;  %2476 = vmatprep.mubr.bf16.mxu0 %v5431_v0 }
 0x285   :  { %2458 = vmatprep.subr.bf16.mxu0 %v5694_v17 }
 0x286   :  { %4760 = vmatpush3.bf16.msra.mxu1 %v5116_v18 }
 0x287   :  { %4761 = vmatprep.subr.bf16.mxu1 %v5432_v5 }
 0x288   :  { %2459 = vmatpush1.bf16.msra.mxu0 %v5127_v20 }
 0x289   :  { %4414 = vmatprep.subr.msk.bf16.mxu0 %vm144_vm0, %v5133_v23 }
 0x28a   :  { %4762 = vmatpush3.bf16.msra.mxu1 %v5120_v25 }
 0x28b   :  { %4388 = vmatprep.subr.msk.bf16.mxu1 %vm144_vm0, %v5124_v27  ;;  %4407 = vmatmul.mubr.msk.bf16.vlgmr.msra.gmra.mxu0 %vm140_vm1, %v2050_v29 }
 0x28c   :  { %2582 = vmatpush1.bf16.msra.mxu0 %v2564_v30  ;;  %2601 = vmatprep.mubr.bf16.mxu0 %v5431_v0 }
 0x28d   :  { %4764 = vmatmul.mubr.bf16.vlgmr.msra.gmra.mxu1 %v1928_v32  ;;  %2583 = vmatprep.subr.bf16.mxu0 %v5138_v31 }
 0x28e   :  { %2172 = vmatpush1.bf16.msra.mxu1 %v2154_v33  ;;  %2191 = vmatprep.mubr.bf16.mxu1 %v5431_v0 }
 0x28f   :  { %2173 = vmatprep.subr.bf16.mxu1 %v5132_v34 }
 0x290   :  { %2584 = vmatpush1.bf16.msra.mxu0 %v5136_v35 }
 0x291   :  { %2805 = vmatprep.subr.bf16.mxu0 %v5141_v46 }
 0x292   :  { %2174 = vmatpush1.bf16.msra.mxu1 %v5130_v38 }
 0x293   :  { %4392 = vmatprep.subr.msk.bf16.mxu1 %vm144_vm0, %v5124_v27  ;;  %4415 = vmatmul.mubr.msk.bf16.vlgmr.msra.gmra.mxu0 %vm140_vm1, %v2044_v41 }
 0x294   :  { %2837 = vmatprep.mubr.bf16.mxu0 %v5431_v0  ;;  %2806 = vmatpush1.bf16.msra.mxu0 %v5139_v48 }
 0x295   :  { %4389 = vmatmul.mubr.msk.bf16.vlgmr.msra.gmra.mxu1 %vm140_vm1, %v2038_v42  ;;  %2807 = vmatprep.subr.bf16.mxu0 %v5147_v50 }
 0x296   :  { %2261 = vmatpush1.bf16.msra.mxu1 %v2154_v33  ;;  %2280 = vmatprep.mubr.bf16.mxu1 %v5431_v0 }
 0x297   :  { %2262 = vmatprep.subr.bf16.mxu1 %v5132_v34 }
 0x298   :  { %2808 = vmatpush1.bf16.msra.mxu0 %v5145_v52 }
 0x299   :  { %2809 = vmatprep.subr.bf16.mxu0 %v5153_v54 }
 0x29a   :  { %2263 = vmatpush1.bf16.msra.mxu1 %v5130_v38 }
 0x29b   :  { %4400 = vmatprep.subr.msk.bf16.mxu1 %vm144_vm0, %v5667_v3  ;;  %v5171_v3 = vld [vmem:[#allocation7 + $0xa4] ss:$8 sps:$4 sm:$0xff]  }
 0x29c   :  { %2810 = vmatpush1.bf16.msra.mxu0 %v5151_v56 }
 0x29d   :  { %4393 = vmatmul.mubr.msk.bf16.vlgmr.msra.gmra.mxu1 %vm140_vm1, %v5654_v62  ;;  %2811 = vmatprep.subr.bf16.mxu0 %v5159_v58  ;;  %v5165_v62 = vld [vmem:[#allocation7 + $0xb4] ss:$8 sps:$4 sm:$0xff]  }
 0x29e   :  { %2382 = vmatpush1.bf16.msra.mxu1 %v5673_v8  ;;  %2401 = vmatprep.mubr.bf16.mxu1 %v5431_v0  ;;  %v5177_v8 = vld [vmem:[#allocation7 + $0x94] ss:$8 sps:$4 sm:$0xff]  }
 0x29f   :  { %2383 = vmatprep.subr.bf16.mxu1 %v5675_v9  ;;  %v5180_v9 = vld [vmem:[#allocation7 + $0x14] ss:$8 sps:$4 sm:$0xff]  }
 0x2a0   :  { %2812 = vmatpush1.bf16.msra.mxu0 %v5157_v60 }
 0x2a1   :  { %2813 = vmatprep.subr.bf16.mxu0 %v5165_v62 }
 0x2a2   :  { %2384 = vmatpush1.bf16.msra.mxu1 %v5680_v11  ;;  %v5178_v11 = vld [vmem:[#allocation7 + $0x10] ss:$8 sps:$4 sm:$0xff]  }
 0x2a3   :  { %4408 = vmatprep.subr.msk.bf16.mxu1 %vm144_vm0, %v5684_v12  ;;  %v5183_v12 = vld [vmem:[#allocation7 + $0x84] ss:$8 sps:$4 sm:$0xff]  }
 0x2a4   :  { %2814 = vmatpush1.bf16.msra.mxu0 %v5163_v1 }
 0x2a5   :  { %4401 = vmatmul.mubr.msk.bf16.vlgmr.msra.gmra.mxu1 %vm140_vm1, %v2050_v29  ;;  %2815 = vmatprep.subr.bf16.mxu0 %v5171_v3 }
 0x2a6   :  { %2507 = vmatpush1.bf16.msra.mxu1 %v5692_v16  ;;  %2526 = vmatprep.mubr.bf16.mxu1 %v5431_v0  ;;  %v5189_v16 = vld [vmem:[#allocation7 + $0x174] ss:$8 sps:$4 sm:$0xff]  }
 0x2a7   :  { %2508 = vmatprep.subr.bf16.mxu1 %v5694_v17  ;;  %v5192_v17 = vld [vmem:[#allocation7 + $0x1f4] ss:$8 sps:$4 sm:$0xff]  }
 0x2a8   :  { %2816 = vmatpush1.bf16.msra.mxu0 %v5169_v6 }
 0x2a9   :  { %2817 = vmatprep.subr.bf16.mxu0 %v5177_v8 }
 0x2aa   :  { %2509 = vmatpush1.bf16.msra.mxu1 %v5127_v20 }
 0x2ab   :  { %4416 = vmatprep.subr.msk.bf16.mxu1 %vm144_vm0, %v5133_v23 }
 0x2ac   :  { %2818 = vmatpush1.bf16.msra.mxu0 %v5175_v10 }
 0x2ad   :  { %4409 = vmatmul.mubr.msk.bf16.vlgmr.msra.gmra.mxu1 %vm140_vm1, %v2044_v41  ;;  %2819 = vmatprep.subr.bf16.mxu0 %v5183_v12 }
 0x2ae   :  { %2632 = vmatpush1.bf16.msra.mxu1 %v2564_v30  ;;  %2651 = vmatprep.mubr.bf16.mxu1 %v5431_v0 }
 0x2af   :  { %2633 = vmatprep.subr.bf16.mxu1 %v5138_v31 }
 0x2b0   :  { %2820 = vmatpush1.bf16.msra.mxu0 %v5181_v14 }
 0x2b1   :  { %3070 = vmatprep.subr.bf16.mxu0 %v5189_v16 }
 0x2b2   :  { %2634 = vmatpush1.bf16.msra.mxu1 %v5136_v35 }
 0x2b3   :  { %2928 = vmatprep.subr.bf16.mxu1 %v5144_v47 }
 0x2b5   :  { %4417 = vmatmul.mubr.msk.bf16.vlgmr.msra.gmra.mxu1 %vm140_vm1, %v2053_v45 }
 0x2b6   :  { %2960 = vmatprep.mubr.bf16.mxu1 %v5431_v0  ;;  %2929 = vmatpush1.bf16.msra.mxu1 %v5142_v49 }
 0x2b7   :  { %2930 = vmatprep.subr.bf16.mxu1 %v5150_v51 }
 0x2ba   :  { %2931 = vmatpush1.bf16.msra.mxu1 %v5148_v53 }
 0x2bb   :  { %2932 = vmatprep.subr.bf16.mxu1 %v5156_v55 }
 0x2be   :  { %2933 = vmatpush1.bf16.msra.mxu1 %v5154_v57 }
 0x2bf   :  { %2934 = vmatprep.subr.bf16.mxu1 %v5162_v59 }
 0x2c2   :  { %2935 = vmatpush1.bf16.msra.mxu1 %v5160_v61 }
 0x2c3   :  { %2936 = vmatprep.subr.bf16.mxu1 %v5168_v63 }
 0x2c6   :  { %2937 = vmatpush1.bf16.msra.mxu1 %v5166_v2 }
 0x2c7   :  { %2938 = vmatprep.subr.bf16.mxu1 %v5174_v4 }
 0x2ca   :  { %2939 = vmatpush1.bf16.msra.mxu1 %v5172_v7 }
 0x2cb   :  { %2940 = vmatprep.subr.bf16.mxu1 %v5180_v9 }
 0x2ce   :  { %2941 = vmatpush1.bf16.msra.mxu1 %v5178_v11 }
 0x2cf   :  { %2942 = vmatprep.subr.bf16.mxu1 %v5186_v13 }
 0x2d2   :  { %2943 = vmatpush1.bf16.msra.mxu1 %v5184_v15 }
 0x2d3   :  { %3216 = vmatprep.subr.bf16.mxu1 %v5192_v17 }
 0x30b   :  { %v1702_v18 = vpop.f32.mrf.mxu0 }
 0x30d   :  { %v1614_v19 = vpop.f32.mrf.mxu1  ;;  %v4705_v20 = vpop.f32.mrf.mxu0 }
 0x30e   :  { %v1703_v41 = vadd.f32 %v1702_v18, %v1614_v19 }
 0x30f   :  { %v4685_v21 = vpop.f32.mrf.mxu1  ;;  %v1705_v22 = vpop.f32.mrf.mxu0 }
 0x311   :  { %v1617_v23 = vpop.f32.mrf.mxu1  ;;  %v4706_v24 = vpop.f32.mrf.mxu0 }
 0x313   :  { %v4686_v25 = vpop.f32.mrf.mxu1 }
 0x32b   :  { %v1917_v26 = vpop.f32.mrf.mxu0 }
 0x32d   :  { %v1809_v27 = vpop.f32.mrf.mxu1  ;;  %v4745_v28 = vpop.f32.mrf.mxu0 }
 0x32e   :  { %v1815_v42 = vadd.f32 %v1809_v27, %v1703_v41 }
 0x32f   :  { %v4725_v29 = vpop.f32.mrf.mxu1  ;;  %v1920_v30 = vpop.f32.mrf.mxu0 }
 0x330   :  { %v1923_v44 = vadd.f32 %v1917_v26, %v1815_v42 }
 0x331   :  { %v1812_v31 = vpop.f32.mrf.mxu1  ;;  %v4746_v32 = vpop.f32.mrf.mxu0 }
 0x333   :  { %v4726_v33 = vpop.f32.mrf.mxu1  ;;  %v2123_v34 = vpop.f32.mrf.mxu0 }
 0x335   :  { %v2125_v35 = vpop.f32.mrf.mxu0 }
 0x337   :  { %v2127_v36 = vpop.f32.mrf.mxu0 }
 0x339   :  { %v2129_v37 = vpop.f32.mrf.mxu0 }
 0x33b   :  { %v2239_v38 = vpop.f32.mrf.mxu0 }
 0x33d   :  { %v2241_v39 = vpop.f32.mrf.mxu0 }
 0x33f   :  { %v2243_v40 = vpop.f32.mrf.mxu0 }
 0x341   :  { %v2245_v43 = vpop.f32.mrf.mxu0 }
 0x343   :  { %v2353_v45 = vpop.f32.mrf.mxu0 }
 0x345   :  { %v2355_v49 = vpop.f32.mrf.mxu0 }
 0x347   :  { %v2357_v52 = vpop.f32.mrf.mxu0 }
 0x349   :  { %v2359_v55 = vpop.f32.mrf.mxu0 }
 0x34b   :  { %v2478_v58 = vpop.f32.mrf.mxu0 }
 0x34d   :  { %v2028_v46 = vpop.f32.mrf.mxu1  ;;  %v2480_v61 = vpop.f32.mrf.mxu0 }
 0x34e   :  { %v2034_v47 = vadd.f32 %v2028_v46, %v1923_v44 }
 0x34f   :  { %v4765_v48 = vpop.f32.mrf.mxu1  ;;  %v2482_v1 = vpop.f32.mrf.mxu0 }
 0x350   :  { %2035 = vst [vmem:[#allocation3] sm:$0x1] %v2034_v47 }
 0x351   :  { %v2031_v50 = vpop.f32.mrf.mxu1  ;;  %v2484_v4 = vpop.f32.mrf.mxu0 }
 0x353   :  { %v4766_v51 = vpop.f32.mrf.mxu1  ;;  %v2603_v10 = vpop.f32.mrf.mxu0 }
 0x355   :  { %v2193_v53 = vpop.f32.mrf.mxu1  ;;  %v2605_v18 = vpop.f32.mrf.mxu0 }
 0x356   :  { %v2194_v7 = vadd.f32 %v2193_v53, %v2123_v34 }
 0x357   :  { %v2195_v54 = vpop.f32.mrf.mxu1  ;;  %v2607_v30 = vpop.f32.mrf.mxu0 }
 0x358   :  { %v2196_v8 = vadd.f32 %v2195_v54, %v2125_v35  ;;  %v2362_v12 = vadd.f32 %v2353_v45, %v2194_v7 }
 0x359   :  { %v2197_v56 = vpop.f32.mrf.mxu1  ;;  %v2609_v46 = vpop.f32.mrf.mxu0 }
 0x35a   :  { %v2363_v13 = vadd.f32 %v2355_v49, %v2196_v8  ;;  %v2198_v14 = vadd.f32 %v2197_v56, %v2127_v36  ;;  %v2487_v23 = vadd.f32 %v2478_v58, %v2362_v12  ;;  %v5195_v8 = vld [vmem:[#allocation7 + $0x164] ss:$8 sps:$4 sm:$0xff]   ;;  %v5201_v12 = vld [vmem:[#allocation7 + $0x154] ss:$8 sps:$4 sm:$0xff]  }
 0x35b   :  { %v2199_v57 = vpop.f32.mrf.mxu1 }
 0x35c   :  { %v2200_v16 = vadd.f32 %v2199_v57, %v2129_v37  ;;  %v2364_v22 = vadd.f32 %v2357_v52, %v2198_v14  ;;  %v2488_v24 = vadd.f32 %v2480_v61, %v2363_v13  ;;  %v2612_v36 = vadd.f32 %v2603_v10, %v2487_v23  ;;  %v5193_v10 = vld [vmem:[#allocation7 + $0x160] ss:$8 sps:$4 sm:$0xff]   ;;  %v5204_v13 = vld [vmem:[#allocation7 + $0x1d4] ss:$8 sps:$4 sm:$0xff]   ;;  %v5199_v14 = vld [vmem:[#allocation7 + $0x150] ss:$8 sps:$4 sm:$0xff]  }
 0x35d   :  { %v2282_v59 = vpop.f32.mrf.mxu1  ;;  %v5214_v23 = vld [vmem:[#allocation7 + $0x1b0] ss:$8 sps:$4 sm:$0xff]  }
 0x35e   :  { %v2283_v17 = vadd.f32 %v2282_v59, %v2239_v38  ;;  %v2365_v26 = vadd.f32 %v2359_v55, %v2200_v16  ;;  %v2613_v37 = vadd.f32 %v2605_v18, %v2488_v24  ;;  %v2489_v38 = vadd.f32 %v2482_v1, %v2364_v22  ;;  %v5190_v1 = vld [vmem:[#allocation7 + $0x1f0] ss:$8 sps:$4 sm:$0xff]   ;;  %v5207_v16 = vld [vmem:[#allocation7 + $0x144] ss:$8 sps:$4 sm:$0xff]   ;;  %v5205_v18 = vld [vmem:[#allocation7 + $0x140] ss:$8 sps:$4 sm:$0xff]  }
 0x35f   :  { %v2284_v60 = vpop.f32.mrf.mxu1  ;;  %v5211_v22 = vld [vmem:[#allocation7 + $0x130] ss:$8 sps:$4 sm:$0xff]   ;;  %v5219_v24 = vld [vmem:[#allocation7 + $0x124] ss:$8 sps:$4 sm:$0xff]  }
 0x360   :  { %v2285_v20 = vadd.f32 %v2284_v60, %v2241_v39  ;;  %v2490_v39 = vadd.f32 %v2484_v4, %v2365_v26  ;;  %v2614_v52 = vadd.f32 %v2607_v30, %v2489_v38  ;;  %v5217_v26 = vld [vmem:[#allocation7 + $0x120] ss:$8 sps:$4 sm:$0xff]   ;;  %v5223_v30 = vld [vmem:[#allocation7 + $0x110] ss:$8 sps:$4 sm:$0xff]  }
 0x361   :  { %v2286_v62 = vpop.f32.mrf.mxu1 }
 0x362   :  { %v2287_v27 = vadd.f32 %v2286_v62, %v2243_v40  ;;  %v2615_v53 = vadd.f32 %v2609_v46, %v2490_v39  ;;  %v5240_v46 = vld [vmem:[#allocation7 + $0x264] ss:$8 sps:$4 sm:$0xff]  }
 0x363   :  { %v2288_v63 = vpop.f32.mrf.mxu1 }
 0x364   :  { %v2289_v32 = vadd.f32 %v2288_v63, %v2245_v43  ;;  %v4418_v43 = vld [vmem:[%s5877_s2] ss:$0 sm:$0xff]  ;;  %v5187_v63 = vld [vmem:[#allocation7 + $0x170] ss:$8 sps:$4 sm:$0xff]  }
 0x365   :  { %v2403_v2 = vpop.f32.mrf.mxu1 }
 0x366   :  { %v2412_v21 = vadd.f32 %v2403_v2, %v2283_v17  ;;  %v5210_v17 = vld [vmem:[#allocation7 + $0x1c4] ss:$8 sps:$4 sm:$0xff]  }
 0x367   :  { %v2405_v3 = vpop.f32.mrf.mxu1 }
 0x368   :  { %v2413_v28 = vadd.f32 %v2405_v3, %v2285_v20  ;;  %v5213_v20 = vld [vmem:[#allocation7 + $0x134] ss:$8 sps:$4 sm:$0xff]  }
 0x369   :  { %v2407_v6 = vpop.f32.mrf.mxu1 }
 0x36a   :  { %v2414_v33 = vadd.f32 %v2407_v6, %v2287_v27  ;;  %v5220_v27 = vld [vmem:[#allocation7 + $0x1a0] ss:$8 sps:$4 sm:$0xff]  }
 0x36b   :  { %v2409_v9 = vpop.f32.mrf.mxu1 }
 0x36c   :  { %v2415_v42 = vadd.f32 %v2409_v9, %v2289_v32  ;;  %v5198_v9 = vld [vmem:[#allocation7 + $0x1e4] ss:$8 sps:$4 sm:$0xff]  }
 0x36d   :  { %v2528_v11 = vpop.f32.mrf.mxu1  ;;  %v5231_v32 = vld [vmem:[#allocation7 + $0x104] ss:$8 sps:$4 sm:$0xff]  }
 0x36e   :  { %v2537_v29 = vadd.f32 %v2528_v11, %v2412_v21  ;;  %v5196_v11 = vld [vmem:[#allocation7 + $0x1e0] ss:$8 sps:$4 sm:$0xff]   ;;  %v5216_v21 = vld [vmem:[#allocation7 + $0x1b4] ss:$8 sps:$4 sm:$0xff]  }
 0x36f   :  { %v2530_v15 = vpop.f32.mrf.mxu1 }
 0x370   :  { %v2538_v34 = vadd.f32 %v2530_v15, %v2413_v28  ;;  %v5202_v15 = vld [vmem:[#allocation7 + $0x1d0] ss:$8 sps:$4 sm:$0xff]   ;;  %v5225_v28 = vld [vmem:[#allocation7 + $0x114] ss:$8 sps:$4 sm:$0xff]  }
 0x371   :  { %v2532_v19 = vpop.f32.mrf.mxu1 }
 0x372   :  { %v2539_v44 = vadd.f32 %v2532_v19, %v2414_v33  ;;  %v5208_v19 = vld [vmem:[#allocation7 + $0x1c0] ss:$8 sps:$4 sm:$0xff]   ;;  %v5234_v33 = vld [vmem:[#allocation7 + $0x184] ss:$8 sps:$4 sm:$0xff]  }
 0x373   :  { %v2534_v25 = vpop.f32.mrf.mxu1 }
 0x374   :  { %v2540_v48 = vadd.f32 %v2534_v25, %v2415_v42  ;;  %v5222_v25 = vld [vmem:[#allocation7 + $0x1a4] ss:$8 sps:$4 sm:$0xff]   ;;  %v5235_v42 = vld [vmem:[#allocation7 + $0x270] ss:$8 sps:$4 sm:$0xff]  }
 0x375   :  { %v2653_v31 = vpop.f32.mrf.mxu1 }
 0x376   :  { %v2662_v35 = vadd.f32 %v2653_v31, %v2537_v29  ;;  %v5228_v29 = vld [vmem:[#allocation7 + $0x194] ss:$8 sps:$4 sm:$0xff]   ;;  %v5226_v31 = vld [vmem:[#allocation7 + $0x190] ss:$8 sps:$4 sm:$0xff]  }
 0x377   :  { %v2655_v41 = vpop.f32.mrf.mxu1 }
 0x378   :  { %v2663_v45 = vadd.f32 %v2655_v41, %v2538_v34  ;;  %v2666_v40 = vmax.f32 %v2612_v36, %v2662_v35  ;;  %v5229_v34 = vld [vmem:[#allocation7 + $0x100] ss:$8 sps:$4 sm:$0xff]  }
 0x379   :  { %v2657_v47 = vpop.f32.mrf.mxu1  ;;  %v5232_v35 = vld [vmem:[#allocation7 + $0x180] ss:$8 sps:$4 sm:$0xff]  }
 0x37a   :  { %v2667_v49 = vmax.f32 %v2613_v37, %v2663_v45  ;;  %v2664_v50 = vadd.f32 %v2657_v47, %v2539_v44  ;;  %v5237_v37 = vld [vmem:[#allocation7 + $0x274] ss:$8 sps:$4 sm:$0xff]   ;;  %v5238_v47 = vld [vmem:[#allocation7 + $0x260] ss:$8 sps:$4 sm:$0xff]  }
 0x37b   :  { %v2659_v51 = vpop.f32.mrf.mxu1 }
 0x37c   :  { %v2670_v54 = vmax.f32 %v2666_v40, %v2667_v49  ;;  %v2665_v55 = vadd.f32 %v2659_v51, %v2540_v48  ;;  %v2668_v57 = vmax.f32 %v2614_v52, %v2664_v50  ;;  %v5243_v48 = vld [vmem:[#allocation7 + $0x254] ss:$8 sps:$4 sm:$0xff]   ;;  %v5241_v40 = vld [vmem:[#allocation7 + $0x250] ss:$8 sps:$4 sm:$0xff]   ;;  %v5246_v49 = vld [vmem:[#allocation7 + $0x244] ss:$8 sps:$4 sm:$0xff]  }
 0x37d   :  { %v5244_v50 = vld [vmem:[#allocation7 + $0x240] ss:$8 sps:$4 sm:$0xff]   ;;  %v5247_v51 = vld [vmem:[#allocation7 + $0x230] ss:$8 sps:$4 sm:$0xff]   ;;  %v5252_v52 = vld [vmem:[#allocation7 + $0x224] ss:$8 sps:$4 sm:$0xff]  }
 0x37e   :  { %v2679_v56 = vadd.f32 %v4418_v43, %v2670_v54  ;;  %v2669_v58 = vmax.f32 %v2615_v53, %v2665_v55  ;;  %v5250_v53 = vld [vmem:[#allocation7 + $0x220] ss:$8 sps:$4 sm:$0xff]   ;;  %v5253_v54 = vld [vmem:[#allocation7 + $0x210] ss:$8 sps:$4 sm:$0xff]   ;;  %v5258_v55 = vld [vmem:[#allocation7 + $0x204] ss:$8 sps:$4 sm:$0xff]  }
 0x380   :  { %v2681_v59 = vmax.f32 %v2679_v56, 0.0  ;;  %v2671_v60 = vmax.f32 %v2668_v57, %v2669_v58  ;;  %v5256_v56 = vld [vmem:[#allocation7 + $0x200] ss:$8 sps:$4 sm:$0xff]  }
 0x382   :  { %2684 = vst [vmem:[#allocation2 + $0x10] sm:$0xff] %v2681_v59  ;;  %v2680_v61 = vadd.f32 %v4418_v43, %v2671_v60  ;;  %v5249_v43 = vld [vmem:[#allocation7 + $0x234] ss:$8 sps:$4 sm:$0xff]  }
 0x383   :  { %v5259_v60 = vld [vmem:[#allocation9 + $0x38] sm:$0xff]  }
 0x384   :  { %v2682_v62 = vmax.f32 %v2680_v61, 0.0  ;;  %v5260_v61 = vld [vmem:[#allocation9 + $0x78] sm:$0xff]  }
 0x386   :  { %2685 = vst [vmem:[#allocation2 + $0x18] sm:$0x1f] %v2682_v62  ;;  %v5261_v62 = vld [vmem:[#allocation9 + $0x30] sm:$0xff]  }
 0x389   :  { %v2687_v3 = vld [vmem:[#allocation2 + $0xf] sm:$0xff] }
 0x38d   :  { %v2707_v2 = vld [vmem:[#allocation2 + $0x18] sm:$0x7]  ;;  %v3264_v58 = vld [vmem:[#allocation2 + $0x1b] sm:$0x7] }
 0x38e   :  { %v2688_v4 = vld [vmem:[#allocation2 + $0x17] sm:$0x7]  ;;  %v2708_v6 = vpack.c.bf16 %v2707_v2, %v2681_v59  ;;  %v3118_v39 = vld [vmem:[#allocation2 + $0x1a] sm:$0x7]  ;;  %v5264_v2 = vld [vmem:[#allocation9 + $0x68] sm:$0xff]  }
 0x38f   :  { %v2689_v7 = vpack.c.bf16 %v2688_v4, %v2687_v3  ;;  %v2971_v36 = vld [vmem:[#allocation2 + $0x11] sm:$0xff]  ;;  %v2972_v38 = vld [vmem:[#allocation2 + $0x19] sm:$0x7]  ;;  %v5265_v3 = vld [vmem:[#allocation9 + $0x20] sm:$0xff]  }
 0x390   :  { %2838 = vmatmul.mubr.bf16.vlgmr.msra.gmra.mxu0 %v2708_v6  ;;  %v3117_v41 = vld [vmem:[#allocation2 + $0x12] sm:$0xff]  ;;  %v2973_v44 = vpack.c.bf16 %v2972_v38, %v2971_v36  ;;  %v5266_v4 = vld [vmem:[#allocation9 + $0x60] sm:$0xff]   ;;  %v5267_v6 = vld [vmem:[#allocation9 + $0x18] sm:$0xff]  }
 0x391   :  { %2961 = vmatmul.mubr.bf16.vlgmr.msra.gmra.mxu1 %v2689_v7  ;;  %3071 = vmatpush1.bf16.msra.mxu0 %v5187_v63  ;;  %v3119_v45 = vpack.c.bf16 %v3118_v39, %v3117_v41  ;;  %v3263_v57 = vld [vmem:[#allocation2 + $0x13] sm:$0xff] }
 0x392   :  { %3217 = vmatpush1.bf16.msra.mxu1 %v5190_v1  ;;  %3072 = vmatprep.subr.bf16.mxu0 %v5195_v8  ;;  %v3265_v59 = vpack.c.bf16 %v3264_v58, %v3263_v57  ;;  %v5262_v63 = vld [vmem:[#allocation9 + $0x70] sm:$0xff]   ;;  %v5263_v1 = vld [vmem:[#allocation9 + $0x28] sm:$0xff]   ;;  %v5268_v7 = vld [vmem:[#allocation9 + $0x58] sm:$0xff]  }
 0x393   :  { %3218 = vmatprep.subr.bf16.mxu1 %v5198_v9  ;;  %3102 = vmatprep.mubr.bf16.mxu0 %v5431_v0  ;;  %v5269_v8 = vld [vmem:[#allocation9 + $0x10] sm:$0xff]   ;;  %v5275_v57 = vld [vmem:[#allocation9 + $0xf8] sm:$0xff]  }
 0x394   :  { %3248 = vmatprep.mubr.bf16.mxu1 %v5431_v0  ;;  %v5270_v9 = vld [vmem:[#allocation9 + $0x50] sm:$0xff]  }
 0x395   :  { %3073 = vmatpush1.bf16.msra.mxu0 %v5193_v10  ;;  %v5271_v10 = vld [vmem:[#allocation9 + $0x8] sm:$0xff]  }
 0x396   :  { %3219 = vmatpush1.bf16.msra.mxu1 %v5196_v11  ;;  %3074 = vmatprep.subr.bf16.mxu0 %v5201_v12  ;;  %v5272_v11 = vld [vmem:[#allocation9 + $0x48] sm:$0xff]   ;;  %v5273_v12 = vld [vmem:[#allocation9] sm:$0xff]  }
 0x397   :  { %3220 = vmatprep.subr.bf16.mxu1 %v5204_v13  ;;  %v5274_v13 = vld [vmem:[#allocation9 + $0x40] sm:$0xff]  }
 0x399   :  { %3075 = vmatpush1.bf16.msra.mxu0 %v5199_v14 }
 0x39a   :  { %3221 = vmatpush1.bf16.msra.mxu1 %v5202_v15  ;;  %3076 = vmatprep.subr.bf16.mxu0 %v5207_v16 }
 0x39b   :  { %3222 = vmatprep.subr.bf16.mxu1 %v5210_v17 }
 0x39d   :  { %3077 = vmatpush1.bf16.msra.mxu0 %v5205_v18 }
 0x39e   :  { %3223 = vmatpush1.bf16.msra.mxu1 %v5208_v19  ;;  %3078 = vmatprep.subr.bf16.mxu0 %v5213_v20 }
 0x39f   :  { %3224 = vmatprep.subr.bf16.mxu1 %v5216_v21 }
 0x3a1   :  { %3079 = vmatpush1.bf16.msra.mxu0 %v5211_v22 }
 0x3a2   :  { %3225 = vmatpush1.bf16.msra.mxu1 %v5214_v23  ;;  %3080 = vmatprep.subr.bf16.mxu0 %v5219_v24 }
 0x3a3   :  { %3226 = vmatprep.subr.bf16.mxu1 %v5222_v25 }
 0x3a5   :  { %3081 = vmatpush1.bf16.msra.mxu0 %v5217_v26 }
 0x3a6   :  { %3227 = vmatpush1.bf16.msra.mxu1 %v5220_v27  ;;  %3082 = vmatprep.subr.bf16.mxu0 %v5225_v28 }
 0x3a7   :  { %3228 = vmatprep.subr.bf16.mxu1 %v5228_v29 }
 0x3a9   :  { %3083 = vmatpush1.bf16.msra.mxu0 %v5223_v30 }
 0x3aa   :  { %3229 = vmatpush1.bf16.msra.mxu1 %v5226_v31  ;;  %3084 = vmatprep.subr.bf16.mxu0 %v5231_v32 }
 0x3ab   :  { %3230 = vmatprep.subr.bf16.mxu1 %v5234_v33 }
 0x3ad   :  { %3085 = vmatpush1.bf16.msra.mxu0 %v5229_v34 }
 0x3ae   :  { %3231 = vmatpush1.bf16.msra.mxu1 %v5232_v35  ;;  %3362 = vmatprep.subr.bf16.mxu0 %v5237_v37 }
 0x3af   :  { %4767 = vmatprep.subr.bf16.mxu1 %v5432_v5 }
 0x3b0   :  { %3103 = vmatmul.mubr.bf16.vlgmr.msra.gmra.mxu0 %v2973_v44 }
 0x3b1   :  { %3249 = vmatmul.mubr.bf16.vlgmr.msra.gmra.mxu1 %v3119_v45  ;;  %3363 = vmatpush1.bf16.msra.mxu0 %v5235_v42 }
 0x3b2   :  { %3394 = vmatprep.mubr.bf16.mxu0 %v5431_v0  ;;  %3364 = vmatprep.subr.bf16.mxu0 %v5240_v46  ;;  %v5255_v0 = vld [vmem:[#allocation7 + $0x214] ss:$8 sps:$4 sm:$0xff]  }
 0x3b3   :  { %4783 = vmatprep.mubr.msk.bf16.mxu1 %vm5433_vm2, %v5432_v5  ;;  %4768 = vmatpush3.bf16.msra.mxu1 %v5260_v61  ;;  %v4499_v46 = vld [vmem:[%s5879_s4] ss:$0 sm:$0xff]  ;;  %v5277_v61 = vld [vmem:[#allocation9 + $0xf0] sm:$0xff]  }
 0x3b4   :  { %4769 = vmatprep.subr.bf16.mxu1 %v5432_v5 }
 0x3b5   :  { %3365 = vmatpush1.bf16.msra.mxu0 %v5238_v47 }
 0x3b6   :  { %3366 = vmatprep.subr.bf16.mxu0 %v5243_v48 }
 0x3b7   :  { %4770 = vmatpush3.bf16.msra.mxu1 %v5262_v63  ;;  %v5279_v63 = vld [vmem:[#allocation9 + $0xe8] sm:$0xff]  }
 0x3b8   :  { %4771 = vmatprep.subr.bf16.mxu1 %v5432_v5 }
 0x3b9   :  { %3367 = vmatpush1.bf16.msra.mxu0 %v5241_v40 }
 0x3ba   :  { %3368 = vmatprep.subr.bf16.mxu0 %v5246_v49 }
 0x3bb   :  { %4772 = vmatpush3.bf16.msra.mxu1 %v5264_v2  ;;  %v5281_v2 = vld [vmem:[#allocation9 + $0xe0] sm:$0xff]  }
 0x3bc   :  { %4773 = vmatprep.subr.bf16.mxu1 %v5432_v5 }
 0x3bd   :  { %3369 = vmatpush1.bf16.msra.mxu0 %v5244_v50 }
 0x3be   :  { %3370 = vmatprep.subr.bf16.mxu0 %v5249_v43 }
 0x3bf   :  { %4774 = vmatpush3.bf16.msra.mxu1 %v5266_v4  ;;  %v5283_v4 = vld [vmem:[#allocation9 + $0xd8] sm:$0xff]  }
 0x3c0   :  { %4775 = vmatprep.subr.bf16.mxu1 %v5432_v5 }
 0x3c1   :  { %3371 = vmatpush1.bf16.msra.mxu0 %v5247_v51 }
 0x3c2   :  { %3372 = vmatprep.subr.bf16.mxu0 %v5252_v52 }
 0x3c3   :  { %4776 = vmatpush3.bf16.msra.mxu1 %v5268_v7  ;;  %v5285_v7 = vld [vmem:[#allocation9 + $0xd0] sm:$0xff]  }
 0x3c4   :  { %4777 = vmatprep.subr.bf16.mxu1 %v5432_v5 }
 0x3c5   :  { %3373 = vmatpush1.bf16.msra.mxu0 %v5250_v53 }
 0x3c6   :  { %3374 = vmatprep.subr.bf16.mxu0 %v5255_v0 }
 0x3c7   :  { %4778 = vmatpush3.bf16.msra.mxu1 %v5270_v9  ;;  %v5287_v9 = vld [vmem:[#allocation9 + $0xc8] sm:$0xff]  }
 0x3c8   :  { %4779 = vmatprep.subr.bf16.mxu1 %v5432_v5 }
 0x3c9   :  { %3375 = vmatpush1.bf16.msra.mxu0 %v5253_v54 }
 0x3ca   :  { %3376 = vmatprep.subr.bf16.mxu0 %v5258_v55 }
 0x3cb   :  { %4780 = vmatpush3.bf16.msra.mxu1 %v5272_v11  ;;  %v5289_v11 = vld [vmem:[#allocation9 + $0xc0] sm:$0xff]  }
 0x3cc   :  { %4781 = vmatprep.subr.bf16.mxu1 %v5432_v5 }
 0x3cd   :  { %3377 = vmatpush1.bf16.msra.mxu0 %v5256_v56 }
 0x3ce   :  { %4787 = vmatprep.subr.bf16.mxu0 %v5432_v5 }
 0x3cf   :  { %4782 = vmatpush3.bf16.msra.mxu1 %v5274_v13 }
 0x3d0   :  { %3395 = vmatmul.mubr.bf16.vlgmr.msra.gmra.mxu0 %v3265_v59  ;;  %4807 = vmatprep.subr.bf16.mxu1 %v5432_v5  ;;  %v5276_v59 = vld [vmem:[#allocation9 + $0xb8] sm:$0xff]  }
 0x3d1   :  { %4803 = vmatprep.mubr.msk.bf16.mxu0 %vm5433_vm2, %v5432_v5  ;;  %4788 = vmatpush3.bf16.msra.mxu0 %v5259_v60 }
 0x3d2   :  { %4789 = vmatprep.subr.bf16.mxu0 %v5432_v5 }
 0x3d5   :  { %4790 = vmatpush3.bf16.msra.mxu0 %v5261_v62  ;;  %v5278_v62 = vld [vmem:[#allocation9 + $0xb0] sm:$0xff]  }
 0x3d6   :  { %4791 = vmatprep.subr.bf16.mxu0 %v5432_v5 }
 0x3d9   :  { %4792 = vmatpush3.bf16.msra.mxu0 %v5263_v1  ;;  %v5280_v1 = vld [vmem:[#allocation9 + $0xa8] sm:$0xff]  }
 0x3da   :  { %4793 = vmatprep.subr.bf16.mxu0 %v5432_v5 }
 0x3dd   :  { %4794 = vmatpush3.bf16.msra.mxu0 %v5265_v3  ;;  %v5282_v3 = vld [vmem:[#allocation9 + $0xa0] sm:$0xff]  }
 0x3de   :  { %4795 = vmatprep.subr.bf16.mxu0 %v5432_v5 }
 0x3e1   :  { %4796 = vmatpush3.bf16.msra.mxu0 %v5267_v6  ;;  %v5284_v6 = vld [vmem:[#allocation9 + $0x98] sm:$0xff]  }
 0x3e2   :  { %4797 = vmatprep.subr.bf16.mxu0 %v5432_v5 }
 0x3e5   :  { %4798 = vmatpush3.bf16.msra.mxu0 %v5269_v8  ;;  %v5286_v8 = vld [vmem:[#allocation9 + $0x90] sm:$0xff]  }
 0x3e6   :  { %4799 = vmatprep.subr.bf16.mxu0 %v5432_v5 }
 0x3e9   :  { %4800 = vmatpush3.bf16.msra.mxu0 %v5271_v10  ;;  %v5288_v10 = vld [vmem:[#allocation9 + $0x88] sm:$0xff]  }
 0x3ea   :  { %4801 = vmatprep.subr.bf16.mxu0 %v5432_v5 }
 0x3ed   :  { %4802 = vmatpush3.bf16.msra.mxu0 %v5273_v12  ;;  %v5290_v12 = vld [vmem:[#allocation9 + $0x80] sm:$0xff]  }
 0x3ee   :  { %4827 = vmatprep.subr.bf16.mxu0 %v5432_v5 }
 0x450   :  { %v2839_v14 = vpop.f32.mrf.mxu0 }
 0x451   :  { %v2962_v15 = vpop.f32.mrf.mxu1 }
 0x452   :  { %v2841_v16 = vpop.f32.mrf.mxu0  ;;  %v2963_v31 = vadd.f32 %v2962_v15, %v2839_v14  ;;  %v5291_v14 = vld [vmem:[#allocation9 + $0x138] sm:$0xff]  }
 0x453   :  { %v2964_v17 = vpop.f32.mrf.mxu1 }
 0x454   :  { %v2843_v18 = vpop.f32.mrf.mxu0  ;;  %v2965_v32 = vadd.f32 %v2964_v17, %v2841_v16  ;;  %v5292_v16 = vld [vmem:[#allocation9 + $0x130] sm:$0xff]   ;;  %v5293_v17 = vld [vmem:[#allocation9 + $0x128] sm:$0xff]  }
 0x455   :  { %v2966_v19 = vpop.f32.mrf.mxu1 }
 0x456   :  { %v2967_v20 = vadd.f32 %v2966_v19, %v2843_v18  ;;  %v2845_v21 = vpop.f32.mrf.mxu0  ;;  %v5294_v18 = vld [vmem:[#allocation9 + $0x120] sm:$0xff]   ;;  %v5295_v19 = vld [vmem:[#allocation9 + $0x118] sm:$0xff]  }
 0x457   :  { %v2968_v22 = vpop.f32.mrf.mxu1 }
 0x458   :  { %v2969_v23 = vadd.f32 %v2968_v22, %v2845_v21  ;;  %v5297_v22 = vld [vmem:[#allocation9 + $0x108] sm:$0xff]  }
 0x470   :  { %v3104_v24 = vpop.f32.mrf.mxu0 }
 0x471   :  { %v3250_v30 = vpop.f32.mrf.mxu1  ;;  %v3113_v34 = vadd.f32 %v3104_v24, %v2963_v31  ;;  %v5298_v24 = vld [vmem:[#allocation9 + $0x100] sm:$0xff]   ;;  %v5303_v31 = vld [vmem:[%s5882_s7 + $0x18] sm:$0xff]  }
 0x472   :  { %v3106_v25 = vpop.f32.mrf.mxu0 }
 0x473   :  { %v3252_v33 = vpop.f32.mrf.mxu1  ;;  %v3114_v35 = vadd.f32 %v3106_v25, %v2965_v32  ;;  %v3259_v38 = vadd.f32 %v3250_v30, %v3113_v34  ;;  %v5302_v30 = vld [vmem:[%s5882_s7 + $0x20] sm:$0xff]   ;;  %v5304_v32 = vld [vmem:[%s5882_s7 + $0x10] sm:$0xff]  }
 0x474   :  { %v3108_v26 = vpop.f32.mrf.mxu0  ;;  %v5306_v34 = vld [vmem:[%s5882_s7] sm:$0xff]  }
 0x475   :  { %v3115_v27 = vadd.f32 %v3108_v26, %v2967_v20  ;;  %v3254_v36 = vpop.f32.mrf.mxu1  ;;  %v3260_v41 = vadd.f32 %v3252_v33, %v3114_v35  ;;  %v5296_v20 = vld [vmem:[#allocation9 + $0x110] sm:$0xff]   ;;  %v5305_v33 = vld [vmem:[%s5882_s7 + $0x8] sm:$0xff]   ;;  %v5307_v35 = vld [vmem:[#allocation10 + $0x38] sm:$0xff]  }
 0x476   :  { %v3110_v28 = vpop.f32.mrf.mxu0 }
 0x477   :  { %v3116_v29 = vadd.f32 %v3110_v28, %v2969_v23  ;;  %v3256_v45 = vpop.f32.mrf.mxu1  ;;  %v3261_v48 = vadd.f32 %v3254_v36, %v3115_v27  ;;  %v5299_v27 = vld [vmem:[%s5882_s7 + $0x38] sm:$0xff]   ;;  %v5300_v28 = vld [vmem:[%s5882_s7 + $0x30] sm:$0xff]  }
 0x478   :  { %v5308_v36 = vld [vmem:[#allocation10 + $0x30] sm:$0xff]  }
 0x479   :  { %v3262_v40 = vadd.f32 %v3256_v45, %v3116_v29  ;;  %v5301_v29 = vld [vmem:[%s5882_s7 + $0x28] sm:$0xff]  }
 0x490   :  { %v3396_v37 = vpop.f32.mrf.mxu0 }
 0x491   :  { %v3405_v42 = vadd.f32 %v3396_v37, %v3259_v38  ;;  %v5309_v37 = vld [vmem:[#allocation10 + $0x28] sm:$0xff]   ;;  %v5310_v38 = vld [vmem:[#allocation10 + $0x20] sm:$0xff]  }
 0x492   :  { %v3398_v39 = vpop.f32.mrf.mxu0 }
 0x493   :  { %v3406_v44 = vadd.f32 %v3398_v39, %v3260_v41  ;;  %v5311_v41 = vld [vmem:[#allocation10 + $0x18] sm:$0xff]   ;;  %v5312_v39 = vld [vmem:[#allocation10 + $0x10] sm:$0xff]  }
 0x494   :  { %v3400_v47 = vpop.f32.mrf.mxu0 }
 0x495   :  { %v3409_v49 = vmax.f32 %v3405_v42, %v3406_v44  ;;  %v3407_v51 = vadd.f32 %v3400_v47, %v3261_v48 }
 0x496   :  { %v3402_v50 = vpop.f32.mrf.mxu0 }
 0x497   :  { %v3418_v43 = vadd.f32 %v4499_v46, %v3409_v49  ;;  %v3408_v52 = vadd.f32 %v3402_v50, %v3262_v40 }
 0x499   :  { %v3420_v53 = vmax.f32 %v3418_v43, 0.0  ;;  %v3410_v0 = vmax.f32 %v3407_v51, %v3408_v52 }
 0x49b   :  { %v3423_v54 = vrot.slane %v3420_v53, 1  ;;  %v5788_v55 = vadd.f32 %v4499_v46, %v3410_v0 }
 0x49d   :  { %v3425_v56 = vmax.f32 %v3420_v53, %v3423_v54  ;;  %v3421_v21 = vmax.f32 %v5788_v55, 0.0 }
 0x49f   :  { %v3426_v58 = vpack.c.bf16 %v3425_v56, %v3425_v56  ;;  %v3853_v23 = vrot.slane %v3421_v21, 1 }
 0x4a1   :  { %4804 = vmatmul.mubr.bf16.vlgmr.msra.gmra.mxu0 %v3426_v58  ;;  %v3460_v60 = vrot.slane %v3426_v58, 1  ;;  %v3761_v13 = vrot.slane %v3426_v58, 3  ;;  %v3654_v15 = vrot.slane %v3426_v58, 2  ;;  %v3855_v25 = vmax.f32 %v3421_v21, %v3853_v23 }
 0x4a2   :  { %4828 = vmatpush3.bf16.msra.mxu0 %v5275_v57  ;;  %4843 = vmatprep.mubr.msk.bf16.mxu0 %vm5433_vm2, %v5432_v5 }
 0x4a3   :  { %4784 = vmatmul.mubr.bf16.vlgmr.msra.gmra.mxu1 %v3460_v60  ;;  %4829 = vmatprep.subr.bf16.mxu0 %v5432_v5  ;;  %v3856_v26 = vpack.c.bf16 %v3855_v25, %v3855_v25 }
 0x4a4   :  { %4808 = vmatpush3.bf16.msra.mxu1 %v5276_v59  ;;  %4823 = vmatprep.mubr.msk.bf16.mxu1 %vm5433_vm2, %v5432_v5 }
 0x4a5   :  { %4809 = vmatprep.subr.bf16.mxu1 %v5432_v5 }
 0x4a6   :  { %4830 = vmatpush3.bf16.msra.mxu0 %v5277_v61 }
 0x4a7   :  { %4831 = vmatprep.subr.bf16.mxu0 %v5432_v5 }
 0x4a8   :  { %4810 = vmatpush3.bf16.msra.mxu1 %v5278_v62 }
 0x4a9   :  { %4811 = vmatprep.subr.bf16.mxu1 %v5432_v5 }
 0x4aa   :  { %4832 = vmatpush3.bf16.msra.mxu0 %v5279_v63 }
 0x4ab   :  { %4833 = vmatprep.subr.bf16.mxu0 %v5432_v5 }
 0x4ac   :  { %4812 = vmatpush3.bf16.msra.mxu1 %v5280_v1  ;;  %v4540_v1 = vld [vmem:[%s5881_s6] ss:$0 sm:$0xff] }
 0x4ad   :  { %4813 = vmatprep.subr.bf16.mxu1 %v5432_v5 }
 0x4ae   :  { %4834 = vmatpush3.bf16.msra.mxu0 %v5281_v2 }
 0x4af   :  { %4835 = vmatprep.subr.bf16.mxu0 %v5432_v5 }
 0x4b0   :  { %4814 = vmatpush3.bf16.msra.mxu1 %v5282_v3 }
 0x4b1   :  { %4815 = vmatprep.subr.bf16.mxu1 %v5432_v5 }
 0x4b2   :  { %4836 = vmatpush3.bf16.msra.mxu0 %v5283_v4 }
 0x4b3   :  { %4837 = vmatprep.subr.bf16.mxu0 %v5432_v5 }
 0x4b4   :  { %4816 = vmatpush3.bf16.msra.mxu1 %v5284_v6 }
 0x4b5   :  { %4817 = vmatprep.subr.bf16.mxu1 %v5432_v5 }
 0x4b6   :  { %4838 = vmatpush3.bf16.msra.mxu0 %v5285_v7  ;;  %v5313_v7 = vld [vmem:[#allocation10 + $0x8] sm:$0xff]  }
 0x4b7   :  { %4839 = vmatprep.subr.bf16.mxu0 %v5432_v5 }
 0x4b8   :  { %4818 = vmatpush3.bf16.msra.mxu1 %v5286_v8  ;;  %v5314_v8 = vld [vmem:[#allocation10] sm:$0xff]  }
 0x4b9   :  { %4819 = vmatprep.subr.bf16.mxu1 %v5432_v5 }
 0x4ba   :  { %4840 = vmatpush3.bf16.msra.mxu0 %v5287_v9  ;;  %v4541_v9 = vld [vmem:[%s5883_s8] ss:$0 sm:$0xff]  ;;  %s5395_s8 = scalar_lea.vmem %s4206_s23, 32 }
 0x4bb   :  { %4841 = vmatprep.subr.bf16.mxu0 %v5432_v5  ;;  %p5396_p6 = scmp.ne.s32.totalorder %s4206_s23, %s5395_s8  ;;  %p5401_p8 = scmp.lt.s32.totalorder %s5395_s8, %s5395_s8 }
 0x4bc   :  { %4820 = vmatpush3.bf16.msra.mxu1 %v5288_v10 }
 0x4bd   :  { %4821 = vmatprep.subr.bf16.mxu1 %v5432_v5  ;;  %p5402_p9 = por %p5401_p8, %p5400_p7 }
 0x4be   :  { %4842 = vmatpush3.bf16.msra.mxu0 %v5289_v11 }
 0x4bf   :  { %4867 = vmatprep.subr.bf16.mxu0 %v5432_v5  ;;  %p5403_p10 = pnand %p5402_p9, %p5396_p6 }
 0x4c0   :  { %4822 = vmatpush3.bf16.msra.mxu1 %v5290_v12 }
 0x4c1   :  { %4844 = vmatmul.mubr.bf16.vlgmr.msra.gmra.mxu0 %v3761_v13  ;;  %4847 = vmatprep.subr.bf16.mxu1 %v5432_v5 }
 0x4c2   :  { %4883 = vmatprep.mubr.msk.bf16.mxu0 %vm5433_vm2, %v5432_v5  ;;  %4868 = vmatpush3.bf16.msra.mxu0 %v5299_v27 }
 0x4c3   :  { %4824 = vmatmul.mubr.bf16.vlgmr.msra.gmra.mxu1 %v3654_v15  ;;  %4869 = vmatprep.subr.bf16.mxu0 %v5432_v5 }
 0x4c4   :  { %4848 = vmatpush3.bf16.msra.mxu1 %v5291_v14  ;;  %4863 = vmatprep.mubr.msk.bf16.mxu1 %vm5433_vm2, %v5432_v5 }
 0x4c5   :  { %4849 = vmatprep.subr.bf16.mxu1 %v5432_v5 }
 0x4c6   :  { %4870 = vmatpush3.bf16.msra.mxu0 %v5300_v28 }
 0x4c7   :  { %4871 = vmatprep.subr.bf16.mxu0 %v5432_v5 }
 0x4c8   :  { %4850 = vmatpush3.bf16.msra.mxu1 %v5292_v16 }
 0x4c9   :  { %4851 = vmatprep.subr.bf16.mxu1 %v5432_v5 }
 0x4ca   :  { %4872 = vmatpush3.bf16.msra.mxu0 %v5301_v29 }
 0x4cb   :  { %4873 = vmatprep.subr.bf16.mxu0 %v5432_v5 }
 0x4cc   :  { %4852 = vmatpush3.bf16.msra.mxu1 %v5293_v17  ;;  %v4550_v17 = vld [vmem:[%s5885_s10] ss:$0 sm:$0xff] }
 0x4cd   :  { %4853 = vmatprep.subr.bf16.mxu1 %v5432_v5 }
 0x4ce   :  { %4874 = vmatpush3.bf16.msra.mxu0 %v5302_v30 }
 0x4cf   :  { %4875 = vmatprep.subr.bf16.mxu0 %v5432_v5 }
 0x4d0   :  { %4854 = vmatpush3.bf16.msra.mxu1 %v5294_v18 }
 0x4d1   :  { %4855 = vmatprep.subr.bf16.mxu1 %v5432_v5 }
 0x4d2   :  { %4876 = vmatpush3.bf16.msra.mxu0 %v5303_v31 }
 0x4d3   :  { %4877 = vmatprep.subr.bf16.mxu0 %v5432_v5 }
 0x4d4   :  { %4856 = vmatpush3.bf16.msra.mxu1 %v5295_v19 }
 0x4d5   :  { %4857 = vmatprep.subr.bf16.mxu1 %v5432_v5 }
 0x4d6   :  { %4878 = vmatpush3.bf16.msra.mxu0 %v5304_v32 }
 0x4d7   :  { %4879 = vmatprep.subr.bf16.mxu0 %v5432_v5 }
 0x4d8   :  { %4858 = vmatpush3.bf16.msra.mxu1 %v5296_v20 }
 0x4d9   :  { %4859 = vmatprep.subr.bf16.mxu1 %v5432_v5 }
 0x4da   :  { %4880 = vmatpush3.bf16.msra.mxu0 %v5305_v33 }
 0x4db   :  { %4881 = vmatprep.subr.bf16.mxu0 %v5432_v5 }
 0x4dc   :  { %4860 = vmatpush3.bf16.msra.mxu1 %v5297_v22 }
 0x4dd   :  { %4861 = vmatprep.subr.bf16.mxu1 %v5432_v5 }
 0x4de   :  { %4882 = vmatpush3.bf16.msra.mxu0 %v5306_v34 }
 0x4e0   :  { %4862 = vmatpush3.bf16.msra.mxu1 %v5298_v24 }
 0x4e1   :  { %4887 = vmatprep.subr.bf16.mxu1 %v5432_v5 }
 0x4e3   :  { %4864 = vmatmul.mubr.bf16.vlgmr.msra.gmra.mxu1 %v3856_v26 }
 0x4e4   :  { %4903 = vmatprep.mubr.msk.bf16.mxu1 %vm5433_vm2, %v5432_v5  ;;  %4888 = vmatpush3.bf16.msra.mxu1 %v5307_v35 }
 0x4e5   :  { %4889 = vmatprep.subr.bf16.mxu1 %v5432_v5 }
 0x4e8   :  { %4890 = vmatpush3.bf16.msra.mxu1 %v5308_v36 }
 0x4e9   :  { %4891 = vmatprep.subr.bf16.mxu1 %v5432_v5 }
 0x4ec   :  { %4892 = vmatpush3.bf16.msra.mxu1 %v5309_v37 }
 0x4ed   :  { %4893 = vmatprep.subr.bf16.mxu1 %v5432_v5 }
 0x4f0   :  { %4894 = vmatpush3.bf16.msra.mxu1 %v5310_v38 }
 0x4f1   :  { %4895 = vmatprep.subr.bf16.mxu1 %v5432_v5 }
 0x4f4   :  { %4896 = vmatpush3.bf16.msra.mxu1 %v5311_v41 }
 0x4f5   :  { %4897 = vmatprep.subr.bf16.mxu1 %v5432_v5 }
 0x4f8   :  { %4898 = vmatpush3.bf16.msra.mxu1 %v5312_v39 }
 0x4f9   :  { %4899 = vmatprep.subr.bf16.mxu1 %v5432_v5 }
 0x4fc   :  { %4900 = vmatpush3.bf16.msra.mxu1 %v5313_v7 }
 0x4fd   :  { %4901 = vmatprep.subr.bf16.mxu1 %v5432_v5 }
 0x500   :  { %4902 = vmatpush3.bf16.msra.mxu1 %v5314_v8 }
 0x561   :  { %v3632_v42 = vpop.f32.mrf.mxu0 }
 0x563   :  { %v3544_v44 = vpop.f32.mrf.mxu1  ;;  %v4805_v45 = vpop.f32.mrf.mxu0 }
 0x564   :  { %v3633_v56 = vadd.f32 %v3632_v42, %v3544_v44 }
 0x565   :  { %v4785_v46 = vpop.f32.mrf.mxu1  ;;  %v3635_v47 = vpop.f32.mrf.mxu0 }
 0x567   :  { %v3547_v48 = vpop.f32.mrf.mxu1  ;;  %v4806_v40 = vpop.f32.mrf.mxu0 }
 0x569   :  { %v4786_v49 = vpop.f32.mrf.mxu1 }
 0x581   :  { %v3845_v50 = vpop.f32.mrf.mxu0 }
 0x583   :  { %v3738_v43 = vpop.f32.mrf.mxu1  ;;  %v4845_v51 = vpop.f32.mrf.mxu0 }
 0x584   :  { %v3744_v57 = vadd.f32 %v3738_v43, %v3633_v56 }
 0x585   :  { %v4825_v52 = vpop.f32.mrf.mxu1  ;;  %v3848_v53 = vpop.f32.mrf.mxu0 }
 0x586   :  { %v3851_v58 = vadd.f32 %v3845_v50, %v3744_v57 }
 0x587   :  { %v3741_v0 = vpop.f32.mrf.mxu1  ;;  %v4846_v54 = vpop.f32.mrf.mxu0 }
 0x589   :  { %v4826_v55 = vpop.f32.mrf.mxu1 }
 0x5a3   :  { %v3955_v59 = vpop.f32.mrf.mxu1 }
 0x5a4   :  { %v3961_v60 = vadd.f32 %v3955_v59, %v3851_v58 }
 0x5a5   :  { %v4865_v61 = vpop.f32.mrf.mxu1 }
 0x5a6   :  { %3962 = vst [vmem:[#allocation3 + $0x1] sm:$0x1] %v3961_v60 }
 0x5a7   :  { %v3958_v62 = vpop.f32.mrf.mxu1 }
 0x5a9   :  { %v4866_v63 = vpop.f32.mrf.mxu1 }
 0x5ad   :  { %v3963_v2 = vld [vmem:[#allocation3] sm:$0x3] }
 0x5ae   :  { %v3971_v3 = vadd.f32 %v4540_v1, %v3963_v2 }
 0x5b0   :  { %v3972_v4 = vmax.f32 %v3971_v3, 0.0 }
 0x5b2   :  { %v3973_v6 = vpack.c.bf16 %v3972_v4, %v3972_v4 }
 0x5b4   :  { %4884 = vmatmul.mubr.bf16.vlgmr.msra.gmra.mxu0 %v3973_v6 }
 0x674   :  { %v4079_v10 = vpop.f32.mrf.mxu0 }
 0x675   :  { %v4080_v11 = vadd.f32 %v4541_v9, %v4079_v10 }
 0x676   :  { %v4885_v12 = vpop.f32.mrf.mxu0 }
 0x677   :  { %v4085_v13 = vmax.f32 %v4080_v11, 0.0 }
 0x678   :  { %v4082_v14 = vpop.f32.mrf.mxu0 }
 0x679   :  { %v4086_v15 = vpack.c.bf16 %v4085_v13, %v4085_v13 }
 0x67a   :  { %v4886_v16 = vpop.f32.mrf.mxu0 }
 0x67b   :  { %4904 = vmatmul.mubr.bf16.vlgmr.msra.gmra.mxu1 %v4086_v15 }
 0x73b   :  { %v4192_v5 = vpop.f32.mrf.mxu1 }
 0x73c   :  { %v4193_v18 = vadd.f32 %v4550_v17, %v4192_v5 }
 0x73d   :  { %v4905_v19 = vpop.f32.mrf.mxu1 }
 0x73e   :  { %4198 = vst [vmem:[#allocation12] sm:$0x3] %v4193_v18 }
 0x73f   :  { %v4195_v20 = vpop.f32.mrf.mxu1 }
 0x740   :  { %5406 = shalt.err (!%p5403_p10)
}
 0x741   :  { %4208 = dma.vmem_to_hbm [thread:$0]  %s4206_s23, 32, %s5886_s11, [#allocation6]   ;;  %v4906_v21 = vpop.f32.mrf.mxu1 }
 0x742   :  { %5421 = dma.done.wait [#allocation6], 32  }
 0x743   :  { %5422 = vsyncadd [#allocation6], 4294967264 }
 0x744   :  { %4212 = vsyncpa [#allocation5], 1 }
 0x745   :  { %4213 = vsyncpa [#allocation8], 1 }
 0x746   :  { %4214 = vsyncpa [#allocation11], 1 }
 0x747   :  { %4215 = vsyncpa [#allocation6], 1 }

</bundles_post_ra>
